<compile_context>
chip_gen: v7x
topology: tpu7x:2x2x1
jax: 0.10.0
libtpu: 0.0.40
codegen_flags: <defaults>
</compile_context>

<pallas_src>
import functools

import jax
import jax.numpy as jnp
from jax.experimental import pallas as pl
from jax.experimental.pallas import tpu as pltpu

EPS = 1e-5


# ---------------------------------------------------------------------------
# Small helpers
# ---------------------------------------------------------------------------
def _round_up(x, m):
    return (x + m - 1) // m * m


def _pick_tile(total, target, mult=1):
    """Largest divisor of `total` that is a multiple of `mult` and <= target."""
    if total <= target:
        return total
    cand = max(mult, (target // mult) * mult)
    while cand >= mult:
        if total % cand == 0:
            return cand
        cand -= mult
    return total


@functools.lru_cache(maxsize=None)
def _vmem_limit_bytes():
    # Raise the scoped-VMEM limit on 128 MiB parts (v5e/v6e); keep it tight on v7x.
    cap = 64 * 1024 * 1024
    try:
        info = pltpu.get_tpu_info()
        cap = int(getattr(info, "vmem_capacity_bytes", cap))
    except Exception:
        pass
    return int(min(cap * 3 // 4, 112 * 1024 * 1024))


# ---------------------------------------------------------------------------
# Kernels
# ---------------------------------------------------------------------------
def _maxpool_kernel(x_ref, o_ref):
    # x_ref block: (1, 2*th, 2*W2, C) dense NHWC  ->  o_ref block: (1, th, W2, C)
    x = x_ref[0]                                   # (2*th, 2*W2, C)
    hh, ww, c = x.shape
    x = x.reshape(hh // 2, 2, ww, c)               # split H (major dim) only
    a = jnp.maximum(x[:, 0], x[:, 1])              # H-pair max  (th, 2*W2, C)
    a = a.reshape(hh // 2, ww // 2, 2, c)          # split W (sublane dim)
    o_ref[0] = jnp.maximum(a[:, :, 0], a[:, :, 1])  # W-pair max (th, W2, C)


def _conv_bn_relu_kernel(x_ref, w_ref, s_ref, t_ref, m_ref, o_ref, *,
                         tm, chunk, wp, pack):
    # x_ref: (1, Larr, Cin) bf16  padded-flat input buffer (resident per batch elem)
    # w_ref: (3, 3*Cin, Cout) [packed] or (9, Cin, Cout) bf16 (grid-invariant)
    # s/t  : (1, Cout) f32   folded conv-bias + eval-mode BatchNorm scale / shift
    # m_ref: (tm, 1) f32     1.0 on interior output rows, 0.0 on pad / junk rows
    # o_ref: (1, tm, Cout)   one flat row tile of the padded-flat output buffer
    cout = o_ref.shape[-1]
    scale = s_ref[...]
    shift = t_ref[...]
    tile = pl.multiple_of(pl.program_id(1) * tm, 8)

    for j in range(tm // chunk):                   # keep the f32 acc in vregs
        row0 = j * chunk
        acc = jnp.zeros((chunk, cout), jnp.float32)
        if pack:
            # One aligned slab load per dy; the 3 dx taps are packed along K.
            for dy in range(3):
                start = pl.multiple_of(tile + row0 + dy * wp, 8)
                slab = x_ref[0, pl.ds(start, chunk + 8), :]
                lhs = jnp.concatenate(
                    [slab[dx:dx + chunk, :] for dx in range(3)], axis=-1)
                acc = acc + jnp.dot(lhs, w_ref[dy],
                                    preferred_element_type=jnp.float32)
        else:
            # 9 shifted (chunk, Cin) GEMMs with f32 accumulation (large-Cin path).
            for dy in range(3):
                for dx in range(3):
                    start = tile + row0 + dy * wp + dx
                    xs = x_ref[0, pl.ds(start, chunk), :]
                    acc = acc + jnp.dot(xs, w_ref[3 * dy + dx],
                                        preferred_element_type=jnp.float32)

        y = acc * scale + shift                    # f32 epilogue (no bf16 VPU paths)
        m = m_ref[pl.ds(row0, chunk), :]
        y = jnp.where(m > 0.5, jnp.maximum(y, 0.0), 0.0)   # ReLU + zero pad ring
        o_ref[0, pl.ds(row0, chunk), :] = y.astype(o_ref.dtype)


# ---------------------------------------------------------------------------
# Wrappers
# ---------------------------------------------------------------------------
def maxpool2x2(x_nhwc):
    N, H, W, C = x_nhwc.shape
    H2, W2 = H // 2, W // 2
    x_c = x_nhwc[:, :2 * H2, :2 * W2, :]           # MaxPool2d(2) floors odd dims
    row_pair_bytes = 2 * (2 * W2) * C * x_nhwc.dtype.itemsize
    th = _pick_tile(H2, max(1, (4 << 20) // max(row_pair_bytes, 1)), 1)
    return pl.pallas_call(
        _maxpool_kernel,
        out_shape=jax.ShapeDtypeStruct((N, H2, W2, C), x_nhwc.dtype),
        grid=(N, H2 // th),
        in_specs=[pl.BlockSpec((1, 2 * th, 2 * W2, C), lambda n, t: (n, t, 0, 0))],
        out_specs=pl.BlockSpec((1, th, W2, C), lambda n, t: (n, t, 0, 0)),
        compiler_params=pltpu.CompilerParams(
            dimension_semantics=("parallel", "parallel"),
            vmem_limit_bytes=_vmem_limit_bytes()),
    )(x_c)


def conv3x3_bn_relu_flat(x_flat, w_oihw, b, gamma, beta, rmean, rvar, *,
                         wp, h_img, w_img, lgrid, larr, b_off, tm, chunk, out_dtype):
    """3x3 conv (pad=1) + eval-mode BN + ReLU on a padded-flat (N, Larr, Cin) buffer.

    Input image (with its zero pad ring) lives at rows [b_off+wp+1, b_off+wp+1+(h+2)*wp);
    the output image (pad ring zeroed in-kernel) is written at rows
    [b_off, b_off+(h+2)*wp) of the returned (N, Larr, Cout) buffer, so it can be fed
    straight into the next conv stage with no XLA repacking."""
    N, _, cin = x_flat.shape
    cout = w_oihw.shape[0]
    pack = (3 * cin <= 128)

    # Fold conv bias + eval-mode BatchNorm into per-channel scale / shift (f32).
    s = (gamma / jnp.sqrt(rvar + EPS)).astype(jnp.float32)
    t = ((b - rmean) * s + beta).astype(jnp.float32)
    s2, t2 = s.reshape(1, cout), t.reshape(1, cout)

    # Weights: (Cout, Cin, 3, 3) -> (3, 3*Cin, Cout) [packed] or (9, Cin, Cout), bf16.
    wk = jnp.transpose(w_oihw, (2, 3, 1, 0)).astype(jnp.bfloat16)   # (3,3,Cin,Cout)
    w_r = wk.reshape(3, 3 * cin, cout) if pack else wk.reshape(9, cin, cout)

    # Interior-row mask (1.0 where the flat row is a real output pixel).
    rows = jnp.arange(lgrid, dtype=jnp.int32)
    p = rows - b_off
    hp_i, wq = p // wp, p % wp
    mask = ((hp_i >= 1) & (hp_i <= h_img) & (wq >= 1) & (wq <= w_img))
    mask = mask.astype(jnp.float32)[:, None]                        # (lgrid, 1)

    out_itemsize = jnp.dtype(out_dtype).itemsize
    cost = pl.CostEstimate(
        flops=2 * N * lgrid * 9 * cin * cout,
        transcendentals=0,
        bytes_accessed=(N * larr * cin * 2 + int(w_r.size) * 2 + 2 * cout * 4
                        + lgrid * 4 + N * lgrid * cout * out_itemsize))

    kernel = functools.partial(_conv_bn_relu_kernel, tm=tm, chunk=chunk,
                               wp=wp, pack=pack)
    return pl.pallas_call(
        kernel,
        out_shape=jax.ShapeDtypeStruct((N, larr, cout), out_dtype),
        grid=(N, lgrid // tm),
        in_specs=[
            pl.BlockSpec((1, larr, cin), lambda n, t: (n, 0, 0)),    # resident per n
            pl.BlockSpec(w_r.shape, lambda n, t: (0, 0, 0)),         # resident
            pl.BlockSpec((1, cout), lambda n, t: (0, 0)),            # resident
            pl.BlockSpec((1, cout), lambda n, t: (0, 0)),            # resident
            pl.BlockSpec((tm, 1), lambda n, t: (t, 0)),
        ],
        out_specs=pl.BlockSpec((1, tm, cout), lambda n, t: (n, t, 0)),
        compiler_params=pltpu.CompilerParams(
            dimension_semantics=("parallel", "parallel"),
            vmem_limit_bytes=_vmem_limit_bytes()),
        cost_estimate=cost,
    )(x_flat, w_r, s2, t2, mask)


def down_forward(x_nchw, params):
    """Pallas implementation of Down.forward (NCHW in, NCHW f32 out, eval-mode BN)."""
    x = jnp.transpose(x_nchw, (0, 2, 3, 1)).astype(jnp.bfloat16)    # NCHW -> NHWC
    pooled = maxpool2x2(x)                                          # (N, H2, W2, Cin)
    N, H2, W2, cin = pooled.shape
    cmid = params["conv1"][0].shape[0]
    cout = params["conv2"][0].shape[0]

    # Shared padded-flat geometry for the two chained conv stages.
    wp = _round_up(W2 + 2, 8)          # padded row stride (multiple of 8 => aligned)
    hp = H2 + 2
    a1 = 2 * (wp + 1)                  # conv1 input image offset
    b1 = wp + 1                        # conv1 output / conv2 input image offset
    b2 = 0                             # conv2 output image offset
    needed = hp * wp + wp + 1          # rows that the grid must cover

    cmax = max(cin, cmid, cout, 8)
    chunk = max(8, min(512, (32768 // cmax) // 8 * 8))   # f32 acc <= ~32 KiB / chunk
    chunk = min(chunk, _round_up(needed, 8))
    n_chunks = -(-needed // chunk)
    tm = chunk * max(1, min(max(1, 512 // chunk), n_chunks))
    lgrid = _round_up(needed, tm)
    larr = lgrid + 2 * wp + 8          # trailing slack covers the per-dy slab reads

    # Build conv1's padded-flat input: image (with pad ring) at rows [a1, a1+hp*wp).
    xp = jnp.pad(pooled, ((0, 0), (1, 1), (1, wp - W2 - 1), (0, 0)))
    xf = xp.reshape(N, hp * wp, cin)
    xf = jnp.pad(xf, ((0, 0), (a1, larr - a1 - hp * wp), (0, 0)))

    y1 = conv3x3_bn_relu_flat(xf, *params["conv1"], wp=wp, h_img=H2, w_img=W2,
                              lgrid=lgrid, larr=larr, b_off=b1, tm=tm, chunk=chunk,
                              out_dtype=jnp.bfloat16)
    y2 = conv3x3_bn_relu_flat(y1, *params["conv2"], wp=wp, h_img=H2, w_img=W2,
                              lgrid=lgrid, larr=larr, b_off=b2, tm=tm, chunk=chunk,
                              out_dtype=jnp.float32)

    out = y2[:, :hp * wp, :].reshape(N, hp, wp, cout)[:, 1:1 + H2, 1:1 + W2, :]
    return jnp.transpose(out, (0, 3, 1, 2))                         # NHWC -> NCHW


# ---------------------------------------------------------------------------
# Parameter init (deterministic, synthetic) and pure-JAX references
# ---------------------------------------------------------------------------
def _conv_bn_params(key, cin, cout):
    kw, kb, kg, kbeta, km, kv = jax.random.split(key, 6)
    w = 0.2 * jax.random.normal(kw, (cout, cin, 3, 3), jnp.float32)
    b = 0.1 * jax.random.normal(kb, (cout,), jnp.float32)
    gamma = 1.0 + 0.1 * jax.random.normal(kg, (cout,), jnp.float32)
    beta = 0.1 * jax.random.normal(kbeta, (cout,), jnp.float32)
    rmean = 0.05 * jax.random.normal(km, (cout,), jnp.float32)
    rvar = 1.0 + 0.1 * jax.random.uniform(kv, (cout,), jnp.float32)
    return (w, b, gamma, beta, rmean, rvar)


def init_down_params(key, in_channels, out_channels):
    mid_channels = out_channels  # DoubleConv default
    k1, k2 = jax.random.split(key)
    return {"conv1": _conv_bn_params(k1, in_channels, mid_channels),
            "conv2": _conv_bn_params(k2, mid_channels, out_channels)}


def down_reference_f32(x_nchw, params):
    """Pure-f32 JAX reference mirroring the PyTorch module (eval-mode BN)."""
    x = jnp.transpose(x_nchw, (0, 2, 3, 1))
    N, H, W, C = x.shape
    H2, W2 = H // 2, W // 2
    x = x[:, :2 * H2, :2 * W2, :].reshape(N, H2, 2, W2, 2, C).max(axis=(2, 4))

    def block(x, w, b, g, beta, rm, rv):
        y = jax.lax.conv_general_dilated(
            x, jnp.transpose(w, (2, 3, 1, 0)), (1, 1), "SAME",
            dimension_numbers=("NHWC", "HWIO", "NHWC"),
            precision=jax.lax.Precision.HIGHEST) + b
        y = (y - rm) / jnp.sqrt(rv + EPS) * g + beta
        return jnp.maximum(y, 0.0)

    x = block(x, *params["conv1"])
    x = block(x, *params["conv2"])
    return jnp.transpose(x, (0, 3, 1, 2))


def down_reference_mixed(x_nchw, params):
    """Mirrors the kernel's precision & tap grouping: bf16 operands, f32 MXU
    accumulation (same per-dy K-packing), f32 epilogue, bf16 mid activation."""
    x = jnp.transpose(x_nchw, (0, 2, 3, 1)).astype(jnp.bfloat16)
    N, H, W, C = x.shape
    H2, W2 = H // 2, W // 2
    x = x[:, :2 * H2, :2 * W2, :].reshape(N, H2, 2, W2, 2, C).max(axis=(2, 4))

    def block(x, w, b, g, beta, rm, rv, out_dtype):
        cout, cin = w.shape[0], w.shape[1]
        s = (g / jnp.sqrt(rv + EPS)).astype(jnp.float32)
        t = ((b - rm) * s + beta).astype(jnp.float32)
        wk = jnp.transpose(w, (2, 3, 1, 0)).astype(jnp.bfloat16)     # (3,3,cin,cout)
        xp = jnp.pad(x.astype(jnp.bfloat16), ((0, 0), (1, 1), (1, 1), (0, 0)))
        n, h2, w2 = x.shape[0], x.shape[1], x.shape[2]
        acc = jnp.zeros((n, h2, w2, cout), jnp.float32)
        if 3 * cin <= 128:
            for dy in range(3):
                lhs = jnp.concatenate(
                    [xp[:, dy:dy + h2, dx:dx + w2, :] for dx in range(3)], axis=-1)
                acc = acc + jnp.dot(lhs, wk[dy].reshape(3 * cin, cout),
                                    preferred_element_type=jnp.float32)
        else:
            for dy in range(3):
                for dx in range(3):
                    acc = acc + jnp.dot(xp[:, dy:dy + h2, dx:dx + w2, :], wk[dy, dx],
                                        preferred_element_type=jnp.float32)
        y = acc * s.reshape(1, cout) + t.reshape(1, cout)
        return jnp.maximum(y, 0.0).astype(out_dtype)

    x = block(x, *params["conv1"], jnp.bfloat16)
    x = block(x, *params["conv2"], jnp.float32)
    return jnp.transpose(x, (0, 3, 1, 2))


# ---------------------------------------------------------------------------
if __name__ == "__main__":
    down = jax.jit(down_forward)

    def run_case(seed, N, Cin, H, W, Cout):
        kx, kp = jax.random.split(jax.random.PRNGKey(seed))
        x = jax.random.normal(kx, (N, Cin, H, W), jnp.float32)
        params = init_down_params(kp, Cin, Cout)

        out = jax.block_until_ready(down(x, params))
        assert out.shape == (N, Cout, H // 2, W // 2), out.shape
        assert out.dtype == jnp.float32

        # Tight check: reference using the identical precision policy / tap grouping.
        ref_m = jax.block_until_ready(down_reference_mixed(x, params))
        assert jnp.allclose(out, ref_m, rtol=1e-2, atol=1e-2), \
            float(jnp.max(jnp.abs(out - ref_m)))

        # Loose sanity check vs. full-f32 PyTorch-semantics reference (covers the
        # bf16 operand rounding through the pool and two convs).
        ref_f = jax.block_until_ready(down_reference_f32(x, params))
        assert jnp.allclose(out, ref_f, rtol=5e-2, atol=2e-1), \
            float(jnp.max(jnp.abs(out - ref_f)))

    run_case(0, 2, 4, 16, 16, 8)    # small-Cin path: dx taps packed along K
    run_case(1, 2, 64, 8, 8, 8)     # large-Cin path: 9 shifted GEMMs

    print("KERNEL_OK")
</pallas_src>

<mosaic_0001>
module attributes {stable_mosaic.version = 11 : i64} {
  func.func @_maxpool_kernel(%arg0: i32, %arg1: i32, %arg2: memref<1x16x16x4xbf16, #tpu.memory_space<vmem>>, %arg3: memref<1x8x8x4xbf16, #tpu.memory_space<vmem>>) attributes {dimension_semantics = [#tpu.dimension_semantics<parallel>, #tpu.dimension_semantics<parallel>], iteration_bounds = array<i64: 2, 1>, scalar_prefetch = 0 : i64, scratch_operands = 0 : i64, tpu.core_type = #tpu.core_type<tc>, window_params = [{transform_indices = @transform_0, window_bounds = array<i64: 1, 16, 16, 4>}, {transform_indices = @transform_1, window_bounds = array<i64: 1, 8, 8, 4>}]} {
    %c0 = arith.constant 0 : index
    %c0_0 = arith.constant 0 : index
    %c0_1 = arith.constant 0 : index
    %c0_2 = arith.constant 0 : index
    %0 = vector.load %arg2[%c0, %c0_0, %c0_1, %c0_2] : memref<1x16x16x4xbf16, #tpu.memory_space<vmem>>, vector<1x16x16x4xbf16>
    %1 = vector.shape_cast %0 : vector<1x16x16x4xbf16> to vector<16x16x4xbf16>
    %2 = vector.shape_cast %1 : vector<16x16x4xbf16> to vector<8x2x16x4xbf16>
    %3 = vector.extract_strided_slice %2 {offsets = [0, 0, 0, 0], sizes = [8, 1, 16, 4], strides = [1, 1, 1, 1]} : vector<8x2x16x4xbf16> to vector<8x1x16x4xbf16>
    %4 = vector.shape_cast %3 : vector<8x1x16x4xbf16> to vector<8x16x4xbf16>
    %5 = vector.extract_strided_slice %2 {offsets = [0, 1, 0, 0], sizes = [8, 1, 16, 4], strides = [1, 1, 1, 1]} : vector<8x2x16x4xbf16> to vector<8x1x16x4xbf16>
    %6 = vector.shape_cast %5 : vector<8x1x16x4xbf16> to vector<8x16x4xbf16>
    %7 = arith.maximumf %4, %6 : vector<8x16x4xbf16>
    %8 = vector.shape_cast %7 : vector<8x16x4xbf16> to vector<8x8x2x4xbf16>
    %9 = vector.extract_strided_slice %8 {offsets = [0, 0, 0, 0], sizes = [8, 8, 1, 4], strides = [1, 1, 1, 1]} : vector<8x8x2x4xbf16> to vector<8x8x1x4xbf16>
    %10 = vector.shape_cast %9 : vector<8x8x1x4xbf16> to vector<8x8x4xbf16>
    %11 = vector.extract_strided_slice %8 {offsets = [0, 0, 1, 0], sizes = [8, 8, 1, 4], strides = [1, 1, 1, 1]} : vector<8x8x2x4xbf16> to vector<8x8x1x4xbf16>
    %12 = vector.shape_cast %11 : vector<8x8x1x4xbf16> to vector<8x8x4xbf16>
    %13 = arith.maximumf %10, %12 : vector<8x8x4xbf16>
    %c0_3 = arith.constant 0 : index
    %c0_4 = arith.constant 0 : index
    %c0_5 = arith.constant 0 : index
    %c0_6 = arith.constant 0 : index
    %14 = vector.load %arg3[%c0_3, %c0_4, %c0_5, %c0_6] : memref<1x8x8x4xbf16, #tpu.memory_space<vmem>>, vector<1x8x8x4xbf16>
    %15 = vector.shape_cast %14 : vector<1x8x8x4xbf16> to vector<8x8x4xbf16>
    %16 = vector.shape_cast %13 : vector<8x8x4xbf16> to vector<1x8x8x4xbf16>
    tpu.vector_store %arg3[%c0_3, %c0_4, %c0_5, %c0_6], %16 {strides = array<i32>} : memref<1x8x8x4xbf16, #tpu.memory_space<vmem>>, vector<1x8x8x4xbf16>,
    return
  }
  func.func @transform_0(%arg0: i32, %arg1: i32) -> (i32, i32, i32, i32) {
    %c0_i32 = arith.constant 0 : i32
    %c0_i32_0 = arith.constant 0 : i32
    %c0_i32_1 = arith.constant 0 : i32
    return %arg0, %arg1, %c0_i32, %c0_i32_0 : i32, i32, i32, i32
  }
  func.func @transform_1(%arg0: i32, %arg1: i32) -> (i32, i32, i32, i32) {
    %c0_i32 = arith.constant 0 : i32
    %c0_i32_0 = arith.constant 0 : i32
    %c0_i32_1 = arith.constant 0 : i32
    return %arg0, %arg1, %c0_i32, %c0_i32_0 : i32, i32, i32, i32
  }
}

module attributes {stable_mosaic.version = 11 : i64} {
  func.func @_conv_bn_relu_kernel(%arg0: i32, %arg1: i32, %arg2: memref<1x224x4xbf16, #tpu.memory_space<vmem>>, %arg3: memref<3x12x8xbf16, #tpu.memory_space<vmem>>, %arg4: memref<1x8xf32, #tpu.memory_space<vmem>>, %arg5: memref<1x8xf32, #tpu.memory_space<vmem>>, %arg6: memref<184x1xf32, #tpu.memory_space<vmem>>, %arg7: memref<1x184x8xbf16, #tpu.memory_space<vmem>>) attributes {dimension_semantics = [#tpu.dimension_semantics<parallel>, #tpu.dimension_semantics<parallel>], iteration_bounds = array<i64: 2, 1>, scalar_prefetch = 0 : i64, scratch_operands = 0 : i64, tpu.core_type = #tpu.core_type<tc>, window_params = [{transform_indices = @transform_0, window_bounds = array<i64: 1, 224, 4>}, {pipeline_mode = #tpu.pipeline_mode<synchronous>, transform_indices = @transform_1, window_bounds = array<i64: 3, 12, 8>}, {pipeline_mode = #tpu.pipeline_mode<synchronous>, transform_indices = @transform_2, window_bounds = array<i64: 1, 8>}, {pipeline_mode = #tpu.pipeline_mode<synchronous>, transform_indices = @transform_3, window_bounds = array<i64: 1, 8>}, {transform_indices = @transform_4, window_bounds = array<i64: 184, 1>}, {transform_indices = @transform_5, window_bounds = array<i64: 1, 184, 8>}]} {
    %c0 = arith.constant 0 : index
    %c0_0 = arith.constant 0 : index
    %0 = vector.load %arg4[%c0, %c0_0] : memref<1x8xf32, #tpu.memory_space<vmem>>, vector<1x8xf32>
    %c0_1 = arith.constant 0 : index
    %c0_2 = arith.constant 0 : index
    %1 = vector.load %arg5[%c0_1, %c0_2] : memref<1x8xf32, #tpu.memory_space<vmem>>, vector<1x8xf32>
    %c184_i32 = arith.constant 184 : i32
    %2 = arith.muli %arg1, %c184_i32 : i32
    %3 = tpu.assume_multiple %2, 8 : i32
    %cst = arith.constant 0.000000e+00 : f32
    %4 = vector.broadcast %cst : f32 to vector<184x8xf32>
    %c0_i32 = arith.constant 0 : i32
    %5 = arith.addi %3, %c0_i32 : i32
    %c0_i32_3 = arith.constant 0 : i32
    %6 = arith.addi %5, %c0_i32_3 : i32
    %7 = tpu.assume_multiple %6, 8 : i32
    %c0_4 = arith.constant 0 : index
    %8 = arith.index_cast %7 : i32 to index
    %c0_5 = arith.constant 0 : index
    %9 = vector.load %arg2[%c0_4, %8, %c0_5] : memref<1x224x4xbf16, #tpu.memory_space<vmem>>, vector<1x192x4xbf16>
    %10 = vector.shape_cast %9 : vector<1x192x4xbf16> to vector<192x4xbf16>
    %11 = vector.extract_strided_slice %10 {offsets = [0, 0], sizes = [184, 4], strides = [1, 1]} : vector<192x4xbf16> to vector<184x4xbf16>
    %12 = vector.extract_strided_slice %10 {offsets = [1, 0], sizes = [184, 4], strides = [1, 1]} : vector<192x4xbf16> to vector<184x4xbf16>
    %13 = vector.extract_strided_slice %10 {offsets = [2, 0], sizes = [184, 4], strides = [1, 1]} : vector<192x4xbf16> to vector<184x4xbf16>
    %14 = tpu.concatenate %11, %12, %13 in 1 : vector<184x4xbf16>, vector<184x4xbf16>, vector<184x4xbf16> -> vector<184x12xbf16>
    %c0_6 = arith.constant 0 : index
    %c0_7 = arith.constant 0 : index
    %c0_8 = arith.constant 0 : index
    %15 = vector.load %arg3[%c0_6, %c0_7, %c0_8] : memref<3x12x8xbf16, #tpu.memory_space<vmem>>, vector<1x12x8xbf16>
    %16 = vector.shape_cast %15 : vector<1x12x8xbf16> to vector<12x8xbf16>
    %cst_9 = arith.constant dense<0.000000e+00> : vector<184x8xf32>
    %17 = tpu.matmul %14, %16, %cst_9 {dimension_numbers = #tpu.dot_dimension_numbers<[1], [0], [0], [1], [0, 0, 1, 1], [], []>} : vector<184x12xbf16>, vector<12x8xbf16>, vector<184x8xf32> -> vector<184x8xf32>
    %18 = arith.addf %4, %17 : vector<184x8xf32>
    %c0_i32_10 = arith.constant 0 : i32
    %19 = arith.addi %3, %c0_i32_10 : i32
    %c16_i32 = arith.constant 16 : i32
    %20 = arith.addi %19, %c16_i32 : i32
    %21 = tpu.assume_multiple %20, 8 : i32
    %c0_11 = arith.constant 0 : index
    %22 = arith.index_cast %21 : i32 to index
    %c0_12 = arith.constant 0 : index
    %23 = vector.load %arg2[%c0_11, %22, %c0_12] : memref<1x224x4xbf16, #tpu.memory_space<vmem>>, vector<1x192x4xbf16>
    %24 = vector.shape_cast %23 : vector<1x192x4xbf16> to vector<192x4xbf16>
    %25 = vector.extract_strided_slice %24 {offsets = [0, 0], sizes = [184, 4], strides = [1, 1]} : vector<192x4xbf16> to vector<184x4xbf16>
    %26 = vector.extract_strided_slice %24 {offsets = [1, 0], sizes = [184, 4], strides = [1, 1]} : vector<192x4xbf16> to vector<184x4xbf16>
    %27 = vector.extract_strided_slice %24 {offsets = [2, 0], sizes = [184, 4], strides = [1, 1]} : vector<192x4xbf16> to vector<184x4xbf16>
    %28 = tpu.concatenate %25, %26, %27 in 1 : vector<184x4xbf16>, vector<184x4xbf16>, vector<184x4xbf16> -> vector<184x12xbf16>
    %c1 = arith.constant 1 : index
    %c0_13 = arith.constant 0 : index
    %c0_14 = arith.constant 0 : index
    %29 = vector.load %arg3[%c1, %c0_13, %c0_14] : memref<3x12x8xbf16, #tpu.memory_space<vmem>>, vector<1x12x8xbf16>
    %30 = vector.shape_cast %29 : vector<1x12x8xbf16> to vector<12x8xbf16>
    %cst_15 = arith.constant dense<0.000000e+00> : vector<184x8xf32>
    %31 = tpu.matmul %28, %30, %cst_15 {dimension_numbers = #tpu.dot_dimension_numbers<[1], [0], [0], [1], [0, 0, 1, 1], [], []>} : vector<184x12xbf16>, vector<12x8xbf16>, vector<184x8xf32> -> vector<184x8xf32>
    %32 = arith.addf %18, %31 : vector<184x8xf32>
    %c0_i32_16 = arith.constant 0 : i32
    %33 = arith.addi %3, %c0_i32_16 : i32
    %c32_i32 = arith.constant 32 : i32
    %34 = arith.addi %33, %c32_i32 : i32
    %35 = tpu.assume_multiple %34, 8 : i32
    %c0_17 = arith.constant 0 : index
    %36 = arith.index_cast %35 : i32 to index
    %c0_18 = arith.constant 0 : index
    %37 = vector.load %arg2[%c0_17, %36, %c0_18] : memref<1x224x4xbf16, #tpu.memory_space<vmem>>, vector<1x192x4xbf16>
    %38 = vector.shape_cast %37 : vector<1x192x4xbf16> to vector<192x4xbf16>
    %39 = vector.extract_strided_slice %38 {offsets = [0, 0], sizes = [184, 4], strides = [1, 1]} : vector<192x4xbf16> to vector<184x4xbf16>
    %40 = vector.extract_strided_slice %38 {offsets = [1, 0], sizes = [184, 4], strides = [1, 1]} : vector<192x4xbf16> to vector<184x4xbf16>
    %41 = vector.extract_strided_slice %38 {offsets = [2, 0], sizes = [184, 4], strides = [1, 1]} : vector<192x4xbf16> to vector<184x4xbf16>
    %42 = tpu.concatenate %39, %40, %41 in 1 : vector<184x4xbf16>, vector<184x4xbf16>, vector<184x4xbf16> -> vector<184x12xbf16>
    %c2 = arith.constant 2 : index
    %c0_19 = arith.constant 0 : index
    %c0_20 = arith.constant 0 : index
    %43 = vector.load %arg3[%c2, %c0_19, %c0_20] : memref<3x12x8xbf16, #tpu.memory_space<vmem>>, vector<1x12x8xbf16>
    %44 = vector.shape_cast %43 : vector<1x12x8xbf16> to vector<12x8xbf16>
    %cst_21 = arith.constant dense<0.000000e+00> : vector<184x8xf32>
    %45 = tpu.matmul %42, %44, %cst_21 {dimension_numbers = #tpu.dot_dimension_numbers<[1], [0], [0], [1], [0, 0, 1, 1], [], []>} : vector<184x12xbf16>, vector<12x8xbf16>, vector<184x8xf32> -> vector<184x8xf32>
    %46 = arith.addf %32, %45 : vector<184x8xf32>
    %47 = vector.broadcast %0 : vector<1x8xf32> to vector<184x8xf32>
    %48 = arith.mulf %46, %47 : vector<184x8xf32>
    %49 = vector.broadcast %1 : vector<1x8xf32> to vector<184x8xf32>
    %50 = arith.addf %48, %49 : vector<184x8xf32>
    %c0_22 = arith.constant 0 : index
    %c0_23 = arith.constant 0 : index
    %51 = vector.load %arg6[%c0_22, %c0_23] : memref<184x1xf32, #tpu.memory_space<vmem>>, vector<184x1xf32>
    %cst_24 = arith.constant 5.000000e-01 : f32
    %52 = vector.broadcast %cst_24 : f32 to vector<184x1xf32>
    %53 = arith.cmpf ogt, %51, %52 : vector<184x1xf32>
    %cst_25 = arith.constant 0.000000e+00 : f32
    %54 = vector.broadcast %cst_25 : f32 to vector<184x8xf32>
    %55 = arith.maximumf %50, %54 : vector<184x8xf32>
    %cst_26 = arith.constant 0.000000e+00 : f32
    %56 = vector.shape_cast %53 : vector<184x1xi1> to vector<184x1xi1>
    %57 = vector.broadcast %56 : vector<184x1xi1> to vector<184x8xi1>
    %58 = vector.broadcast %cst_26 : f32 to vector<184x8xf32>
    %59 = arith.select %57, %55, %58 : vector<184x8xi1>, vector<184x8xf32>
    %60 = arith.truncf %59 : vector<184x8xf32> to vector<184x8xbf16>
    %c0_27 = arith.constant 0 : index
    %c0_28 = arith.constant 0 : index
    %c0_29 = arith.constant 0 : index
    %61 = vector.load %arg7[%c0_27, %c0_28, %c0_29] : memref<1x184x8xbf16, #tpu.memory_space<vmem>>, vector<1x184x8xbf16>
    %62 = vector.shape_cast %61 : vector<1x184x8xbf16> to vector<184x8xbf16>
    %63 = vector.shape_cast %60 : vector<184x8xbf16> to vector<1x184x8xbf16>
    tpu.vector_store %arg7[%c0_27, %c0_28, %c0_29], %63 {strides = array<i32>} : memref<1x184x8xbf16, #tpu.memory_space<vmem>>, vector<1x184x8xbf16>,
    return
  }
  func.func @transform_0(%arg0: i32, %arg1: i32) -> (i32, i32, i32) {
    %c0_i32 = arith.constant 0 : i32
    %c0_i32_0 = arith.constant 0 : i32
    %c0_i32_1 = arith.constant 0 : i32
    return %arg0, %c0_i32, %c0_i32_0 : i32, i32, i32
  }
  func.func @transform_1(%arg0: i32, %arg1: i32) -> (i32, i32, i32) {
    %c0_i32 = arith.constant 0 : i32
    %c0_i32_0 = arith.constant 0 : i32
    %c0_i32_1 = arith.constant 0 : i32
    %c0_i32_2 = arith.constant 0 : i32
    return %c0_i32, %c0_i32_0, %c0_i32_1 : i32, i32, i32
  }
  func.func @transform_2(%arg0: i32, %arg1: i32) -> (i32, i32) {
    %c0_i32 = arith.constant 0 : i32
    %c0_i32_0 = arith.constant 0 : i32
    %c0_i32_1 = arith.constant 0 : i32
    return %c0_i32, %c0_i32_0 : i32, i32
  }
  func.func @transform_3(%arg0: i32, %arg1: i32) -> (i32, i32) {
    %c0_i32 = arith.constant 0 : i32
    %c0_i32_0 = arith.constant 0 : i32
    %c0_i32_1 = arith.constant 0 : i32
    return %c0_i32, %c0_i32_0 : i32, i32
  }
  func.func @transform_4(%arg0: i32, %arg1: i32) -> (i32, i32) {
    %c0_i32 = arith.constant 0 : i32
    %c0_i32_0 = arith.constant 0 : i32
    return %arg1, %c0_i32 : i32, i32
  }
  func.func @transform_5(%arg0: i32, %arg1: i32) -> (i32, i32, i32) {
    %c0_i32 = arith.constant 0 : i32
    %c0_i32_0 = arith.constant 0 : i32
    return %arg0, %arg1, %c0_i32 : i32, i32, i32
  }
}

module attributes {stable_mosaic.version = 11 : i64} {
  func.func @_conv_bn_relu_kernel(%arg0: i32, %arg1: i32, %arg2: memref<1x224x8xbf16, #tpu.memory_space<vmem>>, %arg3: memref<3x24x8xbf16, #tpu.memory_space<vmem>>, %arg4: memref<1x8xf32, #tpu.memory_space<vmem>>, %arg5: memref<1x8xf32, #tpu.memory_space<vmem>>, %arg6: memref<184x1xf32, #tpu.memory_space<vmem>>, %arg7: memref<1x184x8xf32, #tpu.memory_space<vmem>>) attributes {dimension_semantics = [#tpu.dimension_semantics<parallel>, #tpu.dimension_semantics<parallel>], iteration_bounds = array<i64: 2, 1>, scalar_prefetch = 0 : i64, scratch_operands = 0 : i64, tpu.core_type = #tpu.core_type<tc>, window_params = [{transform_indices = @transform_0, window_bounds = array<i64: 1, 224, 8>}, {pipeline_mode = #tpu.pipeline_mode<synchronous>, transform_indices = @transform_1, window_bounds = array<i64: 3, 24, 8>}, {pipeline_mode = #tpu.pipeline_mode<synchronous>, transform_indices = @transform_2, window_bounds = array<i64: 1, 8>}, {pipeline_mode = #tpu.pipeline_mode<synchronous>, transform_indices = @transform_3, window_bounds = array<i64: 1, 8>}, {transform_indices = @transform_4, window_bounds = array<i64: 184, 1>}, {transform_indices = @transform_5, window_bounds = array<i64: 1, 184, 8>}]} {
    %c0 = arith.constant 0 : index
    %c0_0 = arith.constant 0 : index
    %0 = vector.load %arg4[%c0, %c0_0] : memref<1x8xf32, #tpu.memory_space<vmem>>, vector<1x8xf32>
    %c0_1 = arith.constant 0 : index
    %c0_2 = arith.constant 0 : index
    %1 = vector.load %arg5[%c0_1, %c0_2] : memref<1x8xf32, #tpu.memory_space<vmem>>, vector<1x8xf32>
    %c184_i32 = arith.constant 184 : i32
    %2 = arith.muli %arg1, %c184_i32 : i32
    %3 = tpu.assume_multiple %2, 8 : i32
    %cst = arith.constant 0.000000e+00 : f32
    %4 = vector.broadcast %cst : f32 to vector<184x8xf32>
    %c0_i32 = arith.constant 0 : i32
    %5 = arith.addi %3, %c0_i32 : i32
    %c0_i32_3 = arith.constant 0 : i32
    %6 = arith.addi %5, %c0_i32_3 : i32
    %7 = tpu.assume_multiple %6, 8 : i32
    %c0_4 = arith.constant 0 : index
    %8 = arith.index_cast %7 : i32 to index
    %c0_5 = arith.constant 0 : index
    %9 = vector.load %arg2[%c0_4, %8, %c0_5] : memref<1x224x8xbf16, #tpu.memory_space<vmem>>, vector<1x192x8xbf16>
    %10 = vector.shape_cast %9 : vector<1x192x8xbf16> to vector<192x8xbf16>
    %11 = vector.extract_strided_slice %10 {offsets = [0, 0], sizes = [184, 8], strides = [1, 1]} : vector<192x8xbf16> to vector<184x8xbf16>
    %12 = vector.extract_strided_slice %10 {offsets = [1, 0], sizes = [184, 8], strides = [1, 1]} : vector<192x8xbf16> to vector<184x8xbf16>
    %13 = vector.extract_strided_slice %10 {offsets = [2, 0], sizes = [184, 8], strides = [1, 1]} : vector<192x8xbf16> to vector<184x8xbf16>
    %14 = tpu.concatenate %11, %12, %13 in 1 : vector<184x8xbf16>, vector<184x8xbf16>, vector<184x8xbf16> -> vector<184x24xbf16>
    %c0_6 = arith.constant 0 : index
    %c0_7 = arith.constant 0 : index
    %c0_8 = arith.constant 0 : index
    %15 = vector.load %arg3[%c0_6, %c0_7, %c0_8] : memref<3x24x8xbf16, #tpu.memory_space<vmem>>, vector<1x24x8xbf16>
    %16 = vector.shape_cast %15 : vector<1x24x8xbf16> to vector<24x8xbf16>
    %cst_9 = arith.constant dense<0.000000e+00> : vector<184x8xf32>
    %17 = tpu.matmul %14, %16, %cst_9 {dimension_numbers = #tpu.dot_dimension_numbers<[1], [0], [0], [1], [0, 0, 1, 1], [], []>} : vector<184x24xbf16>, vector<24x8xbf16>, vector<184x8xf32> -> vector<184x8xf32>
    %18 = arith.addf %4, %17 : vector<184x8xf32>
    %c0_i32_10 = arith.constant 0 : i32
    %19 = arith.addi %3, %c0_i32_10 : i32
    %c16_i32 = arith.constant 16 : i32
    %20 = arith.addi %19, %c16_i32 : i32
    %21 = tpu.assume_multiple %20, 8 : i32
    %c0_11 = arith.constant 0 : index
    %22 = arith.index_cast %21 : i32 to index
    %c0_12 = arith.constant 0 : index
    %23 = vector.load %arg2[%c0_11, %22, %c0_12] : memref<1x224x8xbf16, #tpu.memory_space<vmem>>, vector<1x192x8xbf16>
    %24 = vector.shape_cast %23 : vector<1x192x8xbf16> to vector<192x8xbf16>
    %25 = vector.extract_strided_slice %24 {offsets = [0, 0], sizes = [184, 8], strides = [1, 1]} : vector<192x8xbf16> to vector<184x8xbf16>
    %26 = vector.extract_strided_slice %24 {offsets = [1, 0], sizes = [184, 8], strides = [1, 1]} : vector<192x8xbf16> to vector<184x8xbf16>
    %27 = vector.extract_strided_slice %24 {offsets = [2, 0], sizes = [184, 8], strides = [1, 1]} : vector<192x8xbf16> to vector<184x8xbf16>
    %28 = tpu.concatenate %25, %26, %27 in 1 : vector<184x8xbf16>, vector<184x8xbf16>, vector<184x8xbf16> -> vector<184x24xbf16>
    %c1 = arith.constant 1 : index
    %c0_13 = arith.constant 0 : index
    %c0_14 = arith.constant 0 : index
    %29 = vector.load %arg3[%c1, %c0_13, %c0_14] : memref<3x24x8xbf16, #tpu.memory_space<vmem>>, vector<1x24x8xbf16>
    %30 = vector.shape_cast %29 : vector<1x24x8xbf16> to vector<24x8xbf16>
    %cst_15 = arith.constant dense<0.000000e+00> : vector<184x8xf32>
    %31 = tpu.matmul %28, %30, %cst_15 {dimension_numbers = #tpu.dot_dimension_numbers<[1], [0], [0], [1], [0, 0, 1, 1], [], []>} : vector<184x24xbf16>, vector<24x8xbf16>, vector<184x8xf32> -> vector<184x8xf32>
    %32 = arith.addf %18, %31 : vector<184x8xf32>
    %c0_i32_16 = arith.constant 0 : i32
    %33 = arith.addi %3, %c0_i32_16 : i32
    %c32_i32 = arith.constant 32 : i32
    %34 = arith.addi %33, %c32_i32 : i32
    %35 = tpu.assume_multiple %34, 8 : i32
    %c0_17 = arith.constant 0 : index
    %36 = arith.index_cast %35 : i32 to index
    %c0_18 = arith.constant 0 : index
    %37 = vector.load %arg2[%c0_17, %36, %c0_18] : memref<1x224x8xbf16, #tpu.memory_space<vmem>>, vector<1x192x8xbf16>
    %38 = vector.shape_cast %37 : vector<1x192x8xbf16> to vector<192x8xbf16>
    %39 = vector.extract_strided_slice %38 {offsets = [0, 0], sizes = [184, 8], strides = [1, 1]} : vector<192x8xbf16> to vector<184x8xbf16>
    %40 = vector.extract_strided_slice %38 {offsets = [1, 0], sizes = [184, 8], strides = [1, 1]} : vector<192x8xbf16> to vector<184x8xbf16>
    %41 = vector.extract_strided_slice %38 {offsets = [2, 0], sizes = [184, 8], strides = [1, 1]} : vector<192x8xbf16> to vector<184x8xbf16>
    %42 = tpu.concatenate %39, %40, %41 in 1 : vector<184x8xbf16>, vector<184x8xbf16>, vector<184x8xbf16> -> vector<184x24xbf16>
    %c2 = arith.constant 2 : index
    %c0_19 = arith.constant 0 : index
    %c0_20 = arith.constant 0 : index
    %43 = vector.load %arg3[%c2, %c0_19, %c0_20] : memref<3x24x8xbf16, #tpu.memory_space<vmem>>, vector<1x24x8xbf16>
    %44 = vector.shape_cast %43 : vector<1x24x8xbf16> to vector<24x8xbf16>
    %cst_21 = arith.constant dense<0.000000e+00> : vector<184x8xf32>
    %45 = tpu.matmul %42, %44, %cst_21 {dimension_numbers = #tpu.dot_dimension_numbers<[1], [0], [0], [1], [0, 0, 1, 1], [], []>} : vector<184x24xbf16>, vector<24x8xbf16>, vector<184x8xf32> -> vector<184x8xf32>
    %46 = arith.addf %32, %45 : vector<184x8xf32>
    %47 = vector.broadcast %0 : vector<1x8xf32> to vector<184x8xf32>
    %48 = arith.mulf %46, %47 : vector<184x8xf32>
    %49 = vector.broadcast %1 : vector<1x8xf32> to vector<184x8xf32>
    %50 = arith.addf %48, %49 : vector<184x8xf32>
    %c0_22 = arith.constant 0 : index
    %c0_23 = arith.constant 0 : index
    %51 = vector.load %arg6[%c0_22, %c0_23] : memref<184x1xf32, #tpu.memory_space<vmem>>, vector<184x1xf32>
    %cst_24 = arith.constant 5.000000e-01 : f32
    %52 = vector.broadcast %cst_24 : f32 to vector<184x1xf32>
    %53 = arith.cmpf ogt, %51, %52 : vector<184x1xf32>
    %cst_25 = arith.constant 0.000000e+00 : f32
    %54 = vector.broadcast %cst_25 : f32 to vector<184x8xf32>
    %55 = arith.maximumf %50, %54 : vector<184x8xf32>
    %cst_26 = arith.constant 0.000000e+00 : f32
    %56 = vector.shape_cast %53 : vector<184x1xi1> to vector<184x1xi1>
    %57 = vector.broadcast %56 : vector<184x1xi1> to vector<184x8xi1>
    %58 = vector.broadcast %cst_26 : f32 to vector<184x8xf32>
    %59 = arith.select %57, %55, %58 : vector<184x8xi1>, vector<184x8xf32>
    %c0_27 = arith.constant 0 : index
    %c0_28 = arith.constant 0 : index
    %c0_29 = arith.constant 0 : index
    %60 = vector.load %arg7[%c0_27, %c0_28, %c0_29] : memref<1x184x8xf32, #tpu.memory_space<vmem>>, vector<1x184x8xf32>
    %61 = vector.shape_cast %60 : vector<1x184x8xf32> to vector<184x8xf32>
    %62 = vector.shape_cast %59 : vector<184x8xf32> to vector<1x184x8xf32>
    tpu.vector_store %arg7[%c0_27, %c0_28, %c0_29], %62 {strides = array<i32>} : memref<1x184x8xf32, #tpu.memory_space<vmem>>, vector<1x184x8xf32>,
    return
  }
  func.func @transform_0(%arg0: i32, %arg1: i32) -> (i32, i32, i32) {
    %c0_i32 = arith.constant 0 : i32
    %c0_i32_0 = arith.constant 0 : i32
    %c0_i32_1 = arith.constant 0 : i32
    return %arg0, %c0_i32, %c0_i32_0 : i32, i32, i32
  }
  func.func @transform_1(%arg0: i32, %arg1: i32) -> (i32, i32, i32) {
    %c0_i32 = arith.constant 0 : i32
    %c0_i32_0 = arith.constant 0 : i32
    %c0_i32_1 = arith.constant 0 : i32
    %c0_i32_2 = arith.constant 0 : i32
    return %c0_i32, %c0_i32_0, %c0_i32_1 : i32, i32, i32
  }
  func.func @transform_2(%arg0: i32, %arg1: i32) -> (i32, i32) {
    %c0_i32 = arith.constant 0 : i32
    %c0_i32_0 = arith.constant 0 : i32
    %c0_i32_1 = arith.constant 0 : i32
    return %c0_i32, %c0_i32_0 : i32, i32
  }
  func.func @transform_3(%arg0: i32, %arg1: i32) -> (i32, i32) {
    %c0_i32 = arith.constant 0 : i32
    %c0_i32_0 = arith.constant 0 : i32
    %c0_i32_1 = arith.constant 0 : i32
    return %c0_i32, %c0_i32_0 : i32, i32
  }
  func.func @transform_4(%arg0: i32, %arg1: i32) -> (i32, i32) {
    %c0_i32 = arith.constant 0 : i32
    %c0_i32_0 = arith.constant 0 : i32
    return %arg1, %c0_i32 : i32, i32
  }
  func.func @transform_5(%arg0: i32, %arg1: i32) -> (i32, i32, i32) {
    %c0_i32 = arith.constant 0 : i32
    %c0_i32_0 = arith.constant 0 : i32
    return %arg0, %arg1, %c0_i32 : i32, i32, i32
  }
}

</mosaic_0001>

<bundles_post_ra>
// kernel: down_forward.3
= control target key start
LH: loop header
LB: loop body
LE: loop exit
PB: predicated region body
PF: predicated region fallthrough
CT: control target
= control target key end

     0   :  { %s2516_s6 = smov 0   ;;  %s2518_s7 = smov 0   ;;  %s3837_s0 = inlined_call_operand.vmem [shape: bf16[2,16,16,4], index: 0, kind: input, shape index: {}]   ;;  %s3838_s1 = inlined_call_operand.vmem [shape: bf16[2,8,8,4], index: 1, kind: output, shape index: {}]  }
   0x1   :  { %s2520_s8 = smov 0  }
   0x2 LB: > { %s23_s9 = sadd.s32 1, %s2498_s7  ;;  %p2381_p0 = scmp.ge.s32.totalorder %s2502_s8, 1  ;;  %s2502_s8 = sphi %s2520_s8, %s11_s8   ;;  %s2498_s7 = sphi %s2518_s7, %s4121_s7   ;;  %s2494_s6 = sphi %s2516_s6, %s4120_s6  }
   0x3   : > { %p25_p1 = scmp.ge.s32.totalorder %s23_s9, 2  ;;  %p109_p2 = scmp.lt.s32.totalorder %s2502_s8, 3 }
   0x5   : > { %s4123_s9 = smov (%p25_p1, %s23_s9), 0  ;;  %p110_p3 = pnand %p2381_p0, %p109_p2 }
   0x7   : > { %113 = sbr.rel (%p110_p3) target bundleno = 171 (0xab), region = 24 }
   0xe   : > { %p139_p4 = scmp.lt.s32.totalorder %s2494_s6, 1  ;;  %v226_v0 = vlaneseq  ;;  %v2504_v1 = vmov 1966171168   ;;  %v2505_v4 = vmov 1935823168   ;;  %vm2144_vm0 = vcmask 1041409  }
   0xf   : > { %v224_v2 = vunpack.c.l.s4 %v2504_v1  ;;  %v1184_v5 = vunpack.c.l.s4 %v2505_v4  ;;  %vm2147_vm1 = vcmask 1042434   ;;  %vm2150_vm2 = vcmask 1043459  }
  0x10   : > { %s4125_s6 = smov (!%p139_p4, %s2494_s6), 1  ;;  %v227_v3 = vshrl.u32 %v226_v0, 7  ;;  %vm2153_vm3 = vcmask 1044484   ;;  %vm2156_vm4 = vcmask 1045509   ;;  %vm2159_vm5 = vcmask 1046534  }
  0x11   : > { %v225_v6 = vunpack.c.0.s8 %v224_v2  ;;  %s2452_s10 = sshll.u32 %s4125_s6, 7  ;;  %v1185_v11 = vunpack.c.0.s8 %v1184_v5  ;;  %vm2162_vm6 = vcmask 1047559   ;;  %s2453_s14 = sshll.u32 %s4125_s6, 5  ;;  %vm2278_vm7 = vcmask 27648  }
  0x12   : > { %s2540_s13 = scalar_lea.vmem %s3837_s0, %s2452_s10  ;;  %s157_s17 = scalar_lea.vmem %s3838_s1, %s2453_s14 }
  0x13   : > { %v2542_v7 = vsub.s32 %v225_v6, %v227_v3  ;;  %v159_v8 = vld [vmem:[%s2540_s13] sm:$0xf]  ;;  %v160_v9 = vld [vmem:[%s2540_s13 + $0x4] sm:$0xf]  ;;  %v161_v10 = vld [vmem:[%s2540_s13 + $0x8] sm:$0xf]  ;;  %v2564_v32 = vsub.s32 %v1185_v11, %v227_v3 }
  0x14   : > { %v162_v12 = vld [vmem:[%s2540_s13 + $0xc] sm:$0xf]  ;;  %v163_v13 = vld [vmem:[%s2540_s13 + $0x10] sm:$0xf]  ;;  %v164_v14 = vld [vmem:[%s2540_s13 + $0x14] sm:$0xf]  ;;  %v191_v15 = vmax.bf16 %v161_v10, %v159_v8 }
  0x15   : > { %v165_v16 = vld [vmem:[%s2540_s13 + $0x18] sm:$0xf]  ;;  %v166_v17 = vld [vmem:[%s2540_s13 + $0x1c] sm:$0xf]  ;;  %v2553_v18 = vld [vmem:[%s2540_s13 + $0x20] sm:$0xf]  ;;  %v192_v19 = vmax.bf16 %v162_v12, %v160_v9 }
  0x16   : > { %v168_v20 = vld [vmem:[%s2540_s13 + $0x24] sm:$0xf]  ;;  %v169_v21 = vld [vmem:[%s2540_s13 + $0x28] sm:$0xf]  ;;  %v170_v22 = vld [vmem:[%s2540_s13 + $0x2c] sm:$0xf]  ;;  %v193_v23 = vmax.bf16 %v165_v16, %v163_v13  ;;  %v194_v24 = vmax.bf16 %v166_v17, %v164_v14  ;;  %v229_v25 = vrot.slane %v191_v15, %v2542_v7 }
  0x17   : > { %v171_v26 = vld [vmem:[%s2540_s13 + $0x30] sm:$0xf]  ;;  %v172_v27 = vld [vmem:[%s2540_s13 + $0x34] sm:$0xf]  ;;  %v173_v28 = vld [vmem:[%s2540_s13 + $0x38] sm:$0xf]  ;;  %v195_v29 = vmax.bf16 %v169_v21, %v2553_v18  ;;  %v196_v30 = vmax.bf16 %v170_v22, %v168_v20  ;;  %v253_v31 = vrot.slane %v192_v19, %v2542_v7 }
  0x18   : > { %3887 = vst [vmem:[#allocation2_spill] sm:$0xff] %v2564_v32  ;;  %v174_v33 = vld [vmem:[%s2540_s13 + $0x3c] sm:$0xf]  ;;  %v175_v34 = vld [vmem:[%s2540_s13 + $0x40] sm:$0xf]  ;;  %v197_v36 = vmax.bf16 %v173_v28, %v171_v26  ;;  %v230_v37 = vcombine.high %v229_v25, %v229_v25  ;;  %v2572_v38 = vrot.slane %v229_v25, %v2542_v7  ;;  %v277_v39 = vrot.slane %v193_v23, %v2542_v7 }
  0x19   : > { %v2569_v35 = vld [vmem:[%s2540_s13 + $0x44] sm:$0xf]  ;;  %v177_v40 = vld [vmem:[%s2540_s13 + $0x48] sm:$0xf]  ;;  %v2577_v41 = vld [vmem:[%s2540_s13 + $0x4c] sm:$0xf]  ;;  %v198_v43 = vmax.bf16 %v174_v33, %v172_v27  ;;  %v254_v44 = vcombine.high %v253_v31, %v253_v31  ;;  %v2583_v45 = vrot.slane %v253_v31, %v2542_v7  ;;  %v301_v46 = vrot.slane %v194_v24, %v2542_v7 }
  0x1a   : > { %v2580_v42 = vld [vmem:[%s2540_s13 + $0x50] sm:$0xf]  ;;  %v2587_v47 = vld [vmem:[%s2540_s13 + $0x54] sm:$0xf]  ;;  %v2590_v48 = vld [vmem:[%s2540_s13 + $0x58] sm:$0xf]  ;;  %v199_v50 = vmax.bf16 %v177_v40, %v175_v34  ;;  %v200_v51 = vmax.bf16 %v2577_v41, %v2569_v35  ;;  %v2598_v52 = vrot.slane %v230_v37, %v2542_v7  ;;  %v2602_v53 = vcombine.high %v2572_v38, %v2572_v38 }
  0x1b   : > { %v2593_v49 = vld [vmem:[%s2540_s13 + $0x5c] sm:$0xf]  ;;  %v183_v54 = vld [vmem:[%s2540_s13 + $0x60] sm:$0xf]  ;;  %v2606_v55 = vld [vmem:[%s2540_s13 + $0x64] sm:$0xf]  ;;  %v201_v57 = vmax.bf16 %v2590_v48, %v2580_v42  ;;  %v2614_v59 = vrot.slane %v254_v44, %v2542_v7  ;;  %v2618_v60 = vcombine.high %v2583_v45, %v2583_v45  ;;  %v278_v2 = vcombine.high %v277_v39, %v277_v39 }
  0x1c   : > { %3888 = vst [vmem:[#allocation3_spill] sm:$0xff] %v2602_v53  ;;  %v185_v56 = vld [vmem:[%s2540_s13 + $0x68] sm:$0xf]  ;;  %v202_v58 = vmax.bf16 %v2593_v49, %v2587_v47  ;;  %v186_v61 = vld [vmem:[%s2540_s13 + $0x6c] sm:$0xf]  ;;  %v2629_v1 = vcombine.high %v2598_v52, %v2598_v52  ;;  %v2632_v3 = vrot.slane %v277_v39, %v2542_v7  ;;  %v302_v9 = vcombine.high %v301_v46, %v301_v46 }
  0x1d   : > { %3889 = vst [vmem:[#allocation4_spill] sm:$0xff] %v2614_v59  ;;  %3890 = vst [vmem:[#allocation5_spill] sm:$0xff] %v2618_v60  ;;  %v2622_v62 = vld [vmem:[%s2540_s13 + $0x70] sm:$0xf]  ;;  %v2625_v63 = vld [vmem:[%s2540_s13 + $0x74] sm:$0xf]  ;;  %v203_v0 = vmax.bf16 %v185_v56, %v183_v54  ;;  %v204_v6 = vmax.bf16 %v186_v61, %v2606_v55  ;;  %v2643_v8 = vcombine.high %v2614_v59, %v2614_v59 }
  0x1e   : > { %3891 = vst [vmem:[#allocation6_spill] sm:$0xff] %v2632_v3  ;;  %v2635_v4 = vld [vmem:[%s2540_s13 + $0x78] sm:$0xf]  ;;  %v2638_v5 = vld [vmem:[%s2540_s13 + $0x7c] sm:$0xf]  ;;  %v2646_v10 = vrot.slane %v301_v46, %v2542_v7  ;;  %v2653_v13 = vrot.slane %v278_v2, %v2542_v7  ;;  %v2657_v14 = vcombine.high %v2632_v3, %v2632_v3  ;;  %v2660_v15 = vrot.slane %v302_v9, %v2542_v7 }
  0x1f   : > { %3892 = vst [vmem:[#allocation7_spill] sm:$0xff] %v2643_v8  ;;  %v205_v11 = vmax.bf16 %v2635_v4, %v2622_v62  ;;  %v325_v17 = vrot.slane %v195_v29, %v2542_v7  ;;  %v349_v18 = vrot.slane %v196_v30, %v2542_v7  ;;  %v373_v20 = vrot.slane %v197_v36, %v2542_v7 }
  0x20   : > { %3893 = vst [vmem:[#allocation8_spill] sm:$0xff] %v2653_v13  ;;  %v2664_v16 = vcombine.high %v2646_v10, %v2646_v10  ;;  %v2670_v19 = vcombine.high %v2653_v13, %v2653_v13  ;;  %v397_v21 = vrot.slane %v198_v43, %v2542_v7  ;;  %v421_v22 = vrot.slane %v199_v50, %v2542_v7 }
  0x21   : > { %v2677_v23 = vcombine.high %v2660_v15, %v2660_v15  ;;  %v326_v24 = vcombine.high %v325_v17, %v325_v17  ;;  %v2680_v25 = vrot.slane %v325_v17, %v2542_v7  ;;  %v350_v26 = vcombine.high %v349_v18, %v349_v18 }
  0x22   : > { %v2683_v27 = vrot.slane %v349_v18, %v2542_v7  ;;  %v374_v28 = vcombine.high %v373_v20, %v373_v20  ;;  %v2686_v29 = vrot.slane %v373_v20, %v2542_v7  ;;  %v398_v30 = vcombine.high %v397_v21, %v397_v21 }
  0x23   : > { %v2689_v31 = vrot.slane %v326_v24, %v2542_v7  ;;  %v2693_v33 = vcombine.high %v2680_v25, %v2680_v25  ;;  %v2696_v34 = vrot.slane %v350_v26, %v2542_v7  ;;  %v2699_v35 = vrot.slane %v397_v21, %v2542_v7 }
  0x24   : > { %v2703_v36 = vcombine.high %v2683_v27, %v2683_v27  ;;  %v2706_v37 = vrot.slane %v374_v28, %v2542_v7  ;;  %v2710_v39 = vcombine.high %v2686_v29, %v2686_v29  ;;  %v2713_v40 = vrot.slane %v398_v30, %v2542_v7 }
  0x25   : > { %v2717_v41 = vcombine.high %v2689_v31, %v2689_v31  ;;  %v2721_v42 = vcombine.high %v2696_v34, %v2696_v34  ;;  %v2725_v43 = vcombine.high %v2699_v35, %v2699_v35  ;;  %v422_v44 = vcombine.high %v421_v22, %v421_v22 }
  0x26   : > { %v2729_v46 = vcombine.high %v2706_v37, %v2706_v37  ;;  %v2733_v47 = vcombine.high %v2713_v40, %v2713_v40  ;;  %v2736_v48 = vrot.slane %v421_v22, %v2542_v7  ;;  %v445_v49 = vrot.slane %v200_v51, %v2542_v7 }
  0x27   : > { %v2740_v50 = vrot.slane %v422_v44, %v2542_v7  ;;  %v469_v54 = vrot.slane %v201_v57, %v2542_v7  ;;  %v493_v55 = vrot.slane %v202_v58, %v2542_v7  ;;  %v517_v56 = vrot.slane %v203_v0, %v2542_v7 }
  0x28   : > { %v2747_v61 = vcombine.high %v2736_v48, %v2736_v48  ;;  %v446_v2 = vcombine.high %v445_v49, %v445_v49  ;;  %v2750_v9 = vrot.slane %v445_v49, %v2542_v7  ;;  %v541_v17 = vrot.slane %v204_v6, %v2542_v7 }
  0x29   : > { %v2755_v51 = vcombine.high %v2740_v50, %v2740_v50  ;;  %v470_v18 = vcombine.high %v469_v54, %v469_v54  ;;  %v2758_v57 = vrot.slane %v469_v54, %v2542_v7  ;;  %v494_v58 = vcombine.high %v493_v55, %v493_v55 }
  0x2a   : > { %v2761_v0 = vrot.slane %v446_v2, %v2542_v7  ;;  %v2765_v20 = vcombine.high %v2750_v9, %v2750_v9  ;;  %v2768_v21 = vrot.slane %v493_v55, %v2542_v7  ;;  %v518_v6 = vcombine.high %v517_v56, %v517_v56 }
  0x2b   : > { %3894 = vst [vmem:[#allocation9_spill] sm:$0xff] %v2758_v57  ;;  %v2771_v22 = vrot.slane %v470_v18, %v2542_v7  ;;  %v2775_v24 = vcombine.high %v2758_v57, %v2758_v57  ;;  %v2778_v26 = vrot.slane %v494_v58, %v2542_v7  ;;  %v2781_v28 = vrot.slane %v517_v56, %v2542_v7 }
  0x2c   : > { %3895 = vst [vmem:[#allocation10_spill] sm:$0xff] %v2761_v0  ;;  %3896 = vst [vmem:[#allocation11_spill] sm:$0xff] %v2765_v20  ;;  %v2785_v30 = vcombine.high %v2761_v0, %v2761_v0  ;;  %v2789_v44 = vcombine.high %v2768_v21, %v2768_v21  ;;  %v2792_v49 = vrot.slane %v518_v6, %v2542_v7  ;;  %v3909_v3 = vshrl.u32 %v2598_v52, 16 }
  0x2d   : > { %3897 = vst [vmem:[#allocation12_spill] sm:$0xff] %v2781_v28  ;;  %v542_v54 = vcombine.high %v541_v17, %v541_v17  ;;  %v2796_v55 = vcombine.high %v2771_v22, %v2771_v22  ;;  %v2800_v56 = vcombine.high %v2778_v26, %v2778_v26  ;;  %v2804_v2 = vcombine.high %v2781_v28, %v2781_v28 }
  0x2e   : > { %3898 = vst [vmem:[#allocation13_spill] sm:$0xff] %v2785_v30  ;;  %3899 = vst [vmem:[#allocation14_spill] sm:$0xff] %v2792_v49  ;;  %v2807_v18 = vrot.slane %v541_v17, %v2542_v7  ;;  %v2811_v58 = vcombine.high %v2792_v49, %v2792_v49  ;;  %v565_v12 = vrot.slane %v205_v11, %v2542_v7  ;;  %v3911_v8 = vmov %v2602_v53 }
  0x2f   : > { %3900 = vst [vmem:[#allocation15_spill] sm:$0xff] %v2804_v2  ;;  %v2814_v6 = vrot.slane %v542_v54, %v2542_v7  ;;  %v3902_v32 = vmax.bf16 %v2638_v5, %v2625_v63  ;;  %v2932_v13 = vmax.bf16 %v3909_v3, %v2598_v52  ;;  %v3912_v59 = vshrl.u32 %v3911_v8, 16  ;;  %v3920_v3 = vld [vmem:[#allocation5_spill] sm:$0xff] }
  0x30   : > { %3901 = vst [vmem:[#allocation16_spill] sm:$0xff] %v2811_v58  ;;  %v2826_v17 = vcombine.high %v2807_v18, %v2807_v18  ;;  %v566_v62 = vcombine.high %v565_v12, %v565_v12  ;;  %v2836_v4 = vrot.slane %v565_v12, %v2542_v7  ;;  %v3906_v57 = vmov %v2811_v58 }
  0x31   : > { %v589_v2 = vrot.slane %v3902_v32, %v2542_v7  ;;  %v2833_v28 = vcombine.high %v2814_v6, %v2814_v6  ;;  %v3907_v58 = vshrl.u32 %v2572_v38, 16  ;;  %v3914_v60 = vshrl.u32 %v2629_v1, 16 }
  0x32   : > { %v2845_v54 = vrot.slane %v566_v62, %v2542_v7  ;;  %v2849_v49 = vcombine.high %v2836_v4, %v2836_v4  ;;  %v3916_v11 = vshrl.u32 %v2583_v45, 16 }
  0x33   : > { %v590_v63 = vcombine.high %v589_v2, %v589_v2  ;;  %v2839_v32 = vrot.slane %v589_v2, %v2542_v7  ;;  %v2927_v62 = vmax.bf16 %v3907_v58, %v2572_v38  ;;  %v2942_v53 = vmax.bf16 %v3914_v60, %v2629_v1  ;;  %v3918_v58 = vld [vmem:[#allocation4_spill] sm:$0xff]  ;;  %v3924_v1 = vld [vmem:[#allocation6_spill] sm:$0xff] }
  0x34   : > { %v2864_v5 = vcombine.high %v2845_v54, %v2845_v54  ;;  %v3903_v0 = vld [vmem:[#allocation12_spill] sm:$0xff]  ;;  %v2947_v38 = vmax.bf16 %v3916_v11, %v2583_v45 }
  0x35   : > { %v2852_v12 = vrot.slane %v590_v63, %v2542_v7  ;;  %v2857_v2 = vcombine.high %v2839_v32, %v2839_v32  ;;  %v3904_v20 = vld [vmem:[#allocation14_spill] sm:$0xff]  ;;  %3908 = vst [vmem:[#allocation12_spill] sm:$0xff] %v2927_v62  ;;  %v2937_v63 = vmax.bf16 %v3912_v59, %v3911_v8  ;;  %3915 = vst [vmem:[#allocation16_spill] sm:$0xff] %v2942_v53  ;;  %v3919_v62 = vshrl.u32 %v3918_v58, 16  ;;  %v3922_v8 = vld [vmem:[#allocation7_spill] sm:$0xff] }
  0x36   : > { %v3905_v30 = vld [vmem:[#allocation15_spill] sm:$0xff]  ;;  %3910 = vst [vmem:[#allocation14_spill] sm:$0xff] %v2932_v13  ;;  %3917 = vst [vmem:[#allocation3_spill] sm:$0xff] %v2947_v38  ;;  %v3921_v13 = vshrl.u32 %v3920_v3, 16  ;;  %v3925_v53 = vshrl.u32 %v3924_v1, 16  ;;  %v3926_v11 = vld [vmem:[#allocation8_spill] sm:$0xff] }
  0x37   : > { %v2868_v7 = vcombine.high %v2852_v12, %v2852_v12  ;;  %3913 = vst [vmem:[#allocation15_spill] sm:$0xff] %v2937_v63  ;;  %v2952_v52 = vmax.bf16 %v3919_v62, %v3918_v58  ;;  %v3923_v63 = vshrl.u32 %v3922_v8, 16  ;;  %v3927_v38 = vshrl.u32 %v3926_v11, 16 }
  0x38   : > { %v2957_v59 = vmax.bf16 %v3921_v13, %v3920_v3  ;;  %v2967_v45 = vmax.bf16 %v3925_v53, %v3924_v1  ;;  %v3928_v58 = vshrl.u32 %v2657_v14, 16  ;;  %v3929_v3 = vshrl.u32 %v2670_v19, 16 }
  0x39   : > { %v2962_v60 = vmax.bf16 %v3923_v63, %v3922_v8  ;;  %v2972_v62 = vmax.bf16 %v3927_v38, %v3926_v11  ;;  %v3930_v8 = vshrl.u32 %v2646_v10, 16  ;;  %v3931_v1 = vshrl.u32 %v2660_v15, 16 }
  0x3a   : > { %v2977_v13 = vmax.bf16 %v3928_v58, %v2657_v14  ;;  %v2982_v63 = vmax.bf16 %v3929_v3, %v2670_v19  ;;  %v3932_v11 = vshrl.u32 %v2664_v16, 16  ;;  %v3933_v58 = vshrl.u32 %v2677_v23, 16 }
  0x3b   : > { %v2987_v53 = vmax.bf16 %v3930_v8, %v2646_v10  ;;  %v2992_v38 = vmax.bf16 %v3931_v1, %v2660_v15  ;;  %v3934_v3 = vshrl.u32 %v2680_v25, 16  ;;  %v3935_v8 = vshrl.u32 %v2689_v31, 16 }
  0x3c   : > { %v2997_v14 = vmax.bf16 %v3932_v11, %v2664_v16  ;;  %v3002_v19 = vmax.bf16 %v3933_v58, %v2677_v23  ;;  %v3936_v1 = vshrl.u32 %v2693_v33, 16  ;;  %v3937_v11 = vshrl.u32 %v2717_v41, 16 }
  0x3d   : > { %v3007_v10 = vmax.bf16 %v3934_v3, %v2680_v25  ;;  %v3012_v15 = vmax.bf16 %v3935_v8, %v2689_v31  ;;  %v3938_v58 = vshrl.u32 %v2683_v27, 16  ;;  %v3939_v3 = vshrl.u32 %v2696_v34, 16 }
  0x3e   : > { %v3017_v16 = vmax.bf16 %v3936_v1, %v2693_v33  ;;  %v3022_v23 = vmax.bf16 %v3937_v11, %v2717_v41  ;;  %v3940_v8 = vshrl.u32 %v2703_v36, 16  ;;  %v3941_v1 = vshrl.u32 %v2721_v42, 16 }
  0x3f   : > { %v3027_v25 = vmax.bf16 %v3938_v58, %v2683_v27  ;;  %v3032_v31 = vmax.bf16 %v3939_v3, %v2696_v34  ;;  %v3942_v11 = vshrl.u32 %v2686_v29, 16  ;;  %v3943_v58 = vshrl.u32 %v2706_v37, 16 }
  0x40   : > { %v3037_v33 = vmax.bf16 %v3940_v8, %v2703_v36  ;;  %v3042_v41 = vmax.bf16 %v3941_v1, %v2721_v42  ;;  %v3944_v3 = vshrl.u32 %v2710_v39, 16  ;;  %v3945_v8 = vshrl.u32 %v2729_v46, 16 }
  0x41   : > { %v3047_v27 = vmax.bf16 %v3942_v11, %v2686_v29  ;;  %v3052_v34 = vmax.bf16 %v3943_v58, %v2706_v37  ;;  %v3946_v1 = vshrl.u32 %v2699_v35, 16  ;;  %v3947_v11 = vshrl.u32 %v2713_v40, 16 }
  0x42   : > { %v3057_v36 = vmax.bf16 %v3944_v3, %v2710_v39  ;;  %v3062_v42 = vmax.bf16 %v3945_v8, %v2729_v46  ;;  %v3948_v58 = vshrl.u32 %v2725_v43, 16  ;;  %v3949_v3 = vshrl.u32 %v2733_v47, 16 }
  0x43   : > { %v3067_v29 = vmax.bf16 %v3946_v1, %v2699_v35  ;;  %v3072_v37 = vmax.bf16 %v3947_v11, %v2713_v40  ;;  %v3950_v8 = vshrl.u32 %v2736_v48, 16  ;;  %v3952_v1 = vshrl.u32 %v2740_v50, 16 }
  0x44   : > { %v3077_v39 = vmax.bf16 %v3948_v58, %v2725_v43  ;;  %v3082_v46 = vmax.bf16 %v3949_v3, %v2733_v47  ;;  %v3954_v11 = vshrl.u32 %v2747_v61, 16  ;;  %v3956_v58 = vshrl.u32 %v2755_v51, 16 }
  0x45   : > { %v3087_v35 = vmax.bf16 %v3950_v8, %v2736_v48  ;;  %v3092_v40 = vmax.bf16 %v3952_v1, %v2740_v50  ;;  %v3958_v3 = vshrl.u32 %v2750_v9, 16  ;;  %v3959_v8 = vld [vmem:[#allocation10_spill] sm:$0xff]  ;;  %v3961_v1 = vld [vmem:[#allocation11_spill] sm:$0xff] }
  0x46   : > { %v3097_v43 = vmax.bf16 %v3954_v11, %v2747_v61  ;;  %v3102_v47 = vmax.bf16 %v3956_v58, %v2755_v51  ;;  %v3963_v11 = vld [vmem:[#allocation13_spill] sm:$0xff] }
  0x47   : > { %3951 = vst [vmem:[#allocation4_spill] sm:$0xff] %v3087_v35  ;;  %3953 = vst [vmem:[#allocation5_spill] sm:$0xff] %v3092_v40  ;;  %v3107_v48 = vmax.bf16 %v3958_v3, %v2750_v9  ;;  %v3960_v35 = vshrl.u32 %v3959_v8, 16  ;;  %v3962_v40 = vshrl.u32 %v3961_v1, 16  ;;  %v3965_v58 = vld [vmem:[#allocation9_spill] sm:$0xff]  ;;  %v3967_v3 = vshrl.u32 %v2771_v22, 16 }
  0x48   : > { %3955 = vst [vmem:[#allocation7_spill] sm:$0xff] %v3097_v43  ;;  %3957 = vst [vmem:[#allocation6_spill] sm:$0xff] %v3102_v47  ;;  %v3964_v43 = vshrl.u32 %v3963_v11, 16  ;;  %v3966_v47 = vshrl.u32 %v3965_v58, 16 }
  0x49   : > { %v3112_v50 = vmax.bf16 %v3960_v35, %v3959_v8  ;;  %v3117_v61 = vmax.bf16 %v3962_v40, %v3961_v1  ;;  %v3132_v35 = vmax.bf16 %v3967_v3, %v2771_v22  ;;  %v3968_v8 = vshrl.u32 %v2775_v24, 16 }
  0x4a   : > { %v3122_v51 = vmax.bf16 %v3964_v43, %v3963_v11  ;;  %v3127_v9 = vmax.bf16 %v3966_v47, %v3965_v58  ;;  %v3969_v1 = vshrl.u32 %v2796_v55, 16  ;;  %v3970_v11 = vshrl.u32 %v2768_v21, 16 }
  0x4b   : > { %v3137_v40 = vmax.bf16 %v3968_v8, %v2775_v24  ;;  %v3971_v58 = vshrl.u32 %v2778_v26, 16  ;;  %v3972_v3 = vshrl.u32 %v2789_v44, 16  ;;  %v3973_v8 = vshrl.u32 %v2800_v56, 16 }
  0x4c   : > { %v3142_v43 = vmax.bf16 %v3969_v1, %v2796_v55  ;;  %v3147_v47 = vmax.bf16 %v3970_v11, %v2768_v21  ;;  %v3974_v1 = vshrl.u32 %v3903_v0, 16  ;;  %v3975_v11 = vshrl.u32 %v3904_v20, 16 }
  0x4d   : > { %v3152_v22 = vmax.bf16 %v3971_v58, %v2778_v26  ;;  %v3157_v24 = vmax.bf16 %v3972_v3, %v2789_v44  ;;  %v3162_v55 = vmax.bf16 %v3973_v8, %v2800_v56  ;;  %v3976_v58 = vshrl.u32 %v3905_v30, 16 }
  0x4e   : > { %v3167_v21 = vmax.bf16 %v3974_v1, %v3903_v0  ;;  %v3172_v26 = vmax.bf16 %v3975_v11, %v3904_v20  ;;  %v3977_v3 = vshrl.u32 %v3906_v57, 16  ;;  %v3978_v8 = vshrl.u32 %v2807_v18, 16 }
  0x4f   : > { %v3177_v44 = vmax.bf16 %v3976_v58, %v3905_v30  ;;  %v3979_v1 = vshrl.u32 %v2814_v6, 16  ;;  %v3980_v11 = vshrl.u32 %v2826_v17, 16  ;;  %v3981_v58 = vshrl.u32 %v2833_v28, 16 }
  0x50   : > { %v3182_v56 = vmax.bf16 %v3977_v3, %v3906_v57  ;;  %v3187_v0 = vmax.bf16 %v3978_v8, %v2807_v18  ;;  %v3982_v3 = vshrl.u32 %v2836_v4, 16  ;;  %v3983_v8 = vshrl.u32 %v2845_v54, 16 }
  0x51   : > { %v3192_v20 = vmax.bf16 %v3979_v1, %v2814_v6  ;;  %v3197_v30 = vmax.bf16 %v3980_v11, %v2826_v17  ;;  %v3202_v57 = vmax.bf16 %v3981_v58, %v2833_v28  ;;  %v3984_v1 = vshrl.u32 %v2849_v49, 16 }
  0x52   : > { %v3207_v18 = vmax.bf16 %v3982_v3, %v2836_v4  ;;  %v3212_v6 = vmax.bf16 %v3983_v8, %v2845_v54  ;;  %v3986_v11 = vshrl.u32 %v2864_v5, 16  ;;  %v3988_v58 = vshrl.u32 %v2839_v32, 16 }
  0x53   : > { %v3217_v17 = vmax.bf16 %v3984_v1, %v2849_v49  ;;  %v3990_v3 = vshrl.u32 %v2852_v12, 16  ;;  %v3992_v8 = vshrl.u32 %v2857_v2, 16  ;;  %v3994_v1 = vshrl.u32 %v2868_v7, 16 }
  0x54   : > { %v3222_v28 = vmax.bf16 %v3986_v11, %v2864_v5  ;;  %v3227_v4 = vmax.bf16 %v3988_v58, %v2839_v32  ;;  %v3995_v11 = vld [vmem:[#allocation2_spill] sm:$0xff] }
  0x55   : > { %3985 = vst [vmem:[#allocation8_spill] sm:$0xff] %v3217_v17  ;;  %v3232_v54 = vmax.bf16 %v3990_v3, %v2852_v12  ;;  %v3237_v49 = vmax.bf16 %v3992_v8, %v2857_v2  ;;  %v3242_v5 = vmax.bf16 %v3994_v1, %v2868_v7  ;;  %v3997_v32 = vld [vmem:[#allocation14_spill] sm:$0xff]  ;;  %v3999_v3 = vld [vmem:[#allocation16_spill] sm:$0xff]  ;;  %v4000_v2 = vld [vmem:[#allocation3_spill] sm:$0xff]  ;;  %v1273_v7 = vrot.slane %v2957_v59, %v3995_v11 }
  0x56   : > { %3987 = vst [vmem:[#allocation10_spill] sm:$0xff] %v3222_v28  ;;  %3989 = vst [vmem:[#allocation11_spill] sm:$0xff] %v3227_v4  ;;  %v3996_v28 = vld [vmem:[#allocation12_spill] sm:$0xff]  ;;  %v1203_v58 = vrot.slane %v3997_v32, %v3995_v11  ;;  %v3998_v4 = vld [vmem:[#allocation15_spill] sm:$0xff]  ;;  %v1245_v8 = vrot.slane %v4000_v2, %v3995_v11  ;;  %v1343_v2 = vrot.slane %v2982_v63, %v3995_v11 }
  0x57   : > { %3991 = vst [vmem:[#allocation13_spill] sm:$0xff] %v3232_v54  ;;  %3993 = vst [vmem:[#allocation9_spill] sm:$0xff] %v3237_v49  ;;  %v1189_v17 = vrot.slane %v3996_v28, %v3995_v11  ;;  %v1217_v12 = vrot.slane %v3998_v4, %v3995_v11  ;;  %v1231_v54 = vrot.slane %v3999_v3, %v3995_v11 }
  0x58   : > { %v1259_v49 = vrot.slane %v2952_v52, %v3995_v11  ;;  %v1287_v28 = vrot.slane %v2962_v60, %v3995_v11  ;;  %v3264_v4 = vrot.slane %v1203_v58, %v3995_v11  ;;  %v3273_v52 = vrot.slane %v1245_v8, %v3995_v11 }
  0x59   : > { %v3261_v1 = vrot.slane %v1189_v17, %v3995_v11  ;;  %v3267_v32 = vrot.slane %v1217_v12, %v3995_v11  ;;  %v3270_v3 = vrot.slane %v1231_v54, %v3995_v11  ;;  %v3279_v60 = vrot.slane %v1273_v7, %v3995_v11 }
  0x5a   : > { %v3276_v59 = vrot.slane %v1259_v49, %v3995_v11  ;;  %v3282_v17 = vrot.slane %v1287_v28, %v3995_v11  ;;  %v1301_v58 = vrot.slane %v2967_v45, %v3995_v11  ;;  %v1315_v12 = vrot.slane %v2972_v62, %v3995_v11 }
  0x5b   : > { %v1329_v54 = vrot.slane %v2977_v13, %v3995_v11  ;;  %v1357_v49 = vrot.slane %v2987_v53, %v3995_v11  ;;  %v1371_v8 = vrot.slane %v2992_v38, %v3995_v11  ;;  %v1385_v7 = vrot.slane %v2997_v14, %v3995_v11 }
  0x5c   : > { %v1399_v45 = vrot.slane %v3002_v19, %v3995_v11  ;;  %v3301_v62 = vrot.slane %v1301_v58, %v3995_v11  ;;  %v3304_v13 = vrot.slane %v1315_v12, %v3995_v11  ;;  %v3310_v53 = vrot.slane %v1343_v2, %v3995_v11 }
  0x5d   : > { %v3307_v63 = vrot.slane %v1329_v54, %v3995_v11  ;;  %v3313_v38 = vrot.slane %v1357_v49, %v3995_v11  ;;  %v3316_v14 = vrot.slane %v1371_v8, %v3995_v11  ;;  %v3319_v19 = vrot.slane %v1385_v7, %v3995_v11 }
  0x5e   : > { %v3322_v28 = vrot.slane %v1399_v45, %v3995_v11  ;;  %v1413_v58 = vrot.slane %v3007_v10, %v3995_v11  ;;  %v1427_v12 = vrot.slane %v3012_v15, %v3995_v11  ;;  %v1441_v54 = vrot.slane %v3017_v16, %v3995_v11 }
  0x5f   : > { %v1455_v2 = vrot.slane %v3022_v23, %v3995_v11  ;;  %v1469_v49 = vrot.slane %v3027_v25, %v3995_v11  ;;  %v1483_v8 = vrot.slane %v3032_v31, %v3995_v11  ;;  %v1497_v7 = vrot.slane %v3037_v33, %v3995_v11 }
  0x60   : > { %v1511_v10 = vrot.slane %v3042_v41, %v3995_v11  ;;  %v3341_v15 = vrot.slane %v1413_v58, %v3995_v11  ;;  %v3344_v16 = vrot.slane %v1427_v12, %v3995_v11  ;;  %v3347_v23 = vrot.slane %v1441_v54, %v3995_v11 }
  0x61   : > { %v3350_v25 = vrot.slane %v1455_v2, %v3995_v11  ;;  %v3353_v31 = vrot.slane %v1469_v49, %v3995_v11  ;;  %v3356_v33 = vrot.slane %v1483_v8, %v3995_v11  ;;  %v3359_v41 = vrot.slane %v1497_v7, %v3995_v11 }
  0x62   : > { %4001 = vst [vmem:[#allocation2_spill] sm:$0xff] %v3341_v15  ;;  %4002 = vst [vmem:[#allocation12_spill] sm:$0xff] %v3344_v16  ;;  %v3362_v45 = vrot.slane %v1511_v10, %v3995_v11  ;;  %v1525_v58 = vrot.slane %v3047_v27, %v3995_v11  ;;  %v1539_v12 = vrot.slane %v3052_v34, %v3995_v11 }
  0x63   : > { %v1553_v54 = vrot.slane %v3057_v36, %v3995_v11  ;;  %v1567_v2 = vrot.slane %v3062_v42, %v3995_v11  ;;  %v1581_v49 = vrot.slane %v3067_v29, %v3995_v11  ;;  %v1595_v8 = vrot.slane %v3072_v37, %v3995_v11 }
  0x64   : > { %v1609_v7 = vrot.slane %v3077_v39, %v3995_v11  ;;  %v1623_v27 = vrot.slane %v3082_v46, %v3995_v11  ;;  %v3381_v34 = vrot.slane %v1525_v58, %v3995_v11  ;;  %v3384_v36 = vrot.slane %v1539_v12, %v3995_v11  ;;  %v4006_v58 = vld [vmem:[#allocation4_spill] sm:$0xff] }
  0x65   : > { %v3387_v42 = vrot.slane %v1553_v54, %v3995_v11  ;;  %v3390_v29 = vrot.slane %v1567_v2, %v3995_v11  ;;  %v3393_v37 = vrot.slane %v1581_v49, %v3995_v11  ;;  %v3396_v39 = vrot.slane %v1595_v8, %v3995_v11  ;;  %v4007_v54 = vld [vmem:[#allocation5_spill] sm:$0xff]  ;;  %v4008_v2 = vld [vmem:[#allocation7_spill] sm:$0xff]  ;;  %v4009_v49 = vld [vmem:[#allocation6_spill] sm:$0xff] }
  0x66   : > { %v3399_v46 = vrot.slane %v1609_v7, %v3995_v11  ;;  %v3402_v10 = vrot.slane %v1623_v27, %v3995_v11  ;;  %v1637_v12 = vrot.slane %v4006_v58, %v3995_v11  ;;  %v1693_v8 = vrot.slane %v3107_v48, %v3995_v11 }
  0x67   : > { %4003 = vst [vmem:[#allocation14_spill] sm:$0xff] %v3387_v42  ;;  %4004 = vst [vmem:[#allocation15_spill] sm:$0xff] %v3390_v29  ;;  %v1651_v42 = vrot.slane %v4007_v54, %v3995_v11  ;;  %v1665_v29 = vrot.slane %v4008_v2, %v3995_v11  ;;  %v1707_v7 = vrot.slane %v3112_v50, %v3995_v11 }
  0x68   : > { %4005 = vst [vmem:[#allocation16_spill] sm:$0xff] %v3393_v37  ;;  %v1679_v37 = vrot.slane %v4009_v49, %v3995_v11  ;;  %v1721_v27 = vrot.slane %v3117_v61, %v3995_v11  ;;  %v1735_v58 = vrot.slane %v3122_v51, %v3995_v11  ;;  %v3421_v54 = vrot.slane %v1637_v12, %v3995_v11 }
  0x69   : > { %v3424_v2 = vrot.slane %v1651_v42, %v3995_v11  ;;  %v3427_v49 = vrot.slane %v1665_v29, %v3995_v11  ;;  %v3433_v50 = vrot.slane %v1693_v8, %v3995_v11  ;;  %v3436_v61 = vrot.slane %v1707_v7, %v3995_v11 }
  0x6a   : > { %v3430_v48 = vrot.slane %v1679_v37, %v3995_v11  ;;  %v3439_v51 = vrot.slane %v1721_v27, %v3995_v11  ;;  %v3442_v12 = vrot.slane %v1735_v58, %v3995_v11  ;;  %v1749_v42 = vrot.slane %v3127_v9, %v3995_v11 }
  0x6b   : > { %v1763_v29 = vrot.slane %v3132_v35, %v3995_v11  ;;  %v1777_v37 = vrot.slane %v3137_v40, %v3995_v11  ;;  %v1791_v8 = vrot.slane %v3142_v43, %v3995_v11  ;;  %v1805_v7 = vrot.slane %v3147_v47, %v3995_v11 }
  0x6c   : > { %v1819_v27 = vrot.slane %v3152_v22, %v3995_v11  ;;  %v1833_v58 = vrot.slane %v3157_v24, %v3995_v11  ;;  %v1847_v9 = vrot.slane %v3162_v55, %v3995_v11  ;;  %v3461_v35 = vrot.slane %v1749_v42, %v3995_v11 }
  0x6d   : > { %v3464_v40 = vrot.slane %v1763_v29, %v3995_v11  ;;  %v3467_v43 = vrot.slane %v1777_v37, %v3995_v11  ;;  %v3470_v47 = vrot.slane %v1791_v8, %v3995_v11  ;;  %v3473_v22 = vrot.slane %v1805_v7, %v3995_v11 }
  0x6e   : > { %4010 = vst [vmem:[#allocation3_spill] sm:$0xff] %v3461_v35  ;;  %v3476_v24 = vrot.slane %v1819_v27, %v3995_v11  ;;  %v3479_v55 = vrot.slane %v1833_v58, %v3995_v11  ;;  %v3482_v42 = vrot.slane %v1847_v9, %v3995_v11  ;;  %v1861_v29 = vrot.slane %v3167_v21, %v3995_v11  ;;  %v4032_v15 = vld [vmem:[#allocation15_spill] sm:$0xff] }
  0x6f   : > { %4011 = vst [vmem:[#allocation4_spill] sm:$0xff] %v3470_v47  ;;  %4012 = vst [vmem:[#allocation5_spill] sm:$0xff] %v3473_v22  ;;  %v1875_v37 = vrot.slane %v3172_v26, %v3995_v11  ;;  %v1889_v8 = vrot.slane %v3177_v44, %v3995_v11  ;;  %v1903_v7 = vrot.slane %v3182_v56, %v3995_v11  ;;  %v4033_v16 = vld [vmem:[#allocation16_spill] sm:$0xff] }
  0x70   : > { %4013 = vst [vmem:[#allocation7_spill] sm:$0xff] %v3476_v24  ;;  %v1917_v27 = vrot.slane %v3187_v0, %v3995_v11  ;;  %v1931_v58 = vrot.slane %v3192_v20, %v3995_v11  ;;  %v1945_v9 = vrot.slane %v3197_v30, %v3995_v11  ;;  %v1959_v21 = vrot.slane %v3202_v57, %v3995_v11 }
  0x71   : > { %v3501_v26 = vrot.slane %v1861_v29, %v3995_v11  ;;  %v3504_v44 = vrot.slane %v1875_v37, %v3995_v11  ;;  %v3507_v56 = vrot.slane %v1889_v8, %v3995_v11  ;;  %v3510_v0 = vrot.slane %v1903_v7, %v3995_v11  ;;  %v4021_v7 = vld [vmem:[#allocation8_spill] sm:$0xff] }
  0x72   : > { %v3513_v20 = vrot.slane %v1917_v27, %v3995_v11  ;;  %v3516_v30 = vrot.slane %v1931_v58, %v3995_v11  ;;  %v3519_v57 = vrot.slane %v1945_v9, %v3995_v11  ;;  %v3522_v29 = vrot.slane %v1959_v21, %v3995_v11  ;;  %v4022_v27 = vld [vmem:[#allocation10_spill] sm:$0xff]  ;;  %v4023_v58 = vld [vmem:[#allocation11_spill] sm:$0xff]  ;;  %v4024_v9 = vld [vmem:[#allocation13_spill] sm:$0xff] }
  0x73   : > { %4014 = vst [vmem:[#allocation6_spill] sm:$0xff] %v3501_v26  ;;  %4015 = vst [vmem:[#allocation17_spill] sm:$0xff] %v3507_v56  ;;  %v1973_v37 = vrot.slane %v3207_v18, %v3995_v11  ;;  %v1987_v8 = vrot.slane %v3212_v6, %v3995_v11  ;;  %v4025_v21 = vld [vmem:[#allocation9_spill] sm:$0xff]  ;;  %v2071_v18 = vrot.slane %v3242_v5, %v3995_v11  ;;  %v4043_v24 = vunpack.c.l.b16 %v3267_v32 }
  0x74   : > { %4016 = vst [vmem:[#allocation18_spill] sm:$0xff] %v3510_v0  ;;  %4017 = vst [vmem:[#allocation19_spill] sm:$0xff] %v3513_v20  ;;  %v2001_v0 = vrot.slane %v4021_v7, %v3995_v11  ;;  %v2015_v20 = vrot.slane %v4022_v27, %v3995_v11  ;;  %v4050_v32 = vunpack.c.l.b16 %v3261_v1 }
  0x75   : > { %4018 = vst [vmem:[#allocation20_spill] sm:$0xff] %v3516_v30  ;;  %4019 = vst [vmem:[#allocation21_spill] sm:$0xff] %v3519_v57  ;;  %v2029_v30 = vrot.slane %v4023_v58, %v3995_v11  ;;  %v2043_v57 = vrot.slane %v4024_v9, %v3995_v11  ;;  %v3541_v6 = vrot.slane %v1973_v37, %v3995_v11 }
  0x76   : > { %4020 = vst [vmem:[#allocation22_spill] sm:$0xff] %v3522_v29  ;;  %v2057_v29 = vrot.slane %v4025_v21, %v3995_v11  ;;  %v3544_v7 = vrot.slane %v1987_v8, %v3995_v11  ;;  %v3547_v27 = vrot.slane %v2001_v0, %v3995_v11  ;;  %v3550_v58 = vrot.slane %v2015_v20, %v3995_v11  ;;  %v4031_v0 = vld [vmem:[#allocation14_spill] sm:$0xff] }
  0x77   : > { %4026 = vst [vmem:[#allocation8_spill] sm:$0xff] %v3541_v6  ;;  %v3553_v9 = vrot.slane %v2029_v30, %v3995_v11  ;;  %v3556_v21 = vrot.slane %v2043_v57, %v3995_v11  ;;  %v3562_v37 = vrot.slane %v2071_v18, %v3995_v11  ;;  %v4044_v18 = vunpack.c.l.b16 %v3270_v3 }
  0x78   : > { %4027 = vst [vmem:[#allocation10_spill] sm:$0xff] %v3547_v27  ;;  %v3559_v5 = vrot.slane %v2057_v29, %v3995_v11  ;;  %v4039_v26 = vmov %v3547_v27  ;;  %v4042_v29 = vunpack.c.l.b16 %v3264_v4  ;;  %v2146_v11 = vrot.slane %v4043_v24, 6 }
  0x79   : > { %4028 = vst [vmem:[#allocation11_spill] sm:$0xff] %v3553_v9  ;;  %4030 = vst [vmem:[#allocation9_spill] sm:$0xff] %v3562_v37  ;;  %v2149_v6 = vrot.slane %v4044_v18, 5  ;;  %v4045_v8 = vunpack.c.l.b16 %v3273_v52  ;;  %v4046_v20 = vunpack.c.l.b16 %v3276_v59  ;;  %v4047_v57 = vunpack.c.l.b16 %v3279_v60 }
  0x7a   : > { %4029 = vst [vmem:[#allocation13_spill] sm:$0xff] %v3559_v5  ;;  %v4041_v35 = vmov %v3559_v5  ;;  %v2143_v5 = vrot.slane %v4042_v29, 7  ;;  %v4048_v9 = vunpack.c.l.b16 %v3282_v17  ;;  %v4049_v4 = vunpack.c.l.b16 %v3304_v13 }
  0x7b   : > { %v2152_v27 = vrot.slane %v4045_v8, 4  ;;  %v2155_v56 = vrot.slane %v4046_v20, 3  ;;  %v2158_v30 = vrot.slane %v4047_v57, 2  ;;  %v4051_v24 = vunpack.c.l.b16 %v3307_v63 }
  0x7c   : > { %v4036_v47 = vld [vmem:[#allocation20_spill] sm:$0xff]  ;;  %v4037_v22 = vld [vmem:[#allocation21_spill] sm:$0xff]  ;;  %v2161_v37 = vrot.slane %v4048_v9, 1  ;;  %v2164_v29 = vrot.slane %v4049_v4, 7  ;;  %v2145_v3 = vsel %vm2144_vm0, %v2143_v5, %v4050_v32  ;;  %v4052_v8 = vunpack.c.l.b16 %v3310_v53 }
  0x7d   : > { %v2166_v52 = vrot.slane %v4051_v24, 6  ;;  %v4053_v20 = vunpack.c.l.b16 %v3313_v38  ;;  %v2148_v57 = vsel %vm2147_vm1, %v2146_v11, %v2145_v3  ;;  %v4054_v17 = vunpack.c.l.b16 %v3301_v62  ;;  %v4058_v32 = vld [vmem:[#allocation12_spill] sm:$0xff] }
  0x7e   : > { %v2168_v59 = vrot.slane %v4052_v8, 5  ;;  %v4055_v9 = vunpack.c.l.b16 %v3316_v14  ;;  %v4056_v5 = vunpack.c.l.b16 %v3319_v19  ;;  %v2151_v63 = vsel %vm2150_vm2, %v2149_v6, %v2148_v57 }
  0x7f   : > { %v2170_v60 = vrot.slane %v4053_v20, 4  ;;  %v2165_v13 = vsel %vm2144_vm0, %v2164_v29, %v4054_v17  ;;  %v4057_v4 = vunpack.c.l.b16 %v3322_v28  ;;  %v4059_v24 = vunpack.c.l.b16 %v4058_v32  ;;  %v4062_v20 = vld [vmem:[#allocation2_spill] sm:$0xff] }
  0x80   : > { %v2172_v1 = vrot.slane %v4055_v9, 3  ;;  %v2174_v18 = vrot.slane %v4056_v5, 2  ;;  %v2167_v53 = vsel %vm2147_vm1, %v2166_v52, %v2165_v13  ;;  %v2154_v62 = vsel %vm2153_vm3, %v2152_v27, %v2151_v63 }
  0x81   : > { %v2176_v38 = vrot.slane %v4057_v4, 1  ;;  %v2178_v11 = vrot.slane %v4059_v24, 7  ;;  %v2169_v29 = vsel %vm2150_vm2, %v2168_v59, %v2167_v53  ;;  %v4060_v14 = vunpack.c.l.b16 %v3347_v23 }
  0x82   : > { %v4061_v19 = vunpack.c.l.b16 %v3350_v25  ;;  %v2157_v6 = vsel %vm2156_vm4, %v2155_v56, %v2154_v62  ;;  %v2171_v52 = vsel %vm2153_vm3, %v2170_v60, %v2169_v29  ;;  %v4063_v28 = vunpack.c.l.b16 %v4062_v20 }
  0x83   : > { %v2180_v3 = vrot.slane %v4060_v14, 6  ;;  %v4064_v17 = vunpack.c.l.b16 %v3353_v31  ;;  %v2160_v27 = vsel %vm2159_vm5, %v2158_v30, %v2157_v6  ;;  %v2173_v59 = vsel %vm2156_vm4, %v2172_v1, %v2171_v52 }
  0x84   : > { %v2182_v8 = vrot.slane %v4061_v19, 5  ;;  %v2179_v57 = vsel %vm2144_vm0, %v2178_v11, %v4063_v28  ;;  %v4065_v25 = vunpack.c.l.b16 %v3356_v33  ;;  %v3686_v56 = vsel %vm2162_vm6, %v2161_v37, %v2160_v27 }
  0x85   : > { %v2184_v13 = vrot.slane %v4064_v17, 4  ;;  %v2181_v23 = vsel %vm2147_vm1, %v2180_v3, %v2179_v57  ;;  %v2175_v60 = vsel %vm2159_vm5, %v2174_v18, %v2173_v59  ;;  %v4066_v63 = vunpack.c.l.b16 %v3359_v41 }
  0x86   : > { %v2186_v9 = vrot.slane %v4065_v25, 3  ;;  %v2183_v5 = vsel %vm2150_vm2, %v2182_v8, %v2181_v23  ;;  %v3693_v53 = vsel %vm2162_vm6, %v2176_v38, %v2175_v60  ;;  %v4067_v1 = vunpack.c.l.b16 %v3362_v45 }
  0x87   : > { %v2188_v31 = vrot.slane %v4066_v63, 2  ;;  %v2185_v30 = vsel %vm2153_vm3, %v2184_v13, %v2183_v5  ;;  %v4068_v33 = vunpack.c.l.b16 %v3384_v36  ;;  %v4069_v18 = vunpack.c.l.b16 %v4031_v0 }
  0x88   : > { %v2190_v4 = vrot.slane %v4067_v1, 1  ;;  %v2187_v37 = vsel %vm2156_vm4, %v2186_v9, %v2185_v30  ;;  %v4070_v11 = vunpack.c.l.b16 %v4032_v15  ;;  %v4071_v62 = vunpack.c.l.b16 %v4033_v16  ;;  %v4086_v1 = vld [vmem:[#allocation4_spill] sm:$0xff] }
  0x89   : > { %v2192_v32 = vrot.slane %v4068_v33, 7  ;;  %v2194_v24 = vrot.slane %v4069_v18, 6  ;;  %v2189_v29 = vsel %vm2159_vm5, %v2188_v31, %v2187_v37  ;;  %v4072_v14 = vunpack.c.l.b16 %v3381_v34  ;;  %v4088_v37 = vld [vmem:[#allocation3_spill] sm:$0xff] }
  0x8a   : > { %v2196_v41 = vrot.slane %v4070_v11, 5  ;;  %v2198_v38 = vrot.slane %v4071_v62, 4  ;;  %v4073_v36 = vunpack.c.l.b16 %v3396_v39  ;;  %v4074_v19 = vunpack.c.l.b16 %v3399_v46 }
  0x8b   : > { %v2193_v45 = vsel %vm2144_vm0, %v2192_v32, %v4072_v14  ;;  %v3716_v0 = vsel %vm2162_vm6, %v2190_v4, %v2189_v29  ;;  %v4075_v16 = vunpack.c.l.b16 %v3402_v10  ;;  %v4076_v52 = vunpack.c.l.b16 %v3424_v2 }
  0x8c   : > { %v2200_v3 = vrot.slane %v4073_v36, 3  ;;  %v2202_v8 = vrot.slane %v4074_v19, 2  ;;  %v2195_v15 = vsel %vm2147_vm1, %v2194_v24, %v2193_v45  ;;  %v4077_v28 = vunpack.c.l.b16 %v3427_v49 }
  0x8d   : > { %v2204_v6 = vrot.slane %v4075_v16, 1  ;;  %v2206_v20 = vrot.slane %v4076_v52, 7  ;;  %v2197_v34 = vsel %vm2150_vm2, %v2196_v41, %v2195_v15  ;;  %v4078_v57 = vunpack.c.l.b16 %v3430_v48 }
  0x8e   : > { %v2208_v39 = vrot.slane %v4077_v28, 6  ;;  %v4079_v17 = vunpack.c.l.b16 %v3433_v50  ;;  %v2199_v27 = vsel %vm2153_vm3, %v2198_v38, %v2197_v34  ;;  %v4080_v59 = vunpack.c.l.b16 %v3421_v54 }
  0x8f   : > { %v2210_v46 = vrot.slane %v4078_v57, 5  ;;  %v4081_v2 = vunpack.c.l.b16 %v3436_v61  ;;  %v4082_v25 = vunpack.c.l.b16 %v3439_v51  ;;  %v2201_v49 = vsel %vm2156_vm4, %v2200_v3, %v2199_v27  ;;  %v4103_v27 = vld [vmem:[#allocation19_spill] sm:$0xff] }
  0x90   : > { %v2212_v13 = vrot.slane %v4079_v17, 4  ;;  %v2207_v10 = vsel %vm2144_vm0, %v2206_v20, %v4080_v59  ;;  %v4083_v60 = vunpack.c.l.b16 %v3442_v12  ;;  %v4084_v5 = vunpack.c.l.b16 %v3464_v40  ;;  %v4090_v40 = vld [vmem:[#allocation5_spill] sm:$0xff]  ;;  %v4101_v17 = vld [vmem:[#allocation6_spill] sm:$0xff] }
  0x91   : > { %v2214_v23 = vrot.slane %v4081_v2, 3  ;;  %v2216_v9 = vrot.slane %v4082_v25, 2  ;;  %v2209_v48 = vsel %vm2147_vm1, %v2208_v39, %v2207_v10  ;;  %v2203_v54 = vsel %vm2159_vm5, %v2202_v8, %v2201_v49  ;;  %v4097_v20 = vld [vmem:[#allocation17_spill] sm:$0xff] }
  0x92   : > { %v2218_v50 = vrot.slane %v4083_v60, 1  ;;  %v2220_v63 = vrot.slane %v4084_v5, 7  ;;  %v2211_v31 = vsel %vm2150_vm2, %v2210_v46, %v2209_v48  ;;  %v4085_v61 = vunpack.c.l.b16 %v3467_v43  ;;  %v4092_v43 = vld [vmem:[#allocation7_spill] sm:$0xff]  ;;  %v4107_v48 = vld [vmem:[#allocation22_spill] sm:$0xff] }
  0x93   : > { %v4087_v51 = vunpack.c.l.b16 %v4086_v1  ;;  %v2205_v33 = vsel %vm2162_vm6, %v2204_v6, %v2203_v54  ;;  %v2213_v32 = vsel %vm2153_vm3, %v2212_v13, %v2211_v31  ;;  %v4089_v12 = vunpack.c.l.b16 %v4088_v37 }
  0x94   : > { %v2222_v30 = vrot.slane %v4085_v61, 6  ;;  %v4091_v24 = vunpack.c.l.b16 %v4090_v40  ;;  %v2215_v41 = vsel %vm2156_vm4, %v2214_v23, %v2213_v32  ;;  %v4093_v38 = vunpack.c.l.b16 %v4092_v43  ;;  %v4115_v40 = vld [vmem:[#allocation8_spill] sm:$0xff] }
  0x95   : > { %v2224_v4 = vrot.slane %v4087_v51, 5  ;;  %v2221_v18 = vsel %vm2144_vm0, %v2220_v63, %v4089_v12  ;;  %v4094_v14 = vunpack.c.l.b16 %v3479_v55  ;;  %v2217_v36 = vsel %vm2159_vm5, %v2216_v9, %v2215_v41  ;;  %v4099_v55 = vld [vmem:[#allocation18_spill] sm:$0xff]  ;;  %v4112_v51 = vld [vmem:[#allocation11_spill] sm:$0xff]  ;;  %v4118_v41 = vld [vmem:[#allocation9_spill] sm:$0xff] }
  0x96   : > { %v2226_v11 = vrot.slane %v4091_v24, 4  ;;  %v2223_v62 = vsel %vm2147_vm1, %v2222_v30, %v2221_v18  ;;  %v2228_v29 = vrot.slane %v4093_v38, 3  ;;  %v4095_v19 = vunpack.c.l.b16 %v3482_v42 }
  0x97   : > { %v2230_v45 = vrot.slane %v4094_v14, 2  ;;  %v2225_v3 = vsel %vm2150_vm2, %v2224_v4, %v2223_v62  ;;  %v4096_v15 = vunpack.c.l.b16 %v3504_v44  ;;  %v2219_v6 = vsel %vm2162_vm6, %v2218_v50, %v2217_v36 }
  0x98   : > { %v2232_v8 = vrot.slane %v4095_v19, 1  ;;  %v2227_v52 = vsel %vm2153_vm3, %v2226_v11, %v2225_v3  ;;  %v4098_v34 = vunpack.c.l.b16 %v4097_v20  ;;  %v4100_v39 = vunpack.c.l.b16 %v4099_v55 }
  0x99   : > { %v2234_v16 = vrot.slane %v4096_v15, 7  ;;  %v2229_v46 = vsel %vm2156_vm4, %v2228_v29, %v2227_v52  ;;  %v4102_v13 = vunpack.c.l.b16 %v4101_v17  ;;  %v4104_v44 = vunpack.c.l.b16 %v4103_v27 }
  0x9a   : > { %v2236_v28 = vrot.slane %v4098_v34, 6  ;;  %v2238_v57 = vrot.slane %v4100_v39, 5  ;;  %v4105_v10 = vunpack.c.l.b16 %v4036_v47  ;;  %v2231_v23 = vsel %vm2159_vm5, %v2230_v45, %v2229_v46 }
  0x9b   : > { %v2235_v42 = vsel %vm2144_vm0, %v2234_v16, %v4102_v13  ;;  %v2240_v59 = vrot.slane %v4104_v44, 4  ;;  %v4106_v9 = vunpack.c.l.b16 %v4037_v22  ;;  %v4108_v60 = vunpack.c.l.b16 %v4107_v48 }
  0x9c   : > { %v2242_v2 = vrot.slane %v4105_v10, 3  ;;  %v2237_v25 = vsel %vm2147_vm1, %v2236_v28, %v2235_v42  ;;  %v2233_v5 = vsel %vm2162_vm6, %v2232_v8, %v2231_v23  ;;  %v4109_v54 = vunpack.c.l.b16 %v3544_v7 }
  0x9d   : > { %v2244_v49 = vrot.slane %v4106_v9, 2  ;;  %v2246_v50 = vrot.slane %v4108_v60, 1  ;;  %v2239_v63 = vsel %vm2150_vm2, %v2238_v57, %v2237_v25  ;;  %v4110_v47 = vunpack.c.l.b16 %v4039_v26 }
  0x9e   : > { %v2248_v31 = vrot.slane %v4109_v54, 7  ;;  %v2241_v30 = vsel %vm2153_vm3, %v2240_v59, %v2239_v63  ;;  %v4111_v1 = vunpack.c.l.b16 %v3550_v58  ;;  %v4113_v4 = vunpack.c.l.b16 %v4112_v51 }
  0x9f   : > { %v2250_v61 = vrot.slane %v4110_v47, 6  ;;  %v4114_v37 = vunpack.c.l.b16 %v3556_v21  ;;  %v2243_v18 = vsel %vm2156_vm4, %v2242_v2, %v2241_v30  ;;  %v4116_v7 = vunpack.c.l.b16 %v4115_v40 }
  0xa0   : > { %v2252_v22 = vrot.slane %v4111_v1, 5  ;;  %v2254_v32 = vrot.slane %v4113_v4, 4  ;;  %v4117_v26 = vunpack.c.l.b16 %v4041_v35  ;;  %v4119_v62 = vunpack.c.l.b16 %v4118_v41 }
  0xa1   : > { %v2256_v12 = vrot.slane %v4114_v37, 3  ;;  %v2249_v24 = vsel %vm2144_vm0, %v2248_v31, %v4116_v7  ;;  %v2245_v58 = vsel %vm2159_vm5, %v2244_v49, %v2243_v18  ;;  %v2262_v21 = vpack.c.b16 %v3686_v56, %v3686_v56 }
  0xa2   : > { %v2258_v11 = vrot.slane %v4117_v26, 2  ;;  %v2260_v43 = vrot.slane %v4119_v62, 1  ;;  %v2251_v38 = vsel %vm2147_vm1, %v2250_v61, %v2249_v24  ;;  %v2263_v29 = vpack.c.b16 %v3693_v53, %v3693_v53 }
  0xa3   : > { %v2247_v35 = vsel %vm2162_vm6, %v2246_v50, %v2245_v58  ;;  %v2253_v14 = vsel %vm2150_vm2, %v2252_v22, %v2251_v38  ;;  %v2264_v45 = vpack.c.b16 %v3716_v0, %v3716_v0  ;;  %v2265_v36 = vpack.c.b16 %v2205_v33, %v2205_v33  ;;  %2279 = vst.msk [vmem:[%s157_s17] sm:$0xf] %vm2278_vm7, %v2262_v21 }
  0xa4   : > { %v2255_v3 = vsel %vm2153_vm3, %v2254_v32, %v2253_v14  ;;  %v2266_v19 = vpack.c.b16 %v2219_v6, %v2219_v6  ;;  %v2267_v8 = vpack.c.b16 %v2233_v5, %v2233_v5  ;;  %v2268_v56 = vpack.c.b16 %v2247_v35, %v2247_v35  ;;  %2280 = vst.msk [vmem:[%s157_s17 + $0x4] sm:$0xf] %vm2278_vm7, %v2263_v29 }
  0xa5   : > { %v2257_v15 = vsel %vm2156_vm4, %v2256_v12, %v2255_v3  ;;  %2281 = vst.msk [vmem:[%s157_s17 + $0x8] sm:$0xf] %vm2278_vm7, %v2264_v45  ;;  %2282 = vst.msk [vmem:[%s157_s17 + $0xc] sm:$0xf] %vm2278_vm7, %v2265_v36 }
  0xa6   : > { %v2259_v53 = vsel %vm2159_vm5, %v2258_v11, %v2257_v15  ;;  %2283 = vst.msk [vmem:[%s157_s17 + $0x10] sm:$0xf] %vm2278_vm7, %v2266_v19  ;;  %2284 = vst.msk [vmem:[%s157_s17 + $0x14] sm:$0xf] %vm2278_vm7, %v2267_v8 }
  0xa7   : > { %2285 = vst.msk [vmem:[%s157_s17 + $0x18] sm:$0xf] %vm2278_vm7, %v2268_v56  ;;  %v2261_v0 = vsel %vm2162_vm6, %v2260_v43, %v2259_v53 }
  0xa8   : > { %v2269_v33 = vpack.c.b16 %v2261_v0, %v2261_v0 }
  0xaa   : > { %2286 = vst.msk [vmem:[%s157_s17 + $0x1c] sm:$0xf] %vm2278_vm7, %v2269_v33 }
  0xab PF: > { %s11_s8 = sadd.s32 1, %s2502_s8   ;;  %s4120_s6 = smov %s2498_s7 }
  0xac   : > { %p8_p5 = scmp.ge.s32.totalorder %s11_s8, 4   ;;  %s4121_s7 = smov %s4123_s9 }
  0xae   :  { %10 = sbr.rel (!%p8_p5) target bundleno = 2 (0x2), region = 54 }

// kernel: down_forward.4
= control target key start
LH: loop header
LB: loop body
LE: loop exit
PB: predicated region body
PF: predicated region fallthrough
CT: control target
= control target key end

     0   :  { %s2995_s18 = smov 0   ;;  %s2997_s19 = smov 0   ;;  %s3955_s0 = inlined_call_operand.vmem [shape: bf16[2,224,4], index: 0, kind: input, shape index: {}]   ;;  %s3956_s1 = inlined_call_operand.vmem [shape: bf16[3,12,8], index: 1, kind: input, shape index: {}]   ;;  %s3957_s2 = inlined_call_operand.vmem [shape: f32[1,8], index: 2, kind: input, shape index: {}]   ;;  %s3958_s3 = inlined_call_operand.vmem [shape: f32[1,8], index: 3, kind: input, shape index: {}]   ;;  %s3959_s4 = inlined_call_operand.vmem [shape: f32[184,1], index: 4, kind: input, shape index: {}]   ;;  %s3960_s5 = inlined_call_operand.vmem [shape: bf16[2,224,8], index: 5, kind: output, shape index: {}]  }
   0x1   :  { %s2999_s20 = smov 0   ;;  %s3001_s21 = smov 0  }
   0x2   :  { %s3003_s22 = smov 0  }
   0x3 LB: > { %s2415_s23 = sadd.s32 4294967295, %s2956_s22   ;;  %s27_s24 = sadd.s32 1, %s2952_s21  ;;  %s2956_s22 = sphi %s3003_s22, %s15_s22   ;;  %s2952_s21 = sphi %s3001_s21, %s3989_s21   ;;  %s2948_s20 = sphi %s2999_s20, %s3988_s20   ;;  %s2944_s19 = sphi %s2997_s19, %s3987_s19   ;;  %s2940_s18 = sphi %s2995_s18, %s3986_s18  }
   0x4   : > { %p29_p0 = scmp.ge.s32.totalorder %s27_s24, 2  ;;  %s151_s25 = sadd.s32 1, %s2944_s19 }
   0x5   : > { %p161_p1 = scmp.ne.s32.totalorder %s2944_s19, %s2940_s18  ;;  %p162_p2 = scmp.eq.s32.totalorder %s2415_s23, 1 }
   0x6   : > { %s3991_s24 = smov (%p29_p0, %s27_s24), 0  ;;  %p2420_p4 = scmp.ge.s32.totalorder %s2956_s22, 1 }
   0x7   : > { %p3027_p3 = por %p162_p2, %p161_p1  ;;  %s146_s27 = ssub.s32 %s2952_s21, %s3991_s24 }
   0x8   : > { %p212_p5 = scmp.lt.s32.totalorder %s2956_s22, 3  ;;  %p149_p6 = scmp.eq.s32.totalorder %s146_s27, 0 }
   0xa   : > { %p213_p7 = pnand %p2420_p4, %p212_p5 }
   0xb   : > { %s3036_s28 = scalar_select %p149_p6, %s2944_s19, %s151_s25  }
   0xc   : > { %216 = sbr.rel (%p213_p7) target bundleno = 538 (0x21a), region = 40 }
  0x13   : > { %p244_p8 = scmp.lt.s32.totalorder %s2948_s20, 1  ;;  %vm473_vm0 = vcmask 1046528   ;;  %vm353_vm1 = vsmask.f32 7424  ;;  %s2962_s9 = smov 8   ;;  %vm912_vm2 = vcmask 1045504  }
  0x14   : > { %s2963_s10 = smov 4   ;;  %vm521_vm3 = vcmask 31744   ;;  %vm547_vm4 = vcmask 64512   ;;  %vm887_vm5 = vcmask 97280   ;;  %s241_s16 = sand.u32 1, %s2940_s18  }
  0x15   : > { %s245_s29 = scalar_select %p244_p8, %s2948_s20, 1 }
  0x16   : > { %s2779_s25 = smul.u32 92, %s241_s16  ;;  %s3886_s7 = smov (%p3027_p3), 0  }
  0x17   : > { %s2780_s30 = smul.u32 112, %s245_s29 }
  0x18   : > { %s3788_s18 = scalar_lea.vmem [#allocation2], %s2779_s25   ;;  %s2781_s27 = smul.u32 (%p3027_p3), 112, %s2948_s20 }
  0x19   : > { %s3043_s8 = scalar_lea.vmem %s3955_s0, %s2780_s30 }
  0x1a   : > { %v3046_v0 = vld [vmem:[%s3043_s8 + $0x8] sm:$0xff]   ;;  %v3049_v1 = vld [vmem:[%s3043_s8 + $0x10] sm:$0xff]   ;;  %v3052_v2 = vld [vmem:[%s3043_s8] sm:$0xff]   ;;  %s3884_s6 = scalar_lea.vmem (%p3027_p3), %s3960_s5, %s2781_s27  }
  0x1b   : > { %v475_v3 = vrot.slane %v3046_v0, 1  ;;  %v477_v4 = vrot.slane %v3049_v1, 1  ;;  %v474_v5 = vrot.slane %v3052_v2, 1  ;;  %v3058_v6 = vld [vmem:[%s3043_s8 + $0x8] sm:$0xff]   ;;  %v3064_v8 = vld [vmem:[%s3043_s8 + $0x10] sm:$0xff]   ;;  %v355_v9 = vshrl.u32 %v3052_v2, 16 }
  0x1c   : > { %v357_v10 = vshll.u32 %v3052_v2, 16  ;;  %v362_v11 = vshll.u32 %v3046_v0, 16  ;;  %v783_v13 = vrot.slane %v3058_v6, 1  ;;  %v3073_v14 = vld [vmem:[%s3043_s8 + $0x18] sm:$0xff]   ;;  %v665_v15 = vshrl.u32 %v3058_v6, 16  ;;  %v3086_v29 = vld [vmem:[%s3043_s8 + $0x20] sm:$0xff]  }
  0x1d   : > { %v478_v7 = vsel %vm473_vm0, %v475_v3, %v477_v4  ;;  %v476_v12 = vsel %vm473_vm0, %v474_v5, %v475_v3  ;;  %v667_v16 = vshll.u32 %v3058_v6, 16  ;;  %v784_v17 = vrot.slane %v3064_v8, 1  ;;  %v3089_v30 = vld [vmem:[%s3043_s8 + $0x18] sm:$0xff]   ;;  %v3099_v40 = vld [vmem:[%s3043_s8 + $0x20] sm:$0xff]   ;;  %v3109_v49 = vld [vmem:[%s3043_s8 + $0x28] sm:$0xff]  }
  0x1e   : > { %499 = vrot.lane.b32.xlu0 %v478_v7, %s2962_s9  ;;  %497 = vrot.lane.b32.xlu1 %v476_v12, %s2962_s9  ;;  %v359_v18 = vrot.slane %v357_v10, 1  ;;  %v364_v19 = vrot.slane %v362_v11, 1  ;;  %v672_v20 = vshll.u32 %v3064_v8, 16  ;;  %v786_v21 = vrot.slane %v3073_v14, 1  ;;  %v3127_v63 = vld [vmem:[%s3043_s8 + $0x30] sm:$0xff]  }
  0x1f   : > { %v669_v22 = vrot.slane %v667_v16, 1  ;;  %v366_v23 = vshrl.u32 %v3046_v0, 16  ;;  %v370_v24 = vshll.u32 %v3049_v1, 16  ;;  %v785_v25 = vsel %vm473_vm0, %v783_v13, %v784_v17 }
  0x20   : > { %v360_v26 = vor.u32 %v359_v18, %v355_v9  ;;  %v674_v27 = vrot.slane %v672_v20, 1  ;;  %v676_v28 = vshrl.u32 %v3064_v8, 16  ;;  %v787_v33 = vsel %vm473_vm0, %v784_v17, %v786_v21  ;;  %v3131_v9 = vld [vmem:[%s3043_s8 + $0x28] sm:$0xff]   ;;  %v3144_v18 = vld [vmem:[%s3043_s8 + $0x30] sm:$0xff]  }
  0x21   : > { %v670_v31 = vor.u32 %v669_v22, %v665_v15  ;;  %v368_v34 = vor.u32 %v366_v23, %v364_v19  ;;  %v680_v35 = vshll.u32 %v3073_v14, 16  ;;  %v372_v36 = vrot.slane %v370_v24, 1  ;;  %v3151_v23 = vld [vmem:[%s3043_s8 + $0x38] sm:$0xff]  }
  0x22   : > { %806 = vrot.lane.b32.xlu1 %v785_v25, %s2962_s9  ;;  %v365_v32 = vsel %vm353_vm1, %v360_v26, %v364_v19  ;;  %v678_v37 = vor.u32 %v676_v28, %v674_v27  ;;  %v684_v38 = vshrl.u32 %v3073_v14, 16  ;;  %v688_v39 = vshll.u32 %v3086_v29, 16  ;;  %v3156_v28 = vld [vmem:[%s3043_s8 + $0x58] sm:$0xff]  }
  0x23   : > { %449 = vrot.lane.b32.xlu0 %v365_v32, %s2963_s10  ;;  %v675_v41 = vsel %vm353_vm1, %v670_v31, %v674_v27  ;;  %v682_v42 = vrot.slane %v680_v35, 1  ;;  %v374_v43 = vshrl.u32 %v3049_v1, 16  ;;  %v378_v44 = vshll.u32 %v3089_v30, 16 }
  0x24   : > { %v373_v45 = vsel %vm353_vm1, %v368_v34, %v372_v36  ;;  %v690_v47 = vrot.slane %v688_v39, 1  ;;  %v386_v48 = vshll.u32 %v3099_v40, 16  ;;  %v382_v53 = vshrl.u32 %v3089_v30, 16 }
  0x25   : > { %v686_v46 = vor.u32 %v684_v38, %v682_v42  ;;  %v683_v50 = vsel %vm353_vm1, %v678_v37, %v682_v42  ;;  %v376_v51 = vor.u32 %v374_v43, %v372_v36  ;;  %v380_v52 = vrot.slane %v378_v44, 1  ;;  %v3166_v36 = vld [vmem:[%s3043_s8 + $0x10] sm:$0xff]   ;;  %v3173_v42 = vld [vmem:[%s3043_s8 + $0x60] sm:$0xf]  ;;  %v2458_v43 = vld [vmem:[%s3043_s8 + $0x64] sm:$0xf] }
  0x26   : > { %808 = vrot.lane.b32.xlu1 %v787_v33, %s2962_s9  ;;  %v479_v55 = vrot.slane %v3089_v30, 1  ;;  %v388_v56 = vrot.slane %v386_v48, 1  ;;  %v692_v59 = vshrl.u32 %v3086_v29, 16  ;;  %v696_v60 = vshll.u32 %v3109_v49, 16 }
  0x27   : > { %759 = vrot.lane.b32.xlu0 %v675_v41, %s2963_s10  ;;  %v691_v54 = vsel %vm353_vm1, %v686_v46, %v690_v47  ;;  %v381_v57 = vsel %vm353_vm1, %v376_v51, %v380_v52  ;;  %v384_v58 = vor.u32 %v382_v53, %v380_v52  ;;  %v788_v61 = vrot.slane %v3086_v29, 1 }
  0x28   : > { %v480_v62 = vsel %vm473_vm0, %v477_v4, %v479_v55  ;;  %v694_v5 = vor.u32 %v692_v59, %v690_v47  ;;  %v698_v7 = vrot.slane %v696_v60, 1  ;;  %v790_v11 = vrot.slane %v3109_v49, 1  ;;  %v3180_v47 = vld [vmem:[%s3043_s8 + $0x18] sm:$0xff]  }
  0x29   : > { %v389_v3 = vsel %vm353_vm1, %v384_v58, %v388_v56  ;;  %v789_v10 = vsel %vm473_vm0, %v786_v21, %v788_v61  ;;  %v481_v4 = vrot.slane %v3099_v40, 1  ;;  %v700_v12 = vshrl.u32 %v3109_v49, 16 }
  0x2a   : > { %451 = vrot.lane.b32.xlu1 %v373_v45, %s2963_s10  ;;  %v704_v13 = vshll.u32 %v3127_v63, 16  ;;  %v699_v15 = vsel %vm353_vm1, %v694_v5, %v698_v7  ;;  %v390_v16 = vshrl.u32 %v3099_v40, 16  ;;  %v394_v17 = vshll.u32 %v3131_v9, 16 }
  0x2b   : > { %761 = vrot.lane.b32.xlu0 %v683_v50, %s2963_s10  ;;  %v791_v19 = vsel %vm473_vm0, %v788_v61, %v790_v11  ;;  %v482_v20 = vsel %vm473_vm0, %v479_v55, %v481_v4  ;;  %v702_v21 = vor.u32 %v700_v12, %v698_v7  ;;  %v398_v26 = vshrl.u32 %v3131_v9, 16  ;;  %v3184_v50 = vld [vmem:[%s3043_s8 + $0x40] sm:$0xff]  }
  0x2c   : > { %v706_v22 = vrot.slane %v704_v13, 1  ;;  %v392_v24 = vor.u32 %v390_v16, %v388_v56  ;;  %v396_v25 = vrot.slane %v394_v17, 1  ;;  %v402_v27 = vshll.u32 %v3144_v18, 16 }
  0x2d   : > { %v483_v31 = vrot.slane %v3131_v9, 1  ;;  %v792_v33 = vrot.slane %v3127_v63, 1  ;;  %v708_v34 = vshrl.u32 %v3127_v63, 16  ;;  %v712_v35 = vshll.u32 %v3151_v23, 16 }
  0x2e   : > { %763 = vrot.lane.b32.xlu1 %v691_v54, %s2963_s10  ;;  %v707_v32 = vsel %vm353_vm1, %v702_v21, %v706_v22  ;;  %v397_v37 = vsel %vm353_vm1, %v392_v24, %v396_v25  ;;  %v400_v38 = vor.u32 %v398_v26, %v396_v25  ;;  %v3169_v39 = vrot.slane %v402_v27, 1 }
  0x2f   : > { %453 = vrot.lane.b32.xlu0 %v381_v57, %s2963_s10  ;;  %v744_v41 = vshll.u32 %v3156_v28, 16  ;;  %v484_v44 = vsel %vm473_vm0, %v481_v4, %v483_v31  ;;  %v710_v45 = vor.u32 %v708_v34, %v706_v22  ;;  %v714_v46 = vrot.slane %v712_v35, 1  ;;  %v3209_v4 = vld [vmem:[%s3043_s8 + $0x48] sm:$0xff]   ;;  %v3245_v35 = vld [vmem:[%s3043_s8 + $0x50] sm:$0xff]  }
  0x30   : > { %v1297_v48 = vshll.u32 %v3166_v36, 16  ;;  %v405_v51 = vsel %vm353_vm1, %v400_v38, %v3169_v39  ;;  %v3191_v53 = vcombine.low %v3173_v42, %v2458_v43  ;;  %v748_v54 = vshrl.u32 %v3156_v28, 16  ;;  %v3242_v34 = vld [vmem:[%s3043_s8 + $0x28] sm:$0xff]  }
  0x31   : > { %v3188_v52 = vrot.slane %v744_v41, 1  ;;  %v793_v55 = vsel %vm473_vm0, %v790_v11, %v792_v33  ;;  %v794_v56 = vrot.slane %v3151_v23, 1  ;;  %v3961_v57 = vrot.slane %v3144_v18, 1 }
  0x32   : > { %501 = vrot.lane.b32.xlu1 %v480_v62, %s2962_s9  ;;  %v802_v58 = vrot.slane %v3156_v28, 1  ;;  %v752_v60 = vshll.u32 %v3191_v53, 16  ;;  %v3964_v61 = vrot.slane %v3191_v53, 1  ;;  %v715_v62 = vsel %vm353_vm1, %v710_v45, %v714_v46 }
  0x33   : > { %455 = vrot.lane.b32.xlu0 %v389_v3, %s2963_s10  ;;  %v750_v59 = vor.u32 %v748_v54, %v3188_v52  ;;  %v1295_v3 = vshrl.u32 %v3166_v36, 16  ;;  %v1299_v5 = vrot.slane %v1297_v48, 1  ;;  %v1302_v7 = vshll.u32 %v3180_v47, 16 }
  0x34   : > { %v720_v11 = vshll.u32 %v3184_v50, 16  ;;  %v3211_v12 = vrot.slane %v752_v60, 1  ;;  %v3218_v13 = vsel %vm473_vm0, %v802_v58, %v3964_v61  ;;  %v795_v17 = vsel %vm473_vm0, %v792_v33, %v794_v56 }
  0x35   : > { %v1304_v21 = vrot.slane %v1302_v7, 1  ;;  %v724_v25 = vshrl.u32 %v3184_v50, 16  ;;  %v728_v26 = vshll.u32 %v3209_v4, 16  ;;  %v796_v27 = vrot.slane %v3184_v50, 1 }
  0x36   : > { %810 = vrot.lane.b32.xlu1 %v789_v10, %s2962_s9  ;;  %v716_v10 = vshrl.u32 %v3151_v23, 16  ;;  %v3226_v16 = vsel %vm353_vm1, %v750_v59, %v3211_v12  ;;  %v722_v24 = vrot.slane %v720_v11, 1  ;;  %v1414_v45 = vrot.slane %v3180_v47, 1  ;;  %v3258_v59 = vld [vmem:[%s3043_s8 + $0x50] sm:$0xff]   ;;  %v3273_v11 = vld [vmem:[%s3043_s8 + $0x68] sm:$0xf] }
  0x37   : > { %765 = vrot.lane.b32.xlu0 %v699_v15, %s2963_s10  ;;  %v3222_v15 = vld [vmem:[%s3043_s8 + $0x20] sm:$0xff]   ;;  %v730_v41 = vrot.slane %v728_v26, 1  ;;  %v797_v43 = vsel %vm473_vm0, %v794_v56, %v796_v27  ;;  %v1318_v60 = vshll.u32 %v3242_v34, 16  ;;  %3972 = vst [vmem:[#allocation3_spill] sm:$0xff] %v3273_v11  ;;  %v2897_v26 = vld [vmem:[%s3956_s1 + $0x10] sm:$0x3f]  }
  0x38   : > { %v718_v22 = vor.u32 %v716_v10, %v714_v46  ;;  %v1310_v33 = vshll.u32 %v3222_v15, 16  ;;  %v726_v38 = vor.u32 %v724_v25, %v722_v24  ;;  %v3252_v46 = vld [vmem:[%s3043_s8 + $0x60] sm:$0xff]   ;;  %v1416_v54 = vrot.slane %v3222_v15, 1 }
  0x39   : > { %v1314_v56 = vshrl.u32 %v3222_v15, 16  ;;  %v2894_v10 = vld [vmem:[%s3956_s1] sm:$0x3f]   ;;  %v434_v25 = vshll.u32 %v3258_v59, 16 }
  0x3a   : > { %812 = vrot.lane.b32.xlu1 %v791_v19, %s2962_s9  ;;  %v486_v19 = vsel %vm473_vm0, %v483_v31, %v3961_v57  ;;  %v731_v7 = vsel %vm353_vm1, %v726_v38, %v730_v41  ;;  %v291_v38 = vld [vmem:[%s3043_s8 + $0x5c] sm:$0xf]  ;;  %2776 = vmatprep.subr.msk.bf16.mxu0 %vm912_vm2, %v2894_v10 }
  0x3b   : > { %503 = vrot.lane.b32.xlu0 %v482_v20, %s2962_s9  ;;  %v1300_v20 = vor.u32 %v1299_v5, %v1295_v3  ;;  %v736_v3 = vshll.u32 %v3245_v35, 16  ;;  %v2893_v5 = vld [vmem:[%s3956_s1 + $0x8] sm:$0x3f]  }
  0x3c   : > { %2775 = vmatprep.subr.msk.bf16.mxu1 %vm912_vm2, %v2893_v5 }
  0x3d   : > { %v1305_v31 = vsel %vm353_vm1, %v1300_v20, %v1304_v21  ;;  %v1374_v20 = vshll.u32 %v3252_v46, 16 }
  0x3e   : > { %767 = vrot.lane.b32.xlu1 %v707_v32, %s2963_s10  ;;  %v1306_v32 = vshrl.u32 %v3180_v47, 16 }
  0x3f   : > { %457 = vrot.lane.b32.xlu0 %v397_v37, %s2963_s10  ;;  %v723_v37 = vsel %vm353_vm1, %v718_v22, %v722_v24  ;;  %v1417_v22 = vsel %vm473_vm0, %v1414_v45, %v1416_v54 }
  0x40   : > { %v1308_v48 = vor.u32 %v1306_v32, %v1304_v21 }
  0x42   : > { %505 = vrot.lane.b32.xlu1 %v484_v44, %s2962_s9  ;;  %v1413_v44 = vrot.slane %v3166_v36, 1 }
  0x43   : > { %459 = vrot.lane.b32.xlu0 %v405_v51, %s2963_s10  ;;  %v1312_v51 = vrot.slane %v1310_v33, 1  ;;  %v1320_v33 = vrot.slane %v1318_v60, 1  ;;  %v3311_v60 = vrot.slane %v434_v25, 1  ;;  %v3329_v25 = vld [vmem:[%s3043_s8 + $0x30] sm:$0xff]  }
  0x45   : > { %v1313_v21 = vsel %vm353_vm1, %v1308_v48, %v1312_v51  ;;  %v1316_v32 = vor.u32 %v1314_v56, %v1312_v51  ;;  %v740_v48 = vshrl.u32 %v3245_v35, 16  ;;  %v3305_v51 = vrot.slane %v1374_v20, 1 }
  0x46   : > { %814 = vrot.lane.b32.xlu1 %v793_v55, %s2962_s9  ;;  %v798_v55 = vrot.slane %v3209_v4, 1 }
  0x47   : > { %769 = vrot.lane.b32.xlu0 %v715_v62, %s2963_s10  ;;  %v732_v62 = vshrl.u32 %v3209_v4, 16 }
  0x48   : > { %v799_v24 = vsel %vm473_vm0, %v796_v27, %v798_v55  ;;  %v914_v27 = vsel %vm912_vm2, %v2893_v5, 0 }
  0x49   : > { %2649 = vmatpush3.bf16.msra.mxu1 %v914_v27 }
  0x4a   : > { %816 = vrot.lane.b32.xlu1 %v795_v17, %s2962_s9  ;;  %v2523_v17 = vld [vmem:[%s3043_s8 + $0x6c] sm:$0xf]  ;;  %2777 = vmatprep.subr.msk.bf16.mxu1 %vm912_vm2, %v2894_v10 }
  0x4b   : > { %507 = vrot.lane.b32.xlu0 %v486_v19, %s2962_s9  ;;  %v1415_v19 = vsel %vm473_vm0, %v1413_v44, %v1414_v45  ;;  %v738_v44 = vrot.slane %v736_v3, 1  ;;  %v3302_v45 = vsel %vm912_vm2, %v2894_v10, 0  ;;  %v438_v3 = vshrl.u32 %v3258_v59, 16 }
  0x4c   : > { %2675 = vmatpush3.bf16.msra.mxu0 %v3302_v45 }
  0x4d   : > { %2778 = vmatprep.subr.msk.bf16.mxu0 %vm912_vm2, %v2897_v26  ;;  %v440_v27 = vor.u32 %v438_v3, %v3311_v60  ;;  %v1321_v3 = vsel %vm353_vm1, %v1316_v32, %v1320_v33  ;;  %v1418_v32 = vrot.slane %v3242_v34, 1 }
  0x4e   : > { %1389 = vrot.lane.b32.xlu1 %v1305_v31, %s2963_s10  ;;  %v3292_v31 = vcombine.low %v3273_v11, %v2523_v17 }
  0x4f   : > { %771 = vrot.lane.b32.xlu0 %v723_v37, %s2963_s10  ;;  %v3295_v37 = vld [vmem:[%s3043_s8 + $0x58] sm:$0xf] }
  0x50   : > { %3973 = vst [vmem:[#allocation4_spill] sm:$0xff] %v3295_v37  ;;  %v1382_v56 = vshll.u32 %v3292_v31, 16  ;;  %v3962_v5 = vrot.slane %v3292_v31, 1 }
  0x52   : > { %818 = vrot.lane.b32.xlu1 %v797_v43, %s2962_s9  ;;  %v734_v43 = vor.u32 %v732_v62, %v730_v41  ;;  %v1378_v41 = vshrl.u32 %v3252_v46, 16  ;;  %v3314_v62 = vcombine.low %v3295_v37, %v291_v38  ;;  %v3322_v20 = vrot.slane %v1382_v56, 1 }
  0x53   : > { %773 = vrot.lane.b32.xlu0 %v731_v7, %s2963_s10  ;;  %v3963_v7 = vrot.slane %v3252_v46, 1  ;;  %v3966_v38 = vrot.slane %v3258_v59, 1 }
  0x54   : > { %v1380_v17 = vor.u32 %v1378_v41, %v3305_v51  ;;  %v442_v57 = vshll.u32 %v3314_v62, 16 }
  0x55   : > { %v3344_v10 = vsel %vm473_vm0, %v3963_v7, %v3962_v5  ;;  %v1322_v5 = vshrl.u32 %v3242_v34, 16  ;;  %v739_v7 = vsel %vm353_vm1, %v734_v43, %v738_v44 }
  0x56   : > { %1436 = vrot.lane.b32.xlu1 %v1415_v19, %s2962_s9  ;;  %v3325_v19 = vsel %vm912_vm2, %v2897_v26, 0  ;;  %v3337_v41 = vsel %vm353_vm1, %v1380_v17, %v3322_v20  ;;  %v3347_v26 = vrot.slane %v442_v57, 1  ;;  %v800_v17 = vrot.slane %v3245_v35, 1 }
  0x57   : > { %1391 = vrot.lane.b32.xlu0 %v1313_v21, %s2963_s10  ;;  %v3965_v21 = vrot.slane %v3314_v62, 1  ;;  %v1326_v57 = vshll.u32 %v3329_v25, 16 }
  0x58   : > { %v3364_v61 = vsel %vm353_vm1, %v440_v27, %v3347_v26  ;;  %v1330_v27 = vshrl.u32 %v3329_v25, 16 }
  0x59   : > { %v3354_v56 = vsel %vm473_vm0, %v3966_v38, %v3965_v21  ;;  %v3373_v21 = vld [vmem:[%s3043_s8 + $0x38] sm:$0xff]  }
  0x5a   : > { %1438 = vrot.lane.b32.xlu1 %v1417_v22, %s2962_s9  ;;  %v742_v22 = vor.u32 %v740_v48, %v738_v44  ;;  %v1324_v44 = vor.u32 %v1322_v5, %v1320_v33  ;;  %v1328_v48 = vrot.slane %v1326_v57, 1 }
  0x5b   : > { %820 = vrot.lane.b32.xlu0 %v799_v24, %s2962_s9  ;;  %v801_v24 = vsel %vm473_vm0, %v798_v55, %v800_v17  ;;  %v1420_v55 = vrot.slane %v3329_v25, 1 }
  0x5c   : > { %v747_v43 = vsel %vm353_vm1, %v742_v22, %v3188_v52  ;;  %v1329_v38 = vsel %vm353_vm1, %v1324_v44, %v1328_v48  ;;  %v1332_v33 = vor.u32 %v1330_v27, %v1328_v48  ;;  %v3393_v22 = vld [vmem:[%s3043_s8 + $0x40] sm:$0xff]  }
  0x5d   : > { %v1421_v52 = vsel %vm473_vm0, %v1418_v32, %v1420_v55 }
  0x5e   : > { %1393 = vrot.lane.b32.xlu1 %v1321_v3, %s2963_s10  ;;  %v1334_v3 = vshll.u32 %v3373_v21, 16 }
  0x5f   : > { %775 = vrot.lane.b32.xlu0 %v739_v7, %s2963_s10  ;;  %v1419_v7 = vsel %vm473_vm0, %v1416_v54, %v1418_v32  ;;  %v803_v54 = vsel %vm473_vm0, %v800_v17, %v802_v58  ;;  %v1342_v32 = vshll.u32 %v3393_v22, 16  ;;  %v1422_v17 = vrot.slane %v3373_v21, 1 }
  0x60   : > { %v1336_v5 = vrot.slane %v1334_v3, 1 }
  0x61   : > { %v1344_v48 = vrot.slane %v1342_v32, 1  ;;  %v1423_v27 = vsel %vm473_vm0, %v1420_v55, %v1422_v17 }
  0x62   : > { %822 = vrot.lane.b32.xlu1 %v801_v24, %s2962_s9  ;;  %v1337_v57 = vsel %vm353_vm1, %v1332_v33, %v1336_v5  ;;  %v1338_v24 = vshrl.u32 %v3373_v21, 16  ;;  %v406_v33 = vshrl.u32 %v3144_v18, 16 }
  0x63   : > { %777 = vrot.lane.b32.xlu0 %v747_v43, %s2963_s10  ;;  %v3407_v43 = vld [vmem:[%s3043_s8 + $0x48] sm:$0xff]  }
  0x64   : > { %v1340_v44 = vor.u32 %v1338_v24, %v1336_v5  ;;  %v1350_v3 = vshll.u32 %v3407_v43, 16 }
  0x66   : > { %1440 = vrot.lane.b32.xlu1 %v1419_v7, %s2962_s9  ;;  %v3410_v7 = vld [vmem:[%s3043_s8 + $0x38] sm:$0xff]  }
  0x67   : > { %1395 = vrot.lane.b32.xlu0 %v1329_v38, %s2963_s10  ;;  %v756_v38 = vshrl.u32 %v3191_v53, 16  ;;  %v410_v5 = vshll.u32 %v3410_v7, 16  ;;  %v414_v32 = vshrl.u32 %v3410_v7, 16 }
  0x69   : > { %v758_v58 = vor.u32 %v756_v38, %v3211_v12  ;;  %v1346_v12 = vshrl.u32 %v3393_v22, 16  ;;  %v408_v38 = vor.u32 %v406_v33, %v3169_v39  ;;  %v412_v24 = vrot.slane %v410_v5, 1 }
  0x6a   : > { %1442 = vrot.lane.b32.xlu1 %v1421_v52, %s2962_s9  ;;  %v1345_v52 = vsel %vm353_vm1, %v1340_v44, %v1344_v48  ;;  %v3432_v44 = vld [vmem:[%s3043_s8 + $0x50] sm:$0xff]   ;;  %v1354_v39 = vshrl.u32 %v3407_v43, 16 }
  0x6b   : > { %824 = vrot.lane.b32.xlu0 %v803_v54, %s2962_s9  ;;  %v3423_v54 = vld [vmem:[%s3043_s8 + $0x40] sm:$0xff]   ;;  %v1348_v55 = vor.u32 %v1346_v12, %v1344_v48  ;;  %3975 = vst [vmem:[#allocation6_spill] sm:$0xff] %v3432_v44  ;;  %v487_v48 = vrot.slane %v3410_v7, 1  ;;  %v413_v12 = vsel %vm353_vm1, %v408_v38, %v412_v24  ;;  %v1358_v33 = vshll.u32 %v3432_v44, 16 }
  0x6c   : > { %3974 = vst [vmem:[#allocation5_spill] sm:$0xff] %v3423_v54 }
  0x6d   : > { %v1360_v38 = vrot.slane %v1358_v33, 1 }
  0x6e   : > { %1397 = vrot.lane.b32.xlu1 %v1337_v57, %s2963_s10  ;;  %v1352_v57 = vrot.slane %v1350_v3, 1  ;;  %v416_v3 = vor.u32 %v414_v32, %v412_v24  ;;  %v3454_v24 = vld [vmem:[%s3043_s8 + $0x48] sm:$0xff]  }
  0x6f   : > { %779 = vrot.lane.b32.xlu0 %v3226_v16, %s2963_s10  ;;  %v1424_v16 = vrot.slane %v3393_v22, 1 }
  0x70   : > { %v1356_v37 = vor.u32 %v1354_v39, %v1352_v57  ;;  %v426_v39 = vshll.u32 %v3454_v24, 16 }
  0x72   : > { %826 = vrot.lane.b32.xlu1 %v3218_v13, %s2962_s9  ;;  %v1425_v13 = vsel %vm473_vm0, %v1422_v17, %v1424_v16  ;;  %v1353_v17 = vsel %vm353_vm1, %v1348_v55, %v1352_v57  ;;  %v3450_v55 = vld [vmem:[%s3043_s8 + $0x58] sm:$0xff]   ;;  %v422_v57 = vshrl.u32 %v3423_v54, 16  ;;  %v428_v11 = vrot.slane %v426_v39, 1 }
  0x73   : > { %781 = vrot.lane.b32.xlu0 %v758_v58, %s2963_s10  ;;  %v418_v58 = vshll.u32 %v3423_v54, 16 }
  0x76   : > { %1444 = vrot.lane.b32.xlu1 %v1423_v27, %s2962_s9  ;;  %v3976_v27 = vrot.slane %v3191_v53, 1  ;;  %v3977_v53 = vrot.slane %v3144_v18, 1  ;;  %v1428_v18 = vrot.slane %v3432_v44, 1 }
  0x77   : > { %1399 = vrot.lane.b32.xlu0 %v1345_v52, %s2963_s10  ;;  %v420_v52 = vrot.slane %v418_v58, 1  ;;  %v1362_v58 = vshrl.u32 %v3432_v44, 16 }
  0x78   : > { %v488_v5 = vsel %vm473_vm0, %v3977_v53, %v487_v48 }
  0x79   : > { %v1364_v33 = vor.u32 %v1362_v58, %v1360_v38 }
  0x7a   : > { %1446 = vrot.lane.b32.xlu1 %v1425_v13, %s2962_s9  ;;  %v1426_v13 = vrot.slane %v3407_v43, 1 }
  0x7b   : > { %828 = vrot.lane.b32.xlu0 %v3976_v27, %s2962_s9  ;;  %v421_v27 = vsel %vm353_vm1, %v416_v3, %v420_v52  ;;  %v489_v3 = vrot.slane %v3423_v54, 1 }
  0x7c   : > { %v1427_v32 = vsel %vm473_vm0, %v1424_v16, %v1426_v13  ;;  %v1429_v16 = vsel %vm473_vm0, %v1426_v13, %v1428_v18  ;;  %v1370_v13 = vshrl.u32 %v3450_v55, 16 }
  0x7e   : > { %1401 = vrot.lane.b32.xlu1 %v1353_v17, %s2963_s10  ;;  %v1366_v17 = vshll.u32 %v3450_v55, 16 }
  0x7f   : > { %461 = vrot.lane.b32.xlu0 %v413_v12, %s2963_s10  ;;  %v1361_v12 = vsel %vm353_vm1, %v1356_v37, %v1360_v38  ;;  %v430_v37 = vshrl.u32 %v3454_v24, 16  ;;  %v1430_v38 = vrot.slane %v3450_v55, 1 }
  0x80   : > { %v1368_v53 = vrot.slane %v1366_v17, 1 }
  0x81   : > { %v432_v54 = vor.u32 %v430_v37, %v428_v11  ;;  %v446_v37 = vshrl.u32 %v3314_v62, 16 }
  0x82   : > { %509 = vrot.lane.b32.xlu1 %v488_v5, %s2962_s9  ;;  %v490_v5 = vsel %vm473_vm0, %v487_v48, %v489_v3  ;;  %v1369_v44 = vsel %vm353_vm1, %v1364_v33, %v1368_v53 }
  0x83   : > { %463 = vrot.lane.b32.xlu0 %v421_v27, %s2963_s10  ;;  %v424_v27 = vor.u32 %v422_v57, %v420_v52  ;;  %v437_v17 = vsel %vm353_vm1, %v432_v54, %v3311_v60  ;;  %v1372_v57 = vor.u32 %v1370_v13, %v1368_v53  ;;  %v3978_v54 = vrot.slane %v3252_v46, 1 }
  0x85   : > { %v1377_v39 = vsel %vm353_vm1, %v1372_v57, %v3305_v51  ;;  %v3979_v51 = vrot.slane %v3258_v59, 1 }
  0x86   : > { %1448 = vrot.lane.b32.xlu1 %v1427_v32, %s2962_s9  ;;  %v491_v32 = vrot.slane %v3454_v24, 1 }
  0x87   : > { %1403 = vrot.lane.b32.xlu0 %v1361_v12, %s2963_s10  ;;  %v429_v12 = vsel %vm353_vm1, %v424_v27, %v428_v11  ;;  %v1431_v11 = vsel %vm473_vm0, %v1428_v18, %v1430_v38  ;;  %v1433_v18 = vsel %vm473_vm0, %v1430_v38, %v3978_v54 }
  0x88   : > { %v492_v52 = vsel %vm473_vm0, %v489_v3, %v491_v32  ;;  %v494_v53 = vsel %vm473_vm0, %v491_v32, %v3979_v51 }
  0x8a   : > { %1450 = vrot.lane.b32.xlu1 %v1429_v16, %s2962_s9 }
  0x8b   : > { %511 = vrot.lane.b32.xlu0 %v490_v5, %s2962_s9 }
  0x8e   : > { %1405 = vrot.lane.b32.xlu1 %v1369_v44, %s2963_s10 }
  0x8f   : > { %465 = vrot.lane.b32.xlu0 %v429_v12, %s2963_s10 }
  0x90   : > { %v500_v48 = vpop.permute.xlu0 %499  ;;  %v498_v58 = vpop.permute.xlu1 %497 }
  0x92   : > { %513 = vrot.lane.b32.xlu1 %v492_v52, %s2962_s9 }
  0x93   : > { %467 = vrot.lane.b32.xlu0 %v437_v17, %s2963_s10 }
  0x94   : > { %v807_v44 = vpop.permute.xlu1 %806 }
  0x95   : > { %v450_v3 = vpop.permute.xlu0 %449 }
  0x96   : > { %v523_v16 = vsel %vm521_vm3, %v3052_v2, %v450_v3  ;;  %1452 = vrot.lane.b32.xlu1 %v1431_v11, %s2962_s9  ;;  %v3981_v3 = vrot.slane %v3314_v62, 1  ;;  %v1757_v62 = vld [vmem:[%s3959_s4 + $0x20] sm:$0xff] }
  0x97   : > { %1407 = vrot.lane.b32.xlu0 %v1377_v39, %s2963_s10  ;;  %v549_v60 = vsel %vm547_vm4, %v523_v16, %v498_v58  ;;  %v448_v58 = vor.u32 %v446_v37, %v3347_v26  ;;  %v3980_v39 = vrot.slane %v3292_v31, 1  ;;  %vm1780_vm10 = vcmp.gt.f32.partialorder %v1757_v62, 0.5  ;;  %v1759_v37 = vld [vmem:[%s3959_s4 + $0x30] sm:$0xff] }
  0x98   : > { %2676 = vmatprep.mubr.msk.bf16.mxu0 %vm887_vm5, %v549_v60  ;;  %v809_v33 = vpop.permute.xlu1 %808  ;;  %vm1782_vm12 = vcmp.gt.f32.partialorder %v1759_v37, 0.5 }
  0x99   : > { %v760_v5 = vpop.permute.xlu0 %759 }
  0x9a   : > { %v831_v2 = vsel %vm521_vm3, %v3058_v6, %v760_v5  ;;  %1454 = vrot.lane.b32.xlu1 %v1433_v18, %s2962_s9 }
  0x9b   : > { %515 = vrot.lane.b32.xlu0 %v494_v53, %s2962_s9  ;;  %v856_v27 = vsel %vm547_vm4, %v831_v2, %v807_v44 }
  0x9c   : > { %2650 = vmatprep.mubr.msk.bf16.mxu1 %vm887_vm5, %v856_v27  ;;  %v452_v12 = vpop.permute.xlu1 %451 }
  0x9d   : > { %v525_v13 = vsel %vm521_vm3, %v3046_v0, %v452_v12  ;;  %v762_v52 = vpop.permute.xlu0 %761  ;;  %v1386_v0 = vshrl.u32 %v3292_v31, 16  ;;  %v1760_v12 = vld [vmem:[%s3959_s4 + $0x38] sm:$0xff] }
  0x9e   : > { %v833_v32 = vsel %vm521_vm3, %v3064_v8, %v762_v52  ;;  %1409 = vrot.lane.b32.xlu1 %v3337_v41, %s2963_s10  ;;  %v551_v6 = vsel %vm547_vm4, %v525_v13, %v500_v48  ;;  %v2964_v41 = vmov 0   ;;  %vm1783_vm13 = vcmp.gt.f32.partialorder %v1760_v12, 0.5 }
  0x9f   : > { %469 = vrot.lane.b32.xlu0 %v3364_v61, %s2963_s10  ;;  %v858_v38 = vsel %vm547_vm4, %v833_v32, %v809_v33  ;;  %2677 = vmatmul.mubr.msk.bf16.vlgmr.msra.gmra.mrb[0].mxu0 %vm887_vm5, %v551_v6  ;;  %v1388_v61 = vor.u32 %v1386_v0, %v3322_v20  ;;  %v1753_v20 = vld [vmem:[%s3959_s4] sm:$0xff]  ;;  %v1826_v13 = vsel %vm1780_vm10, 1, %v2964_v41 }
  0xa0   : > { %2651 = vmatmul.mubr.msk.bf16.vlgmr.msra.gmra.mrb[0].mxu1 %vm887_vm5, %v858_v38  ;;  %v764_v17 = vpop.permute.xlu1 %763  ;;  %2701 = vmatpush3.bf16.msra.mxu0 %v3325_v19  ;;  %vm1776_vm7 = vcmp.gt.f32.partialorder %v1753_v20, 0.5  ;;  %v1761_v0 = vld [vmem:[%s3959_s4 + $0x40] sm:$0xff] }
  0xa1   : > { %v454_v8 = vpop.permute.xlu0 %453  ;;  %2727 = vmatpush3.bf16.msra.mxu1 %v3302_v45  ;;  %2858 = vset.pattern.permute.xlu1 %v2964_v41  ;;  %v1754_v45 = vld [vmem:[%s3959_s4 + $0x8] sm:$0xff]  ;;  %v1822_v18 = vsel %vm1776_vm7, 1, %v2964_v41  ;;  %vm1784_vm14 = vcmp.gt.f32.partialorder %v1761_v0, 0.5 }
  0xa2   : > { %517 = vrot.lane.b32.xlu1 %v3354_v56, %s2962_s9  ;;  %2857 = vset.pattern.permute.xlu0 %v2964_v41  ;;  %v527_v26 = vsel %vm521_vm3, %v3049_v1, %v454_v8  ;;  %v835_v1 = vsel %vm521_vm3, %v3073_v14, %v764_v17  ;;  %vm1777_vm6 = vcmp.gt.f32.partialorder %v1754_v45, 0.5  ;;  %v1756_v14 = vld [vmem:[%s3959_s4 + $0x18] sm:$0xff]  ;;  %v1762_v17 = vld [vmem:[%s3959_s4 + $0x48] sm:$0xff] }
  0xa3   : > { %471 = vrot.lane.b32.xlu0 %v448_v58, %s2963_s10  ;;  %v1823_v16 = vsel %vm1777_vm6, 1, %v2964_v41  ;;  %vm1779_vm9 = vcmp.gt.f32.partialorder %v1756_v14, 0.5  ;;  %vm1785_vm15 = vcmp.gt.f32.partialorder %v1762_v17, 0.5  ;;  %v1764_v45 = vld [vmem:[%s3959_s4 + $0x58] sm:$0xff] }
  0xa4   : > { %v502_v48 = vpop.permute.xlu1 %501  ;;  %v1825_v2 = vsel %vm1779_vm9, 1, %v2964_v41  ;;  %vm1787_vm1 = vcmp.gt.f32.partialorder %v1764_v45, 0.5 }
  0xa5   : > { %v553_v19 = vsel %vm547_vm4, %v527_v26, %v502_v48  ;;  %v456_v57 = vpop.permute.xlu0 %455  ;;  %v1829_v26 = vsel %vm1783_vm13, 1, %v2964_v41 }
  0xa6   : > { %1456 = vrot.lane.b32.xlu1 %v3344_v10, %s2962_s9  ;;  %2680 = vmatprep.mubr.msk.bf16.mxu0 %vm887_vm5, %v553_v19  ;;  %v1755_v10 = vld [vmem:[%s3959_s4 + $0x10] sm:$0xff]  ;;  %v529_v31 = vsel %vm521_vm3, %v3089_v30, %v456_v57 }
  0xa7   : > { %1411 = vrot.lane.b32.xlu0 %v1388_v61, %s2963_s10  ;;  %vm1778_vm8 = vcmp.gt.f32.partialorder %v1755_v10, 0.5  ;;  %v1763_v57 = vld [vmem:[%s3959_s4 + $0x50] sm:$0xff] }
  0xa8   : > { %v811_v56 = vpop.permute.xlu1 %810  ;;  %v1824_v30 = vsel %vm1778_vm8, 1, %v2964_v41  ;;  %vm1786_vm0 = vcmp.gt.f32.partialorder %v1763_v57, 0.5  ;;  %v1775_v57 = vld [vmem:[%s3959_s4 + $0xb0] sm:$0xff] }
  0xa9   : > { %v860_v11 = vsel %vm547_vm4, %v835_v1, %v811_v56  ;;  %v766_v44 = vpop.permute.xlu0 %765  ;;  %v1831_v56 = vsel %vm1785_vm15, 1, %v2964_v41  ;;  %vm1798_vm15 = vcmp.gt.f32.partialorder %v1775_v57, 0.5 }
  0xaa   : > { %1458 = vrot.lane.b32.xlu1 %v3980_v39, %s2962_s9  ;;  %2654 = vmatprep.mubr.msk.bf16.mxu1 %vm887_vm5, %v860_v11  ;;  %v837_v60 = vsel %vm521_vm3, %v3086_v29, %v766_v44  ;;  %v1758_v29 = vld [vmem:[%s3959_s4 + $0x28] sm:$0xff]  ;;  %v1765_v39 = vld [vmem:[%s3959_s4 + $0x60] sm:$0xff] }
  0xab   : > { %519 = vrot.lane.b32.xlu0 %v3981_v3, %s2962_s9  ;;  %vm1781_vm11 = vcmp.gt.f32.partialorder %v1758_v29, 0.5  ;;  %vm1788_vm2 = vcmp.gt.f32.partialorder %v1765_v39, 0.5 }
  0xac   : > { %v813_v54 = vpop.permute.xlu1 %812  ;;  %v1827_v6 = vsel %vm1781_vm11, 1, %v2964_v41 }
  0xad   : > { %v862_v33 = vsel %vm547_vm4, %v837_v60, %v813_v54  ;;  %v504_v51 = vpop.permute.xlu0 %503  ;;  %v1767_v54 = vld [vmem:[%s3959_s4 + $0x70] sm:$0xff] }
  0xae   : > { %v555_v53 = vsel %vm547_vm4, %v529_v31, %v504_v51  ;;  %2655 = vmatmul.mubr.msk.bf16.gmra.mrb[4].mxu1 %vm887_vm5, %v862_v33  ;;  %1849 = vperm.xlu1 %2858, %v1823_v16   ;;  %v1833_v16 = vsel %vm1787_vm1, 1, %v2964_v41  ;;  %v1834_v31 = vsel %vm1788_vm2, 1, %v2964_v41  ;;  %vm1790_vm7 = vcmp.gt.f32.partialorder %v1767_v54, 0.5 }
  0xaf   : > { %2681 = vmatmul.mubr.msk.bf16.gmra.mrb[4].mxu0 %vm887_vm5, %v555_v53  ;;  %1846 = vperm.xlu0 %2857, %v1822_v18   ;;  %v1768_v18 = vld [vmem:[%s3959_s4 + $0x78] sm:$0xff]  ;;  %vm2053_vm1 = vcmask 60416  }
  0xb0   : > { %v768_v5 = vpop.permute.xlu1 %767  ;;  %vm1791_vm8 = vcmp.gt.f32.partialorder %v1768_v18, 0.5 }
  0xb1   : > { %v458_v27 = vpop.permute.xlu0 %457  ;;  %v839_v8 = vsel %vm521_vm3, %v3109_v49, %v768_v5  ;;  %v1830_v49 = vsel %vm1784_vm14, 1, %v2964_v41  ;;  %v1770_v5 = vld [vmem:[%s3959_s4 + $0x88] sm:$0xff]  ;;  %v1837_v37 = vsel %vm1791_vm8, 1, %v2964_v41 }
  0xb2   : > { %1852 = vperm.xlu1 %2858, %v1824_v30   ;;  %v531_v52 = vsel %vm521_vm3, %v3099_v40, %v458_v27  ;;  %v1828_v40 = vsel %vm1782_vm12, 1, %v2964_v41  ;;  %v1769_v30 = vld [vmem:[%s3959_s4 + $0x80] sm:$0xff]  ;;  %vm1793_vm10 = vcmp.gt.f32.partialorder %v1770_v5, 0.5 }
  0xb3   : > { %1855 = vperm.xlu0 %2857, %v1825_v2   ;;  %vm1792_vm9 = vcmp.gt.f32.partialorder %v1769_v30, 0.5 }
  0xb4   : > { %v506_v32 = vpop.permute.xlu1 %505 }
  0xb5   : > { %v557_v38 = vsel %vm547_vm4, %v531_v52, %v506_v32  ;;  %v460_v58 = vpop.permute.xlu0 %459  ;;  %v1771_v52 = vld [vmem:[%s3959_s4 + $0x90] sm:$0xff]  ;;  %v1772_v32 = vld [vmem:[%s3959_s4 + $0x98] sm:$0xff] }
  0xb6   : > { %2684 = vmatprep.mubr.msk.bf16.mxu0 %vm887_vm5, %v557_v38  ;;  %1858 = vperm.xlu1 %2858, %v1826_v13   ;;  %v533_v11 = vsel %vm521_vm3, %v3131_v9, %v460_v58  ;;  %v1832_v9 = vsel %vm1786_vm0, 1, %v2964_v41  ;;  %vm1794_vm11 = vcmp.gt.f32.partialorder %v1771_v52, 0.5  ;;  %v1839_v58 = vsel %vm1793_vm10, 1, %v2964_v41 }
  0xb7   : > { %1861 = vperm.xlu0 %2857, %v1827_v6   ;;  %vm1795_vm12 = vcmp.gt.f32.partialorder %v1772_v32, 0.5 }
  0xb8   : > { %v815_v61 = vpop.permute.xlu1 %814 }
  0xb9   : > { %v864_v48 = vsel %vm547_vm4, %v839_v8, %v815_v61  ;;  %v770_v19 = vpop.permute.xlu0 %769  ;;  %v1773_v8 = vld [vmem:[%s3959_s4 + $0xa0] sm:$0xff] }
  0xba   : > { %2658 = vmatprep.mubr.msk.bf16.mxu1 %vm887_vm5, %v864_v48  ;;  %1864 = vperm.xlu1 %2858, %v1828_v40   ;;  %v841_v20 = vsel %vm521_vm3, %v3127_v63, %v770_v19  ;;  %v1766_v63 = vld [vmem:[%s3959_s4 + $0x68] sm:$0xff]  ;;  %vm1796_vm13 = vcmp.gt.f32.partialorder %v1773_v8, 0.5  ;;  %v1841_v48 = vsel %vm1795_vm12, 1, %v2964_v41 }
  0xbb   : > { %1867 = vperm.xlu0 %2857, %v1829_v26   ;;  %vm1789_vm6 = vcmp.gt.f32.partialorder %v1766_v63, 0.5  ;;  %v1842_v45 = vsel %vm1796_vm13, 1, %v2964_v41 }
  0xbc   : > { %v817_v1 = vpop.permute.xlu1 %816  ;;  %v1835_v62 = vsel %vm1789_vm6, 1, %v2964_v41 }
  0xbd   : > { %v866_v44 = vsel %vm547_vm4, %v841_v20, %v817_v1  ;;  %v508_v10 = vpop.permute.xlu0 %507 }
  0xbe   : > { %v559_v14 = vsel %vm547_vm4, %v533_v11, %v508_v10  ;;  %2659 = vmatmul.mubr.msk.bf16.gmra.mrb[8].mxu1 %vm887_vm5, %v866_v44  ;;  %1870 = vperm.xlu1 %2858, %v1830_v49   ;;  %v1844_v44 = vsel %vm1798_vm15, 1, %v2964_v41 }
  0xbf   : > { %2685 = vmatmul.mubr.msk.bf16.gmra.mrb[8].mxu0 %vm887_vm5, %v559_v14  ;;  %1873 = vperm.xlu0 %2857, %v1831_v56  }
  0xc0   : > { %v1390_v3 = vpop.permute.xlu1 %1389 }
  0xc1   : > { %v772_v60 = vpop.permute.xlu0 %771  ;;  %v1461_v2 = vsel %vm521_vm3, %v3166_v36, %v1390_v3  ;;  %v1838_v36 = vsel %vm1792_vm9, 1, %v2964_v41 }
  0xc2   : > { %1876 = vperm.xlu1 %2858, %v1832_v9   ;;  %v843_v33 = vsel %vm521_vm3, %v3151_v23, %v772_v60  ;;  %v1836_v23 = vsel %vm1790_vm7, 1, %v2964_v41 }
  0xc3   : > { %1879 = vperm.xlu0 %2857, %v1833_v16  }
  0xc4   : > { %v819_v51 = vpop.permute.xlu1 %818 }
  0xc5   : > { %v868_v53 = vsel %vm547_vm4, %v843_v33, %v819_v51  ;;  %v774_v29 = vpop.permute.xlu0 %773 }
  0xc6   : > { %2662 = vmatprep.mubr.msk.bf16.mxu1 %vm887_vm5, %v868_v53  ;;  %1882 = vperm.xlu1 %2858, %v1834_v31   ;;  %v845_v0 = vsel %vm521_vm3, %v3184_v50, %v774_v29  ;;  %v1840_v50 = vsel %vm1794_vm11, 1, %v2964_v41 }
  0xc7   : > { %1885 = vperm.xlu0 %2857, %v1835_v62   ;;  %v2470_v62 = vcombine.low %v3173_v42, %v3173_v42 }
  0xc8   : > { %v1437_v27 = vpop.permute.xlu1 %1436 }
  0xc9   : > { %v1486_v12 = vsel %vm547_vm4, %v1461_v2, %v1437_v27  ;;  %v1392_v13 = vpop.permute.xlu0 %1391 }
  0xca   : > { %2702 = vmatprep.mubr.msk.bf16.mxu0 %vm887_vm5, %v1486_v12  ;;  %1888 = vperm.xlu1 %2858, %v1836_v23   ;;  %v1463_v6 = vsel %vm521_vm3, %v3180_v47, %v1392_v13  ;;  %v1774_v47 = vld [vmem:[%s3959_s4 + $0xa8] sm:$0xff] }
  0xcb   : > { %1891 = vperm.xlu0 %2857, %v1837_v37   ;;  %vm1797_vm14 = vcmp.gt.f32.partialorder %v1774_v47, 0.5  ;;  %v2901_v37 = vld [vmem:[%s3043_s8 + $0x30] sm:$0xff]  }
  0xcc   : > { %v1439_v38 = vpop.permute.xlu1 %1438  ;;  %v1843_v1 = vsel %vm1797_vm14, 1, %v2964_v41 }
  0xcd   : > { %v1488_v17 = vsel %vm547_vm4, %v1463_v6, %v1439_v38  ;;  %v821_v40 = vpop.permute.xlu0 %820 }
  0xce   : > { %v870_v61 = vsel %vm547_vm4, %v845_v0, %v821_v40  ;;  %2703 = vmatmul.mubr.msk.bf16.vlgmr.msra.gmra.mrb[0].mxu0 %vm887_vm5, %v1488_v17  ;;  %1894 = vperm.xlu1 %2858, %v1838_v36  }
  0xcf   : > { %2663 = vmatmul.mubr.msk.bf16.gmra.mrb[12].mxu1 %vm887_vm5, %v870_v61  ;;  %1897 = vperm.xlu0 %2857, %v1839_v58  }
  0xd0   : > { %v1394_v26 = vpop.permute.xlu1 %1393 }
  0xd1   : > { %v776_v19 = vpop.permute.xlu0 %775  ;;  %v1465_v10 = vsel %vm521_vm3, %v3222_v15, %v1394_v26 }
  0xd2   : > { %1900 = vperm.xlu1 %2858, %v1840_v50   ;;  %v847_v49 = vsel %vm521_vm3, %v3209_v4, %v776_v19  ;;  %v3982_v50 = vld [vmem:[#allocation5_spill] sm:$0xff] }
  0xd3   : > { %1903 = vperm.xlu0 %2857, %v1841_v48  }
  0xd4   : > { %v823_v20 = vpop.permute.xlu1 %822 }
  0xd5   : > { %v872_v56 = vsel %vm547_vm4, %v847_v49, %v823_v20  ;;  %v778_v11 = vpop.permute.xlu0 %777 }
  0xd6   : > { %2666 = vmatprep.mubr.msk.bf16.mxu1 %vm887_vm5, %v872_v56  ;;  %1906 = vperm.xlu1 %2858, %v1842_v45   ;;  %v849_v3 = vsel %vm521_vm3, %v3245_v35, %v778_v11 }
  0xd7   : > { %1909 = vperm.xlu0 %2857, %v1843_v1  }
  0xd8   : > { %v1441_v39 = vpop.permute.xlu1 %1440 }
  0xd9   : > { %v1490_v14 = vsel %vm547_vm4, %v1465_v10, %v1441_v39  ;;  %v1396_v4 = vpop.permute.xlu0 %1395 }
  0xda   : > { %2706 = vmatprep.mubr.msk.bf16.mxu0 %vm887_vm5, %v1490_v14  ;;  %1912 = vperm.xlu1 %2858, %v1844_v44   ;;  %v1467_v63 = vsel %vm521_vm3, %v3242_v34, %v1396_v4 }
  0xdc   : > { %v1443_v9 = vpop.permute.xlu1 %1442 }
  0xdd   : > { %v1492_v41 = vsel %vm547_vm4, %v1467_v63, %v1443_v9  ;;  %v825_v16 = vpop.permute.xlu0 %824 }
  0xde   : > { %v874_v60 = vsel %vm547_vm4, %v849_v3, %v825_v16  ;;  %2707 = vmatmul.mubr.msk.bf16.gmra.mrb[4].mxu0 %vm887_vm5, %v1492_v41  ;;  %v3984_v16 = vld [vmem:[#allocation3_spill] sm:$0xff] }
  0xdf   : > { %2667 = vmatmul.mubr.msk.bf16.gmra.mrb[16].mxu1 %vm887_vm5, %v874_v60  ;;  %v2535_v60 = vcombine.low %v3984_v16, %v3984_v16 }
  0xe0   : > { %v1398_v15 = vpop.permute.xlu1 %1397 }
  0xe1   : > { %v780_v54 = vpop.permute.xlu0 %779  ;;  %v1469_v35 = vsel %vm521_vm3, %v3329_v25, %v1398_v15  ;;  %v3985_v15 = vld [vmem:[#allocation4_spill] sm:$0xff] }
  0xe2   : > { %v851_v18 = vsel %vm521_vm3, %v3156_v28, %v780_v54  ;;  %v2433_v54 = vcombine.low %v3985_v15, %v3985_v15 }
  0xe4   : > { %v827_v31 = vpop.permute.xlu1 %826 }
  0xe5   : > { %v876_v34 = vsel %vm547_vm4, %v851_v18, %v827_v31  ;;  %v782_v33 = vpop.permute.xlu0 %781 }
  0xe6   : > { %2670 = vmatprep.mubr.msk.bf16.mxu1 %vm887_vm5, %v876_v34  ;;  %v854_v5 = vsel %vm521_vm3, %v2470_v62, %v782_v33 }
  0xe8   : > { %v1445_v51 = vpop.permute.xlu1 %1444 }
  0xe9   : > { %v1494_v53 = vsel %vm547_vm4, %v1469_v35, %v1445_v51  ;;  %v1400_v29 = vpop.permute.xlu0 %1399 }
  0xea   : > { %2710 = vmatprep.mubr.msk.bf16.mxu0 %vm887_vm5, %v1494_v53  ;;  %v1471_v28 = vsel %vm521_vm3, %v3373_v21, %v1400_v29 }
  0xec   : > { %v1447_v30 = vpop.permute.xlu1 %1446 }
  0xed   : > { %v1496_v23 = vsel %vm547_vm4, %v1471_v28, %v1447_v30  ;;  %v829_v2 = vpop.permute.xlu0 %828 }
  0xee   : > { %v878_v25 = vsel %vm547_vm4, %v854_v5, %v829_v2  ;;  %2711 = vmatmul.mubr.msk.bf16.gmra.mrb[8].mxu0 %vm887_vm5, %v1496_v23 }
  0xef   : > { %2671 = vmatmul.mubr.msk.bf16.gmra.mrb[20].mxu1 %vm887_vm5, %v878_v25 }
  0xf0   : > { %v1402_v42 = vpop.permute.xlu1 %1401 }
  0xf1   : > { %v462_v27 = vpop.permute.xlu0 %461  ;;  %v1473_v32 = vsel %vm521_vm3, %v3393_v22, %v1402_v42 }
  0xf2   : > { %v535_v12 = vsel %vm521_vm3, %v2901_v37, %v462_v27 }
  0xf4   : > { %v510_v13 = vpop.permute.xlu1 %509 }
  0xf5   : > { %v561_v21 = vsel %vm547_vm4, %v535_v12, %v510_v13  ;;  %v464_v52 = vpop.permute.xlu0 %463 }
  0xf6   : > { %2688 = vmatprep.mubr.msk.bf16.mxu1 %vm887_vm5, %v561_v21  ;;  %v537_v17 = vsel %vm521_vm3, %v3410_v7, %v464_v52  ;;  %v3983_v7 = vld [vmem:[#allocation6_spill] sm:$0xff]  ;;  %v3772_v21 = vld [vmem:[%s3957_s2] ss:$0 sm:$0xff] }
  0xf8   : > { %v1449_v36 = vpop.permute.xlu1 %1448 }
  0xf9   : > { %v1498_v6 = vsel %vm547_vm4, %v1473_v32, %v1449_v36  ;;  %v1404_v38 = vpop.permute.xlu0 %1403 }
  0xfa   : > { %2714 = vmatprep.mubr.msk.bf16.mxu0 %vm887_vm5, %v1498_v6  ;;  %v1475_v58 = vsel %vm521_vm3, %v3407_v43, %v1404_v38 }
  0xfc   : > { %v1451_v0 = vpop.permute.xlu1 %1450 }
  0xfd   : > { %v1500_v40 = vsel %vm547_vm4, %v1475_v58, %v1451_v0  ;;  %v512_v8 = vpop.permute.xlu0 %511  ;;  %v3778_v58 = vld [vmem:[%s3958_s3] ss:$0 sm:$0xff] }
  0xfe   : > { %v563_v61 = vsel %vm547_vm4, %v537_v17, %v512_v8  ;;  %2715 = vmatmul.mubr.msk.bf16.gmra.mrb[12].mxu0 %vm887_vm5, %v1500_v40 }
  0xff   : > { %2689 = vmatmul.mubr.msk.bf16.vlgmr.msra.gmra.mrb[12].mxu1 %vm887_vm5, %v563_v61 }
 0x100   : > { %v1406_v22 = vpop.permute.xlu1 %1405 }
 0x101   : > { %v466_v47 = vpop.permute.xlu0 %465  ;;  %v1477_v57 = vsel %vm521_vm3, %v3983_v7, %v1406_v22 }
 0x102   : > { %v539_v26 = vsel %vm521_vm3, %v3982_v50, %v466_v47 }
 0x104   : > { %v514_v48 = vpop.permute.xlu1 %513 }
 0x105   : > { %v565_v43 = vsel %vm547_vm4, %v539_v26, %v514_v48  ;;  %v468_v19 = vpop.permute.xlu0 %467 }
 0x106   : > { %2692 = vmatprep.mubr.msk.bf16.mxu1 %vm887_vm5, %v565_v43  ;;  %v541_v11 = vsel %vm521_vm3, %v3454_v24, %v468_v19 }
 0x108   : > { %v1453_v45 = vpop.permute.xlu1 %1452 }
 0x109   : > { %v1502_v49 = vsel %vm547_vm4, %v1477_v57, %v1453_v45  ;;  %v1408_v20 = vpop.permute.xlu0 %1407 }
 0x10a   : > { %2718 = vmatprep.mubr.msk.bf16.mxu0 %vm887_vm5, %v1502_v49  ;;  %v1479_v1 = vsel %vm521_vm3, %v3450_v55, %v1408_v20 }
 0x10c   : > { %v1455_v56 = vpop.permute.xlu1 %1454 }
 0x10d   : > { %v1504_v44 = vsel %vm547_vm4, %v1479_v1, %v1455_v56  ;;  %v516_v10 = vpop.permute.xlu0 %515 }
 0x10e   : > { %v567_v39 = vsel %vm547_vm4, %v541_v11, %v516_v10  ;;  %2719 = vmatmul.mubr.msk.bf16.gmra.mrb[16].mxu0 %vm887_vm5, %v1504_v44 }
 0x10f   : > { %2693 = vmatmul.mubr.msk.bf16.gmra.mrb[16].mxu1 %vm887_vm5, %v567_v39 }
 0x110   : > { %v1410_v14 = vpop.permute.xlu1 %1409 }
 0x111   : > { %v470_v4 = vpop.permute.xlu0 %469  ;;  %v1481_v24 = vsel %vm521_vm3, %v3252_v46, %v1410_v14 }
 0x112   : > { %v543_v63 = vsel %vm521_vm3, %v3258_v59, %v470_v4 }
 0x114   : > { %v518_v9 = vpop.permute.xlu1 %517 }
 0x115   : > { %v569_v55 = vsel %vm547_vm4, %v543_v63, %v518_v9  ;;  %v472_v3 = vpop.permute.xlu0 %471 }
 0x116   : > { %2696 = vmatprep.mubr.msk.bf16.mxu1 %vm887_vm5, %v569_v55  ;;  %v546_v33 = vsel %vm521_vm3, %v2433_v54, %v472_v3 }
 0x118   : > { %v1457_v41 = vpop.permute.xlu1 %1456 }
 0x119   : > { %v1506_v18 = vsel %vm547_vm4, %v1481_v24, %v1457_v41  ;;  %v1412_v31 = vpop.permute.xlu0 %1411 }
 0x11a   : > { %2722 = vmatprep.mubr.msk.bf16.mxu0 %vm887_vm5, %v1506_v18  ;;  %v1484_v59 = vsel %vm521_vm3, %v2535_v60, %v1412_v31 }
 0x11c   : > { %v1459_v34 = vpop.permute.xlu1 %1458 }
 0x11d   : > { %v1508_v35 = vsel %vm547_vm4, %v1484_v59, %v1459_v34  ;;  %v520_v46 = vpop.permute.xlu0 %519 }
 0x11e   : > { %v571_v51 = vsel %vm547_vm4, %v546_v33, %v520_v46  ;;  %2723 = vmatmul.mubr.msk.bf16.gmra.mrb[20].mxu0 %vm887_vm5, %v1508_v35 }
 0x11f   : > { %2697 = vmatmul.mubr.msk.bf16.gmra.mrb[20].mxu1 %vm887_vm5, %v571_v51 }
 0x12d   : > { %v1850_v12 = vpop.permute.xlu1 %1849 }
 0x12e   : > { %v1847_v13 = vpop.permute.xlu0 %1846  ;;  %vm1915_vm0 = vcmp.eq.s32.totalorder %v1850_v12, 1 }
 0x12f   : > { %vm1914_vm4 = vcmp.eq.s32.totalorder %v1847_v13, 1 }
 0x131   : > { %v1853_v8 = vpop.permute.xlu1 %1852 }
 0x132   : > { %v1856_v26 = vpop.permute.xlu0 %1855  ;;  %vm1916_vm3 = vcmp.eq.s32.totalorder %v1853_v8, 1 }
 0x133   : > { %vm1917_vm5 = vcmp.eq.s32.totalorder %v1856_v26, 1 }
 0x135   : > { %v1859_v63 = vpop.permute.xlu1 %1858 }
 0x136   : > { %v1862_v24 = vpop.permute.xlu0 %1861  ;;  %vm1918_vm6 = vcmp.eq.s32.totalorder %v1859_v63, 1 }
 0x137   : > { %vm1919_vm8 = vcmp.eq.s32.totalorder %v1862_v24, 1 }
 0x139   : > { %v1865_v59 = vpop.permute.xlu1 %1864 }
 0x13a   : > { %vm1920_vm2 = vcmp.eq.s32.totalorder %v1865_v59, 1 }
 0x173   : > { %v2652_v62 = vpop.f32.mrb[0].mxu1 }
 0x174   : > { %v950_v53 = vpop.f32.mrb[1].mxu1 }
 0x175   : > { %v2653_v29 = vpop.f32.mrb[2].mxu1 }
 0x176   : > { %v953_v28 = vpop.f32.mrb[3].mxu1 }
 0x181   : > { %v2656_v30 = vpop.f32.mrb[4].mxu1 }
 0x182   : > { %v966_v5 = vpop.f32.mrb[5].mxu1 }
 0x183   : > { %v2657_v23 = vpop.f32.mrb[6].mxu1 }
 0x184   : > { %v969_v2 = vpop.f32.mrb[7].mxu1 }
 0x191   : > { %v3761_v25 = vpop.f32.mrb[8].mxu1 }
 0x192   : > { %v3763_v42 = vpop.f32.mrb[9].mxu1 }
 0x193   : > { %v3765_v27 = vpop.f32.mrb[10].mxu1 }
 0x194   : > { %v3767_v37 = vpop.f32.mrb[11].mxu1 }
 0x1a1   : > { %v2704_v52 = vpop.f32.mrb[0].mxu0 }
 0x1a2   : > { %v2728_v32 = vadd.f32 %v2704_v52, %v2652_v62  ;;  %v1578_v36 = vpop.f32.mrb[1].mxu0 }
 0x1a3   : > { %v2729_v6 = vadd.f32 %v1578_v36, %v950_v53  ;;  %v2705_v38 = vpop.f32.mrb[2].mxu0  ;;  %v1868_v53 = vpop.permute.xlu0 %1867 }
 0x1a4   : > { %v1703_v0 = vmul.f32 %v2728_v32, %v3772_v21  ;;  %v2730_v17 = vadd.f32 %v2705_v38, %v2653_v29  ;;  %v1581_v40 = vpop.f32.mrb[3].mxu0  ;;  %vm1921_vm7 = vcmp.eq.s32.totalorder %v1868_v53, 1  ;;  %v1871_v38 = vpop.permute.xlu1 %1870 }
 0x1a5   : > { %v1701_v61 = vmul.f32 %v2729_v6, %v3772_v21  ;;  %v2731_v22 = vadd.f32 %v1581_v40, %v953_v28  ;;  %vm1922_vm10 = vcmp.eq.s32.totalorder %v1871_v38, 1 }
 0x1a6   : > { %v1704_v47 = vmul.f32 %v2730_v17, %v3772_v21  ;;  %v1732_v50 = vadd.f32 %v3778_v58, %v1703_v0 }
 0x1a7   : > { %v1702_v48 = vmul.f32 %v2731_v22, %v3772_v21  ;;  %v1730_v43 = vadd.f32 %v3778_v58, %v1701_v61  ;;  %v1874_v17 = vpop.permute.xlu0 %1873 }
 0x1a8   : > { %v1801_v19 = vmax.f32 %v1732_v50, 0.0  ;;  %v1733_v7 = vadd.f32 %v3778_v58, %v1704_v47  ;;  %vm1923_vm12 = vcmp.eq.s32.totalorder %v1874_v17, 1 }
 0x1a9   : > { %v1731_v57 = vadd.f32 %v3778_v58, %v1702_v48  ;;  %v1799_v45 = vmax.f32 %v1730_v43, 0.0 }
 0x1aa   : > { %v1939_v49 = vsel %vm1916_vm3, %v1801_v19, 0.0  ;;  %v1802_v20 = vmax.f32 %v1733_v7, 0.0  ;;  %v1877_v19 = vpop.permute.xlu1 %1876 }
 0x1ab   : > { %v1800_v1 = vmax.f32 %v1731_v57, 0.0  ;;  %v1937_v56 = vsel %vm1914_vm4, %v1799_v45, 0.0  ;;  %v2588_v11 = vpack.c.bf16 %v1939_v49, %v1939_v49  ;;  %vm1924_vm9 = vcmp.eq.s32.totalorder %v1877_v19, 1  ;;  %v1880_v45 = vpop.permute.xlu0 %1879 }
 0x1ac   : > { %v2586_v44 = vpack.c.bf16 %v1937_v56, %v1937_v56  ;;  %v1940_v10 = vsel %vm1917_vm5, %v1802_v20, 0.0  ;;  %vm1925_vm11 = vcmp.eq.s32.totalorder %v1880_v45, 1 }
 0x1ad   : > { %v1938_v39 = vsel %vm1915_vm0, %v1800_v1, 0.0  ;;  %2056 = vst.msk [vmem:[%s3788_s18 + $0x8] sm:$0xf] %vm2053_vm1, %v2588_v11  ;;  %v2589_v14 = vpack.c.bf16 %v1940_v10, %v1940_v10 }
 0x1ae   : > { %v2587_v4 = vpack.c.bf16 %v1938_v39, %v1938_v39  ;;  %2054 = vst.msk [vmem:[%s3788_s18] sm:$0xf] %vm2053_vm1, %v2586_v44 }
 0x1af   : > { %2057 = vst.msk [vmem:[%s3788_s18 + $0xc] sm:$0xf] %vm2053_vm1, %v2589_v14  ;;  %v1886_v59 = vpop.permute.xlu0 %1885 }
 0x1b0   : > { %2055 = vst.msk [vmem:[%s3788_s18 + $0x4] sm:$0xf] %vm2053_vm1, %v2587_v4  ;;  %vm1927_vm3 = vcmp.eq.s32.totalorder %v1886_v59, 1 }
 0x1b1   : > { %v2708_v9 = vpop.f32.mrb[4].mxu0 }
 0x1b2   : > { %v2732_v55 = vadd.f32 %v2708_v9, %v2656_v30  ;;  %v1594_v3 = vpop.f32.mrb[5].mxu0 }
 0x1b3   : > { %v2733_v41 = vadd.f32 %v1594_v3, %v966_v5  ;;  %v2709_v16 = vpop.f32.mrb[6].mxu0 }
 0x1b4   : > { %v1707_v60 = vmul.f32 %v2732_v55, %v3772_v21  ;;  %v2734_v15 = vadd.f32 %v2709_v16, %v2657_v23  ;;  %v1597_v54 = vpop.f32.mrb[7].mxu0  ;;  %v1883_v55 = vpop.permute.xlu1 %1882 }
 0x1b5   : > { %v1705_v18 = vmul.f32 %v2733_v41, %v3772_v21  ;;  %v2735_v31 = vadd.f32 %v1597_v54, %v969_v2  ;;  %vm1926_vm14 = vcmp.eq.s32.totalorder %v1883_v55, 1 }
 0x1b6   : > { %v1736_v34 = vadd.f32 %v3778_v58, %v1707_v60  ;;  %v1708_v33 = vmul.f32 %v2734_v15, %v3772_v21 }
 0x1b7   : > { %v1734_v35 = vadd.f32 %v3778_v58, %v1705_v18  ;;  %v1706_v46 = vmul.f32 %v2735_v31, %v3772_v21 }
 0x1b8   : > { %v1805_v51 = vmax.f32 %v1736_v34, 0.0  ;;  %v1737_v62 = vadd.f32 %v3778_v58, %v1708_v33 }
 0x1b9   : > { %v1803_v29 = vmax.f32 %v1734_v35, 0.0  ;;  %v1735_v28 = vadd.f32 %v3778_v58, %v1706_v46 }
 0x1ba   : > { %v1943_v30 = vsel %vm1920_vm2, %v1805_v51, 0.0  ;;  %v1806_v5 = vmax.f32 %v1737_v62, 0.0 }
 0x1bb   : > { %v2592_v23 = vpack.c.bf16 %v1943_v30, %v1943_v30  ;;  %v1941_v2 = vsel %vm1918_vm6, %v1803_v29, 0.0  ;;  %v1804_v12 = vmax.f32 %v1735_v28, 0.0  ;;  %v1889_v30 = vpop.permute.xlu1 %1888 }
 0x1bc   : > { %v2590_v13 = vpack.c.bf16 %v1941_v2, %v1941_v2  ;;  %v1944_v52 = vsel %vm1921_vm7, %v1806_v5, 0.0  ;;  %vm1928_vm13 = vcmp.eq.s32.totalorder %v1889_v30, 1 }
 0x1bd   : > { %2060 = vst.msk [vmem:[%s3788_s18 + $0x18] sm:$0xf] %vm2053_vm1, %v2592_v23  ;;  %v1942_v32 = vsel %vm1919_vm8, %v1804_v12, 0.0  ;;  %v2593_v36 = vpack.c.bf16 %v1944_v52, %v1944_v52 }
 0x1be   : > { %2058 = vst.msk [vmem:[%s3788_s18 + $0x10] sm:$0xf] %vm2053_vm1, %v2590_v13  ;;  %v2591_v6 = vpack.c.bf16 %v1942_v32, %v1942_v32  ;;  %v1892_v13 = vpop.permute.xlu0 %1891 }
 0x1bf   : > { %2061 = vst.msk [vmem:[%s3788_s18 + $0x1c] sm:$0xf] %vm2053_vm1, %v2593_v36  ;;  %vm1929_vm15 = vcmp.eq.s32.totalorder %v1892_v13, 1 }
 0x1c0   : > { %2059 = vst.msk [vmem:[%s3788_s18 + $0x14] sm:$0xf] %vm2053_vm1, %v2591_v6 }
 0x1c1   : > { %v2712_v0 = vpop.f32.mrb[8].mxu0 }
 0x1c2   : > { %v2736_v40 = vadd.f32 %v2712_v0, %v3761_v25  ;;  %v1610_v8 = vpop.f32.mrb[9].mxu0 }
 0x1c3   : > { %v2737_v61 = vadd.f32 %v1610_v8, %v3763_v42  ;;  %v2713_v22 = vpop.f32.mrb[10].mxu0 }
 0x1c4   : > { %v1711_v47 = vmul.f32 %v2736_v40, %v3772_v21  ;;  %v2738_v50 = vadd.f32 %v2713_v22, %v3765_v27  ;;  %v1613_v26 = vpop.f32.mrb[11].mxu0  ;;  %v1895_v22 = vpop.permute.xlu1 %1894 }
 0x1c5   : > { %v1709_v48 = vmul.f32 %v2737_v61, %v3772_v21  ;;  %v2739_v43 = vadd.f32 %v1613_v26, %v3767_v37  ;;  %vm1930_vm5 = vcmp.eq.s32.totalorder %v1895_v22, 1 }
 0x1c6   : > { %v1740_v7 = vadd.f32 %v3778_v58, %v1711_v47  ;;  %v1712_v57 = vmul.f32 %v2738_v50, %v3772_v21 }
 0x1c7   : > { %v1738_v25 = vadd.f32 %v3778_v58, %v1709_v48  ;;  %v1710_v42 = vmul.f32 %v2739_v43, %v3772_v21 }
 0x1c8   : > { %v1809_v49 = vmax.f32 %v1740_v7, 0.0  ;;  %v1741_v27 = vadd.f32 %v3778_v58, %v1712_v57 }
 0x1c9   : > { %v1807_v37 = vmax.f32 %v1738_v25, 0.0  ;;  %v1739_v20 = vadd.f32 %v3778_v58, %v1710_v42  ;;  %v1898_v42 = vpop.permute.xlu0 %1897 }
 0x1ca   : > { %v1947_v1 = vsel %vm1924_vm9, %v1809_v49, 0.0  ;;  %v1810_v56 = vmax.f32 %v1741_v27, 0.0  ;;  %vm1931_vm2 = vcmp.eq.s32.totalorder %v1898_v42, 1 }
 0x1cb   : > { %v2596_v11 = vpack.c.bf16 %v1947_v1, %v1947_v1  ;;  %v1945_v44 = vsel %vm1922_vm10, %v1807_v37, 0.0  ;;  %v1808_v10 = vmax.f32 %v1739_v20, 0.0 }
 0x1cc   : > { %v2594_v39 = vpack.c.bf16 %v1945_v44, %v1945_v44  ;;  %v1948_v14 = vsel %vm1925_vm11, %v1810_v56, 0.0 }
 0x1cd   : > { %2064 = vst.msk [vmem:[%s3788_s18 + $0x28] sm:$0xf] %vm2053_vm1, %v2596_v11  ;;  %v2597_v4 = vpack.c.bf16 %v1948_v14, %v1948_v14  ;;  %v1946_v63 = vsel %vm1923_vm12, %v1808_v10, 0.0  ;;  %v1901_v10 = vpop.permute.xlu1 %1900 }
 0x1ce   : > { %2062 = vst.msk [vmem:[%s3788_s18 + $0x20] sm:$0xf] %vm2053_vm1, %v2594_v39  ;;  %v2595_v9 = vpack.c.bf16 %v1946_v63, %v1946_v63  ;;  %vm1932_vm4 = vcmp.eq.s32.totalorder %v1901_v10, 1 }
 0x1cf   : > { %2065 = vst.msk [vmem:[%s3788_s18 + $0x2c] sm:$0xf] %vm2053_vm1, %v2597_v4 }
 0x1d0   : > { %2063 = vst.msk [vmem:[%s3788_s18 + $0x24] sm:$0xf] %vm2053_vm1, %v2595_v9  ;;  %v1904_v9 = vpop.permute.xlu0 %1903 }
 0x1d1   : > { %v2716_v3 = vpop.f32.mrb[12].mxu0  ;;  %vm1933_vm0 = vcmp.eq.s32.totalorder %v1904_v9, 1  ;;  %v1907_v59 = vpop.permute.xlu1 %1906 }
 0x1d2   : > { %v2690_v24 = vpop.f32.mrb[12].mxu1  ;;  %v1626_v41 = vpop.f32.mrb[13].mxu0  ;;  %vm1934_vm7 = vcmp.eq.s32.totalorder %v1907_v59, 1 }
 0x1d3   : > { %v2740_v16 = vadd.f32 %v2716_v3, %v2690_v24  ;;  %v1158_v60 = vpop.f32.mrb[13].mxu1  ;;  %v2717_v15 = vpop.f32.mrb[14].mxu0 }
 0x1d4   : > { %v2741_v54 = vadd.f32 %v1626_v41, %v1158_v60  ;;  %v2691_v18 = vpop.f32.mrb[14].mxu1  ;;  %v1629_v31 = vpop.f32.mrb[15].mxu0 }
 0x1d5   : > { %v1715_v34 = vmul.f32 %v2740_v16, %v3772_v21  ;;  %v2742_v33 = vadd.f32 %v2717_v15, %v2691_v18  ;;  %v1161_v35 = vpop.f32.mrb[15].mxu1 }
 0x1d6   : > { %v1713_v46 = vmul.f32 %v2741_v54, %v3772_v21  ;;  %v2743_v51 = vadd.f32 %v1629_v31, %v1161_v35 }
 0x1d7   : > { %v1744_v62 = vadd.f32 %v3778_v58, %v1715_v34  ;;  %v1716_v53 = vmul.f32 %v2742_v33, %v3772_v21 }
 0x1d8   : > { %v1742_v29 = vadd.f32 %v3778_v58, %v1713_v46  ;;  %v1714_v28 = vmul.f32 %v2743_v51, %v3772_v21 }
 0x1d9   : > { %v1813_v5 = vmax.f32 %v1744_v62, 0.0  ;;  %v1745_v23 = vadd.f32 %v3778_v58, %v1716_v53 }
 0x1da   : > { %v1811_v2 = vmax.f32 %v1742_v29, 0.0  ;;  %v1743_v12 = vadd.f32 %v3778_v58, %v1714_v28 }
 0x1db   : > { %v1951_v52 = vsel %vm1928_vm13, %v1813_v5, 0.0  ;;  %v1814_v32 = vmax.f32 %v1745_v23, 0.0 }
 0x1dc   : > { %v2600_v36 = vpack.c.bf16 %v1951_v52, %v1951_v52  ;;  %v1949_v6 = vsel %vm1926_vm14, %v1811_v2, 0.0  ;;  %v1812_v38 = vmax.f32 %v1743_v12, 0.0  ;;  %v1913_v12 = vpop.permute.xlu1 %1912 }
 0x1dd   : > { %v2598_v0 = vpack.c.bf16 %v1949_v6, %v1949_v6  ;;  %v1952_v17 = vsel %vm1929_vm15, %v1814_v32, 0.0  ;;  %vm1936_vm6 = vcmp.eq.s32.totalorder %v1913_v12, 1  ;;  %v1910_v6 = vpop.permute.xlu0 %1909 }
 0x1de   : > { %2068 = vst.msk [vmem:[%s3788_s18 + $0x38] sm:$0xf] %vm2053_vm1, %v2600_v36  ;;  %v2601_v40 = vpack.c.bf16 %v1952_v17, %v1952_v17  ;;  %v1950_v8 = vsel %vm1927_vm3, %v1812_v38, 0.0  ;;  %vm1935_vm8 = vcmp.eq.s32.totalorder %v1910_v6, 1 }
 0x1df   : > { %2066 = vst.msk [vmem:[%s3788_s18 + $0x30] sm:$0xf] %vm2053_vm1, %v2598_v0  ;;  %v2599_v61 = vpack.c.bf16 %v1950_v8, %v1950_v8 }
 0x1e0   : > { %2069 = vst.msk [vmem:[%s3788_s18 + $0x3c] sm:$0xf] %vm2053_vm1, %v2601_v40 }
 0x1e1   : > { %2067 = vst.msk [vmem:[%s3788_s18 + $0x34] sm:$0xf] %vm2053_vm1, %v2599_v61  ;;  %v2720_v47 = vpop.f32.mrb[16].mxu0 }
 0x1e2   : > { %v2694_v50 = vpop.f32.mrb[16].mxu1  ;;  %v1642_v26 = vpop.f32.mrb[17].mxu0 }
 0x1e3   : > { %v2744_v48 = vadd.f32 %v2720_v47, %v2694_v50  ;;  %v1174_v43 = vpop.f32.mrb[17].mxu1  ;;  %v2721_v19 = vpop.f32.mrb[18].mxu0 }
 0x1e4   : > { %v2745_v7 = vadd.f32 %v1642_v26, %v1174_v43  ;;  %v2695_v57 = vpop.f32.mrb[18].mxu1  ;;  %v1645_v25 = vpop.f32.mrb[19].mxu0 }
 0x1e5   : > { %v1719_v45 = vmul.f32 %v2744_v48, %v3772_v21  ;;  %v2746_v49 = vadd.f32 %v2721_v19, %v2695_v57  ;;  %v1177_v27 = vpop.f32.mrb[19].mxu1 }
 0x1e6   : > { %v1717_v37 = vmul.f32 %v2745_v7, %v3772_v21  ;;  %v2747_v20 = vadd.f32 %v1645_v25, %v1177_v27 }
 0x1e7   : > { %v1748_v1 = vadd.f32 %v3778_v58, %v1719_v45  ;;  %v1720_v56 = vmul.f32 %v2746_v49, %v3772_v21 }
 0x1e8   : > { %v1746_v11 = vadd.f32 %v3778_v58, %v1717_v37  ;;  %v1718_v44 = vmul.f32 %v2747_v20, %v3772_v21 }
 0x1e9   : > { %v1817_v39 = vmax.f32 %v1748_v1, 0.0  ;;  %v1749_v14 = vadd.f32 %v3778_v58, %v1720_v56 }
 0x1ea   : > { %v1815_v4 = vmax.f32 %v1746_v11, 0.0  ;;  %v1747_v63 = vadd.f32 %v3778_v58, %v1718_v44 }
 0x1eb   : > { %v1955_v55 = vsel %vm1932_vm4, %v1817_v39, 0.0  ;;  %v1818_v3 = vmax.f32 %v1749_v14, 0.0 }
 0x1ec   : > { %v2604_v24 = vpack.c.bf16 %v1955_v55, %v1955_v55  ;;  %v1953_v41 = vsel %vm1930_vm5, %v1815_v4, 0.0  ;;  %v1816_v16 = vmax.f32 %v1747_v63, 0.0 }
 0x1ed   : > { %v2602_v60 = vpack.c.bf16 %v1953_v41, %v1953_v41  ;;  %v1956_v15 = vsel %vm1933_vm0, %v1818_v3, 0.0 }
 0x1ee   : > { %2072 = vst.msk [vmem:[%s3788_s18 + $0x48] sm:$0xf] %vm2053_vm1, %v2604_v24  ;;  %v2605_v54 = vpack.c.bf16 %v1956_v15, %v1956_v15  ;;  %v1954_v18 = vsel %vm1931_vm2, %v1816_v16, 0.0 }
 0x1ef   : > { %2070 = vst.msk [vmem:[%s3788_s18 + $0x40] sm:$0xf] %vm2053_vm1, %v2602_v60  ;;  %v2603_v31 = vpack.c.bf16 %v1954_v18, %v1954_v18 }
 0x1f0   : > { %2073 = vst.msk [vmem:[%s3788_s18 + $0x4c] sm:$0xf] %vm2053_vm1, %v2605_v54 }
 0x1f1   : > { %2071 = vst.msk [vmem:[%s3788_s18 + $0x44] sm:$0xf] %vm2053_vm1, %v2603_v31  ;;  %v2724_v34 = vpop.f32.mrb[20].mxu0 }
 0x1f2   : > { %v2698_v33 = vpop.f32.mrb[20].mxu1  ;;  %v1658_v35 = vpop.f32.mrb[21].mxu0 }
 0x1f3   : > { %v2748_v46 = vadd.f32 %v2724_v34, %v2698_v33  ;;  %v1190_v51 = vpop.f32.mrb[21].mxu1  ;;  %v2725_v62 = vpop.f32.mrb[22].mxu0 }
 0x1f4   : > { %v2749_v53 = vadd.f32 %v1658_v35, %v1190_v51  ;;  %v2699_v29 = vpop.f32.mrb[22].mxu1  ;;  %v1661_v28 = vpop.f32.mrb[23].mxu0 }
 0x1f5   : > { %v1723_v30 = vmul.f32 %v2748_v46, %v3772_v21  ;;  %v1193_v5 = vpop.f32.mrb[23].mxu1 }
 0x1f6   : > { %v1721_v23 = vmul.f32 %v2749_v53, %v3772_v21  ;;  %v2750_v2 = vadd.f32 %v1661_v28, %v1193_v5 }
 0x1f7   : > { %v1752_v13 = vadd.f32 %v3778_v58, %v1723_v30 }
 0x1f8   : > { %v1750_v52 = vadd.f32 %v3778_v58, %v1721_v23  ;;  %v1722_v32 = vmul.f32 %v2750_v2, %v3772_v21 }
 0x1f9   : > { %v1821_v36 = vmax.f32 %v1752_v13, 0.0 }
 0x1fa   : > { %v1819_v38 = vmax.f32 %v1750_v52, 0.0  ;;  %v1751_v0 = vadd.f32 %v3778_v58, %v1722_v32 }
 0x1fb   : > { %v1959_v17 = vsel %vm1936_vm6, %v1821_v36, 0.0  ;;  %2083 = sbr.rel (!%p3027_p3) target bundleno = 538 (0x21a), region = 44 }
 0x1fc   : > { %v2608_v40 = vpack.c.bf16 %v1959_v17, %v1959_v17  ;;  %v1957_v8 = vsel %vm1934_vm7, %v1819_v38, 0.0  ;;  %v1820_v61 = vmax.f32 %v1751_v0, 0.0 }
 0x1fd   : > { %v2606_v22 = vpack.c.bf16 %v1957_v8, %v1957_v8 }
 0x1fe   : > { %2076 = vst.msk [vmem:[%s3788_s18 + $0x58] sm:$0xf] %vm2053_vm1, %v2608_v40  ;;  %v1958_v47 = vsel %vm1935_vm8, %v1820_v61, 0.0 }
 0x1ff   : > { %2074 = vst.msk [vmem:[%s3788_s18 + $0x50] sm:$0xf] %vm2053_vm1, %v2606_v22  ;;  %v2607_v21 = vpack.c.bf16 %v1958_v47, %v1958_v47 }
 0x201   : > { %2075 = vst.msk [vmem:[%s3788_s18 + $0x54] sm:$0xf] %vm2053_vm1, %v2607_v21 }
 0x202 LB: >> { %v2113_v58 = vld [vmem:[%s3788_s18] sm:$0xf]  ;;  %v2115_v50 = vld [vmem:[%s3788_s18 + $0x4] sm:$0xf]  ;;  %v2117_v26 = vld [vmem:[%s3788_s18 + $0x8] sm:$0xf]  ;;  %s2960_s7 = sphi %s3886_s7, %s2107_s7  }
 0x203   : >> { %2114 = vst [vmem:[%s3884_s6] sm:$0xf] %v2113_v58  ;;  %2116 = vst [vmem:[%s3884_s6 + $0x4] sm:$0xf] %v2115_v50  ;;  %v2119_v48 = vld [vmem:[%s3788_s18 + $0xc] sm:$0xf]  ;;  %s2107_s7 = sadd.s32 1, %s2960_s7  }
 0x204   : >> { %2118 = vst [vmem:[%s3884_s6 + $0x8] sm:$0xf] %v2117_v26  ;;  %v2121_v43 = vld [vmem:[%s3788_s18 + $0x10] sm:$0xf]  ;;  %v2123_v19 = vld [vmem:[%s3788_s18 + $0x14] sm:$0xf] }
 0x205   : >> { %2120 = vst [vmem:[%s3884_s6 + $0xc] sm:$0xf] %v2119_v48  ;;  %2122 = vst [vmem:[%s3884_s6 + $0x10] sm:$0xf] %v2121_v43  ;;  %v2125_v7 = vld [vmem:[%s3788_s18 + $0x18] sm:$0xf] }
 0x206   : >> { %2124 = vst [vmem:[%s3884_s6 + $0x14] sm:$0xf] %v2123_v19  ;;  %v2127_v57 = vld [vmem:[%s3788_s18 + $0x1c] sm:$0xf]  ;;  %v2129_v25 = vld [vmem:[%s3788_s18 + $0x20] sm:$0xf] }
 0x207   : >> { %2126 = vst [vmem:[%s3884_s6 + $0x18] sm:$0xf] %v2125_v7  ;;  %2128 = vst [vmem:[%s3884_s6 + $0x1c] sm:$0xf] %v2127_v57  ;;  %v2131_v42 = vld [vmem:[%s3788_s18 + $0x24] sm:$0xf] }
 0x208   : >> { %2130 = vst [vmem:[%s3884_s6 + $0x20] sm:$0xf] %v2129_v25  ;;  %v2133_v45 = vld [vmem:[%s3788_s18 + $0x28] sm:$0xf]  ;;  %v2135_v49 = vld [vmem:[%s3788_s18 + $0x2c] sm:$0xf] }
 0x209   : >> { %2132 = vst [vmem:[%s3884_s6 + $0x24] sm:$0xf] %v2131_v42  ;;  %2134 = vst [vmem:[%s3884_s6 + $0x28] sm:$0xf] %v2133_v45  ;;  %v2137_v27 = vld [vmem:[%s3788_s18 + $0x30] sm:$0xf] }
 0x20a   : >> { %2136 = vst [vmem:[%s3884_s6 + $0x2c] sm:$0xf] %v2135_v49  ;;  %v2139_v37 = vld [vmem:[%s3788_s18 + $0x34] sm:$0xf]  ;;  %v2141_v20 = vld [vmem:[%s3788_s18 + $0x38] sm:$0xf] }
 0x20b   : >> { %2138 = vst [vmem:[%s3884_s6 + $0x30] sm:$0xf] %v2137_v27  ;;  %2140 = vst [vmem:[%s3884_s6 + $0x34] sm:$0xf] %v2139_v37  ;;  %v2143_v1 = vld [vmem:[%s3788_s18 + $0x3c] sm:$0xf] }
 0x20c   : >> { %2142 = vst [vmem:[%s3884_s6 + $0x38] sm:$0xf] %v2141_v20  ;;  %v2145_v56 = vld [vmem:[%s3788_s18 + $0x40] sm:$0xf]  ;;  %v2147_v11 = vld [vmem:[%s3788_s18 + $0x44] sm:$0xf] }
 0x20d   : >> { %2144 = vst [vmem:[%s3884_s6 + $0x3c] sm:$0xf] %v2143_v1  ;;  %2146 = vst [vmem:[%s3884_s6 + $0x40] sm:$0xf] %v2145_v56  ;;  %v2149_v44 = vld [vmem:[%s3788_s18 + $0x48] sm:$0xf] }
 0x20e   : >> { %2148 = vst [vmem:[%s3884_s6 + $0x44] sm:$0xf] %v2147_v11  ;;  %v2151_v10 = vld [vmem:[%s3788_s18 + $0x4c] sm:$0xf]  ;;  %v2153_v39 = vld [vmem:[%s3788_s18 + $0x50] sm:$0xf] }
 0x20f   : >> { %2150 = vst [vmem:[%s3884_s6 + $0x48] sm:$0xf] %v2149_v44  ;;  %2152 = vst [vmem:[%s3884_s6 + $0x4c] sm:$0xf] %v2151_v10  ;;  %v2155_v14 = vld [vmem:[%s3788_s18 + $0x54] sm:$0xf] }
 0x210   : >> { %2154 = vst [vmem:[%s3884_s6 + $0x50] sm:$0xf] %v2153_v39  ;;  %v2157_v4 = vld [vmem:[%s3788_s18 + $0x58] sm:$0xf]  ;;  %2156 = vst [vmem:[%s3884_s6 + $0x54] sm:$0xf] %v2155_v14 }
 0x211   : >> { %2158 = vst [vmem:[%s3884_s6 + $0x58] sm:$0xf] %v2157_v4  ;;  %p2106_p9 = scmp.ge.s32.totalorder %s2107_s7, 1 }
 0x213   : > { %2109 = sbr.rel (!%p2106_p9) target bundleno = 514 (0x202), region = 134 }
 0x21a PF: > { %s15_s22 = sadd.s32 1, %s2956_s22   ;;  %s3986_s18 = smov %s2944_s19 }
 0x21b   : > { %p12_p10 = scmp.ge.s32.totalorder %s15_s22, 4   ;;  %s3987_s19 = smov %s3036_s28 }
 0x21c   : > { %s3988_s20 = smov %s2952_s21  ;;  %s3989_s21 = smov %s3991_s24 }
 0x21d   :  { %14 = sbr.rel (!%p12_p10) target bundleno = 3 (0x3), region = 156 }

// kernel: down_forward.5
= control target key start
LH: loop header
LB: loop body
LE: loop exit
PB: predicated region body
PF: predicated region fallthrough
CT: control target
= control target key end

     0   :  { %s2890_s18 = smov 0   ;;  %s2892_s19 = smov 0   ;;  %s3871_s0 = inlined_call_operand.vmem [shape: bf16[2,224,8], index: 0, kind: input, shape index: {}]   ;;  %s3872_s1 = inlined_call_operand.vmem [shape: bf16[3,24,8], index: 1, kind: input, shape index: {}]   ;;  %s3873_s2 = inlined_call_operand.vmem [shape: f32[1,8], index: 2, kind: input, shape index: {}]   ;;  %s3874_s3 = inlined_call_operand.vmem [shape: f32[1,8], index: 3, kind: input, shape index: {}]   ;;  %s3875_s4 = inlined_call_operand.vmem [shape: f32[184,1], index: 4, kind: input, shape index: {}]   ;;  %s3876_s5 = inlined_call_operand.vmem [shape: f32[2,224,8], index: 5, kind: output, shape index: {}]  }
   0x1   :  { %s2894_s20 = smov 0   ;;  %s2896_s21 = smov 0  }
   0x2   :  { %s2898_s22 = smov 0  }
   0x3 LB: > { %s2337_s23 = sadd.s32 4294967295, %s2851_s22   ;;  %s27_s24 = sadd.s32 1, %s2847_s21  ;;  %s2851_s22 = sphi %s2898_s22, %s15_s22   ;;  %s2847_s21 = sphi %s2896_s21, %s3915_s21   ;;  %s2843_s20 = sphi %s2894_s20, %s3914_s20   ;;  %s2839_s19 = sphi %s2892_s19, %s3913_s19   ;;  %s2835_s18 = sphi %s2890_s18, %s3912_s18  }
   0x4   : > { %p29_p0 = scmp.ge.s32.totalorder %s27_s24, 2  ;;  %s151_s25 = sadd.s32 1, %s2839_s19 }
   0x5   : > { %p161_p1 = scmp.ne.s32.totalorder %s2839_s19, %s2835_s18  ;;  %p162_p2 = scmp.eq.s32.totalorder %s2337_s23, 1 }
   0x6   : > { %s3917_s24 = smov (%p29_p0, %s27_s24), 0  ;;  %p2342_p4 = scmp.ge.s32.totalorder %s2851_s22, 1 }
   0x7   : > { %p2922_p3 = por %p162_p2, %p161_p1  ;;  %s146_s27 = ssub.s32 %s2847_s21, %s3917_s24 }
   0x8   : > { %p212_p5 = scmp.lt.s32.totalorder %s2851_s22, 3  ;;  %p149_p6 = scmp.eq.s32.totalorder %s146_s27, 0 }
   0xa   : > { %p213_p7 = pnand %p2342_p4, %p212_p5 }
   0xb   : > { %s2931_s28 = scalar_select %p149_p6, %s2839_s19, %s151_s25  }
   0xc   : > { %216 = sbr.rel (%p213_p7) target bundleno = 525 (0x20d), region = 40 }
  0x13   : > { %p244_p8 = scmp.lt.s32.totalorder %s2843_s20, 1  ;;  %vm473_vm0 = vcmask 1046528   ;;  %v2785_v0 = vld [vmem:[%s3872_s1 + $0xc] sm:$0xff]   ;;  %v2946_v1 = vld [vmem:[%s3872_s1] sm:$0xff]   ;;  %vm353_vm1 = vsmask.f32 7424 }
  0x14   : > { %2532 = vmatprep.subr.bf16.mxu1 %v2785_v0  ;;  %2560 = vmatprep.subr.bf16.mxu0 %v2946_v1  ;;  %s2857_s13 = smov 16   ;;  %s2858_s14 = smov 8   ;;  %vm918_vm2 = vcmask 1043456   ;;  %vm521_vm3 = vcmask 64512   ;;  %vm547_vm4 = vcmask 130048   ;;  %vm893_vm5 = vcmask 195584  }
  0x15   : > { %s245_s29 = scalar_select %p244_p8, %s2843_s20, 1  ;;  %2533 = vmatpush3.bf16.msra.mxu1 %v2785_v0  ;;  %2561 = vmatpush3.bf16.msra.mxu0 %v2946_v1 }
  0x16   : > { %s2673_s10 = smul.u32 (%p2922_p3), 224, %s2843_s20  ;;  %s3802_s15 = smov (%p2922_p3), 0  }
  0x17   : > { %s2672_s30 = smul.u32 112, %s245_s29 }
  0x19   : > { %s2938_s8 = scalar_lea.vmem %s3871_s0, %s2672_s30  ;;  %s241_s30 = sand.u32 1, %s2835_s18  }
  0x1a   : > { %v2949_v2 = vld [vmem:[%s2938_s8 + $0x8] sm:$0xff]   ;;  %v2952_v3 = vld [vmem:[%s2938_s8 + $0x10] sm:$0xff]   ;;  %v2956_v4 = vld [vmem:[%s2938_s8] sm:$0xff]   ;;  %s2671_s9 = smul.u32 184, %s241_s30 }
  0x1b   : > { %v475_v5 = vrot.slane %v2949_v2, 1  ;;  %v477_v6 = vrot.slane %v2952_v3, 1  ;;  %v474_v7 = vrot.slane %v2956_v4, 1  ;;  %v2963_v8 = vld [vmem:[%s2938_s8 + $0x8] sm:$0xff]   ;;  %v2969_v10 = vld [vmem:[%s2938_s8 + $0x10] sm:$0xff]   ;;  %v355_v11 = vshrl.u32 %v2956_v4, 16 }
  0x1c   : > { %v357_v12 = vshll.u32 %v2956_v4, 16  ;;  %v362_v13 = vshll.u32 %v2949_v2, 16  ;;  %v784_v15 = vrot.slane %v2963_v8, 1  ;;  %v2978_v16 = vld [vmem:[%s2938_s8 + $0x18] sm:$0xff]   ;;  %v666_v17 = vshrl.u32 %v2963_v8, 16  ;;  %v2991_v31 = vld [vmem:[%s2938_s8 + $0x20] sm:$0xff]  }
  0x1d   : > { %v478_v9 = vsel %vm473_vm0, %v475_v5, %v477_v6  ;;  %v476_v14 = vsel %vm473_vm0, %v474_v7, %v475_v5  ;;  %v668_v18 = vshll.u32 %v2963_v8, 16  ;;  %v785_v19 = vrot.slane %v2969_v10, 1  ;;  %v2994_v32 = vld [vmem:[%s2938_s8 + $0x18] sm:$0xff]   ;;  %v3004_v42 = vld [vmem:[%s2938_s8 + $0x20] sm:$0xff]   ;;  %v3014_v51 = vld [vmem:[%s2938_s8 + $0x28] sm:$0xff]   ;;  %s3704_s18 = scalar_lea.vmem [#allocation2], %s2671_s9  }
  0x1e   : > { %499 = vrot.lane.b32.xlu0 %v478_v9, %s2857_s13  ;;  %497 = vrot.lane.b32.xlu1 %v476_v14, %s2857_s13  ;;  %v359_v20 = vrot.slane %v357_v12, 1  ;;  %v364_v21 = vrot.slane %v362_v13, 1  ;;  %v673_v22 = vshll.u32 %v2969_v10, 16  ;;  %v787_v23 = vrot.slane %v2978_v16, 1  ;;  %v3032_v5 = vld [vmem:[%s2938_s8 + $0x30] sm:$0xff]   ;;  %v3036_v12 = vld [vmem:[%s2938_s8 + $0x28] sm:$0xff]  }
  0x1f   : > { %v670_v24 = vrot.slane %v668_v18, 1  ;;  %v366_v25 = vshrl.u32 %v2949_v2, 16  ;;  %v370_v26 = vshll.u32 %v2952_v3, 16  ;;  %v786_v27 = vsel %vm473_vm0, %v784_v15, %v785_v19 }
  0x20   : > { %v360_v28 = vor.u32 %v359_v20, %v355_v11  ;;  %v675_v29 = vrot.slane %v673_v22, 1  ;;  %v677_v30 = vshrl.u32 %v2969_v10, 16  ;;  %v788_v35 = vsel %vm473_vm0, %v785_v19, %v787_v23 }
  0x21   : > { %v671_v33 = vor.u32 %v670_v24, %v666_v17  ;;  %v368_v36 = vor.u32 %v366_v25, %v364_v21  ;;  %v681_v37 = vshll.u32 %v2978_v16, 16  ;;  %v372_v38 = vrot.slane %v370_v26, 1  ;;  %v3056_v26 = vld [vmem:[%s2938_s8 + $0x38] sm:$0xff]  }
  0x22   : > { %807 = vrot.lane.b32.xlu1 %v786_v27, %s2857_s13  ;;  %v365_v34 = vsel %vm353_vm1, %v360_v28, %v364_v21  ;;  %v679_v39 = vor.u32 %v677_v30, %v675_v29  ;;  %v685_v40 = vshrl.u32 %v2978_v16, 16  ;;  %v689_v41 = vshll.u32 %v2991_v31, 16  ;;  %v3049_v21 = vld [vmem:[%s2938_s8 + $0x30] sm:$0xff]  }
  0x23   : > { %449 = vrot.lane.b32.xlu0 %v365_v34, %s2858_s14  ;;  %v676_v43 = vsel %vm353_vm1, %v671_v33, %v675_v29  ;;  %v683_v44 = vrot.slane %v681_v37, 1  ;;  %v374_v45 = vshrl.u32 %v2952_v3, 16  ;;  %v378_v46 = vshll.u32 %v2994_v32, 16  ;;  %v3061_v33 = vld [vmem:[%s2938_s8 + $0x58] sm:$0xff]  }
  0x24   : > { %v373_v47 = vsel %vm353_vm1, %v368_v36, %v372_v38  ;;  %v691_v49 = vrot.slane %v689_v41, 1  ;;  %v386_v50 = vshll.u32 %v3004_v42, 16  ;;  %v382_v55 = vshrl.u32 %v2994_v32, 16 }
  0x25   : > { %v687_v48 = vor.u32 %v685_v40, %v683_v44  ;;  %v684_v52 = vsel %vm353_vm1, %v679_v39, %v683_v44  ;;  %v376_v53 = vor.u32 %v374_v45, %v372_v38  ;;  %v380_v54 = vrot.slane %v378_v46, 1  ;;  %v3071_v39 = vld [vmem:[%s2938_s8 + $0x10] sm:$0xff]   ;;  %v3078_v45 = vld [vmem:[%s2938_s8 + $0x60] sm:$0xf]  ;;  %v2380_v46 = vld [vmem:[%s2938_s8 + $0x64] sm:$0xf] }
  0x26   : > { %809 = vrot.lane.b32.xlu1 %v788_v35, %s2857_s13  ;;  %v479_v57 = vrot.slane %v2994_v32, 1  ;;  %v388_v58 = vrot.slane %v386_v50, 1  ;;  %v693_v61 = vshrl.u32 %v2991_v31, 16  ;;  %v697_v62 = vshll.u32 %v3014_v51, 16  ;;  %v3085_v50 = vld [vmem:[%s2938_s8 + $0x18] sm:$0xff]  }
  0x27   : > { %760 = vrot.lane.b32.xlu0 %v676_v43, %s2858_s14  ;;  %v692_v56 = vsel %vm353_vm1, %v687_v48, %v691_v49  ;;  %v381_v59 = vsel %vm353_vm1, %v376_v53, %v380_v54  ;;  %v384_v60 = vor.u32 %v382_v55, %v380_v54  ;;  %v789_v63 = vrot.slane %v2991_v31, 1  ;;  %v3089_v53 = vld [vmem:[%s2938_s8 + $0x40] sm:$0xff]  }
  0x28   : > { %v480_v0 = vsel %vm473_vm0, %v477_v6, %v479_v57  ;;  %v695_v9 = vor.u32 %v693_v61, %v691_v49  ;;  %v699_v11 = vrot.slane %v697_v62, 1  ;;  %v791_v14 = vrot.slane %v3014_v51, 1 }
  0x29   : > { %v389_v7 = vsel %vm353_vm1, %v384_v60, %v388_v58  ;;  %v790_v13 = vsel %vm473_vm0, %v787_v23, %v789_v63  ;;  %v481_v6 = vrot.slane %v3004_v42, 1  ;;  %v701_v15 = vshrl.u32 %v3014_v51, 16 }
  0x2a   : > { %451 = vrot.lane.b32.xlu1 %v373_v47, %s2858_s14  ;;  %v705_v17 = vshll.u32 %v3032_v5, 16  ;;  %v700_v18 = vsel %vm353_vm1, %v695_v9, %v699_v11  ;;  %v390_v19 = vshrl.u32 %v3004_v42, 16  ;;  %v394_v20 = vshll.u32 %v3036_v12, 16 }
  0x2b   : > { %762 = vrot.lane.b32.xlu0 %v684_v52, %s2858_s14  ;;  %v792_v22 = vsel %vm473_vm0, %v789_v63, %v791_v14  ;;  %v482_v23 = vsel %vm473_vm0, %v479_v57, %v481_v6  ;;  %v703_v24 = vor.u32 %v701_v15, %v699_v11  ;;  %v398_v29 = vshrl.u32 %v3036_v12, 16  ;;  %v3114_v15 = vld [vmem:[%s2938_s8 + $0x48] sm:$0xff]  }
  0x2c   : > { %v707_v25 = vrot.slane %v705_v17, 1  ;;  %v392_v27 = vor.u32 %v390_v19, %v388_v58  ;;  %v396_v28 = vrot.slane %v394_v20, 1  ;;  %v402_v30 = vshll.u32 %v3049_v21, 16  ;;  %v3127_v19 = vld [vmem:[%s2938_s8 + $0x20] sm:$0xff]  }
  0x2d   : > { %v483_v34 = vrot.slane %v3036_v12, 1  ;;  %v793_v36 = vrot.slane %v3032_v5, 1  ;;  %v709_v37 = vshrl.u32 %v3032_v5, 16  ;;  %v713_v38 = vshll.u32 %v3056_v26, 16 }
  0x2e   : > { %764 = vrot.lane.b32.xlu1 %v692_v56, %s2858_s14  ;;  %v708_v35 = vsel %vm353_vm1, %v703_v24, %v707_v25  ;;  %v397_v40 = vsel %vm353_vm1, %v392_v27, %v396_v28  ;;  %v400_v41 = vor.u32 %v398_v29, %v396_v28  ;;  %v3074_v43 = vrot.slane %v402_v30, 1 }
  0x2f   : > { %453 = vrot.lane.b32.xlu0 %v381_v59, %s2858_s14  ;;  %v745_v44 = vshll.u32 %v3061_v33, 16  ;;  %v484_v47 = vsel %vm473_vm0, %v481_v6, %v483_v34  ;;  %v711_v48 = vor.u32 %v709_v37, %v707_v25  ;;  %v715_v49 = vrot.slane %v713_v38, 1  ;;  %v3147_v38 = vld [vmem:[%s2938_s8 + $0x28] sm:$0xff]  }
  0x30   : > { %v1307_v52 = vshll.u32 %v3071_v39, 16  ;;  %v405_v54 = vsel %vm353_vm1, %v400_v41, %v3074_v43  ;;  %v3096_v56 = vcombine.low %v3078_v45, %v2380_v46  ;;  %v749_v57 = vshrl.u32 %v3061_v33, 16 }
  0x31   : > { %v3093_v55 = vrot.slane %v745_v44, 1  ;;  %v794_v58 = vsel %vm473_vm0, %v791_v14, %v793_v36  ;;  %v795_v59 = vrot.slane %v3056_v26, 1  ;;  %v3877_v60 = vrot.slane %v3049_v21, 1 }
  0x32   : > { %501 = vrot.lane.b32.xlu1 %v480_v0, %s2857_s13  ;;  %v3879_v61 = vrot.slane %v3061_v33, 1  ;;  %v753_v63 = vshll.u32 %v3096_v56, 16  ;;  %v3878_v0 = vrot.slane %v3096_v56, 1  ;;  %v1305_v9 = vshrl.u32 %v3071_v39, 16 }
  0x33   : > { %455 = vrot.lane.b32.xlu0 %v389_v7, %s2858_s14  ;;  %v751_v62 = vor.u32 %v749_v57, %v3093_v55  ;;  %v716_v7 = vsel %vm353_vm1, %v711_v48, %v715_v49  ;;  %v1309_v11 = vrot.slane %v1307_v52, 1  ;;  %v717_v14 = vshrl.u32 %v3056_v26, 16  ;;  %v3153_v48 = vld [vmem:[%s2938_s8 + $0x50] sm:$0xff]  }
  0x34   : > { %v721_v6 = vshll.u32 %v3089_v53, 16  ;;  %v3116_v17 = vrot.slane %v753_v63, 1  ;;  %v725_v29 = vshrl.u32 %v3089_v53, 16  ;;  %v729_v30 = vshll.u32 %v3114_v15, 16 }
  0x35   : > { %v1310_v24 = vor.u32 %v1309_v11, %v1305_v9  ;;  %v719_v27 = vor.u32 %v717_v14, %v715_v49  ;;  %v1320_v37 = vshll.u32 %v3127_v19, 16  ;;  %v3156_v49 = vld [vmem:[%s2938_s8 + $0x60] sm:$0xff]   ;;  %v1424_v52 = vrot.slane %v3085_v50, 1  ;;  %v2787_v11 = vld [vmem:[%s3872_s1 + $0x14] ss:$0 sps:$4 sm:$0xff]  }
  0x36   : > { %811 = vrot.lane.b32.xlu1 %v790_v13, %s2857_s13  ;;  %v1312_v13 = vshll.u32 %v3085_v50, 16  ;;  %v3131_v20 = vsel %vm353_vm1, %v751_v62, %v3116_v17  ;;  %v723_v28 = vrot.slane %v721_v6, 1  ;;  %v731_v44 = vrot.slane %v729_v30, 1  ;;  %v3162_v62 = vld [vmem:[%s2938_s8 + $0x50] sm:$0xff]   ;;  %v3176_v14 = vld [vmem:[%s3872_s1 + $0x8] ss:$0 sps:$4 sm:$0xff]   ;;  %2667 = vmatprep.subr.msk.bf16.mxu1 %vm918_vm2, %v2787_v11 }
  0x37   : > { %766 = vrot.lane.b32.xlu0 %v700_v18, %s2858_s14  ;;  %v3123_v18 = vsel %vm473_vm0, %v3879_v61, %v3878_v0  ;;  %v1322_v57 = vrot.slane %v1320_v37, 1  ;;  %v1324_v63 = vshrl.u32 %v3127_v19, 16  ;;  %v733_v9 = vshrl.u32 %v3114_v15, 16  ;;  %v3179_v6 = vld [vmem:[%s2938_s8 + $0x68] sm:$0xf]  ;;  %v3194_v30 = vld [vmem:[%s3872_s1 + $0x18] sm:$0xff]   ;;  %2668 = vmatprep.subr.msk.bf16.mxu0 %vm918_vm2, %v3176_v14 }
  0x38   : > { %v1314_v25 = vrot.slane %v1312_v13, 1  ;;  %v727_v41 = vor.u32 %v725_v29, %v723_v28  ;;  %3892 = vst [vmem:[#allocation3_spill] sm:$0xff] %v3179_v6  ;;  %v434_v29 = vshll.u32 %v3162_v62, 16  ;;  %v801_v61 = vrot.slane %v3153_v48, 1 }
  0x39   : > { %v1326_v37 = vor.u32 %v1324_v63, %v1322_v57 }
  0x3a   : > { %813 = vrot.lane.b32.xlu1 %v792_v22, %s2857_s13  ;;  %v796_v22 = vsel %vm473_vm0, %v793_v36, %v795_v59  ;;  %v1316_v36 = vshrl.u32 %v3085_v50, 16  ;;  %v732_v13 = vsel %vm353_vm1, %v727_v41, %v731_v44  ;;  %v291_v41 = vld [vmem:[%s2938_s8 + $0x5c] sm:$0xf] }
  0x3b   : > { %503 = vrot.lane.b32.xlu0 %v482_v23, %s2857_s13  ;;  %v486_v23 = vsel %vm473_vm0, %v483_v34, %v3877_v60  ;;  %v1315_v34 = vsel %vm353_vm1, %v1310_v24, %v1314_v25  ;;  %v1384_v24 = vshll.u32 %v3156_v49, 16 }
  0x3e   : > { %768 = vrot.lane.b32.xlu1 %v708_v35, %s2858_s14  ;;  %v797_v35 = vrot.slane %v3089_v53, 1 }
  0x3f   : > { %457 = vrot.lane.b32.xlu0 %v397_v40, %s2858_s14  ;;  %v724_v40 = vsel %vm353_vm1, %v719_v27, %v723_v28 }
  0x40   : > { %v798_v46 = vsel %vm473_vm0, %v795_v59, %v797_v35  ;;  %v799_v59 = vrot.slane %v3114_v15, 1 }
  0x42   : > { %505 = vrot.lane.b32.xlu1 %v484_v47, %s2857_s13  ;;  %v1423_v47 = vrot.slane %v3071_v39, 1 }
  0x43   : > { %459 = vrot.lane.b32.xlu0 %v405_v54, %s2858_s14  ;;  %v1318_v54 = vor.u32 %v1316_v36, %v1314_v25  ;;  %v800_v36 = vsel %vm473_vm0, %v797_v35, %v799_v59  ;;  %v3213_v35 = vsel %vm918_vm2, %v3176_v14, 0 }
  0x44   : > { %v1425_v25 = vsel %vm473_vm0, %v1423_v47, %v1424_v52  ;;  %v735_v47 = vor.u32 %v733_v9, %v731_v44  ;;  %2563 = vmatpush3.bf16.msra.mxu0 %v3213_v35  ;;  %v1388_v44 = vshrl.u32 %v3156_v49, 16 }
  0x45   : > { %v1323_v27 = vsel %vm353_vm1, %v1318_v54, %v1322_v57  ;;  %v3215_v57 = vrot.slane %v1384_v24, 1  ;;  %2588 = vmatprep.subr.bf16.mxu0 %v3194_v30 }
  0x46   : > { %815 = vrot.lane.b32.xlu1 %v794_v58, %s2857_s13  ;;  %v3882_v58 = vrot.slane %v3127_v19, 1 }
  0x47   : > { %770 = vrot.lane.b32.xlu0 %v716_v7, %s2858_s14  ;;  %v1328_v7 = vshll.u32 %v3147_v38, 16  ;;  %v1390_v24 = vor.u32 %v1388_v44, %v3215_v57 }
  0x48   : > { %v1427_v28 = vsel %vm473_vm0, %v1424_v52, %v3882_v58  ;;  %v920_v52 = vsel %vm918_vm2, %v2787_v11, 0  ;;  %v438_v11 = vshrl.u32 %v3162_v62, 16 }
  0x49   : > { %2535 = vmatpush3.bf16.msra.mxu1 %v920_v52 }
  0x4a   : > { %817 = vrot.lane.b32.xlu1 %v796_v22, %s2857_s13  ;;  %v2448_v22 = vld [vmem:[%s2938_s8 + $0x6c] sm:$0xf]  ;;  %2616 = vmatprep.subr.bf16.mxu1 %v2946_v1 }
  0x4b   : > { %507 = vrot.lane.b32.xlu0 %v486_v23, %s2857_s13  ;;  %v737_v23 = vshll.u32 %v3153_v48, 16 }
  0x4d   : > { %v739_v54 = vrot.slane %v737_v23, 1  ;;  %v3881_v23 = vrot.slane %v3156_v49, 1 }
  0x4e   : > { %1399 = vrot.lane.b32.xlu1 %v1315_v34, %s2858_s14  ;;  %v3201_v34 = vcombine.low %v3179_v6, %v2448_v22  ;;  %v741_v22 = vshrl.u32 %v3153_v48, 16  ;;  %v3340_v6 = vld [vmem:[%s2938_s8 + $0x50] sm:$0xff]  }
  0x4f   : > { %772 = vrot.lane.b32.xlu0 %v724_v40, %s2858_s14  ;;  %v3204_v40 = vld [vmem:[%s2938_s8 + $0x58] sm:$0xf]  ;;  %3899 = vst [vmem:[#allocation8_spill] sm:$0xff] %v3340_v6 }
  0x50   : > { %3893 = vst [vmem:[#allocation4_spill] sm:$0xff] %v3204_v40  ;;  %v1392_v63 = vshll.u32 %v3201_v34, 16  ;;  %v3224_v9 = vcombine.low %v3204_v40, %v291_v41  ;;  %v3884_v41 = vrot.slane %v3162_v62, 1 }
  0x52   : > { %819 = vrot.lane.b32.xlu1 %v798_v46, %s2857_s13  ;;  %v1330_v46 = vrot.slane %v1328_v7, 1  ;;  %v3221_v7 = vrot.slane %v434_v29, 1  ;;  %v3237_v29 = vld [vmem:[%s2938_s8 + $0x30] sm:$0xff]   ;;  %v442_v60 = vshll.u32 %v3224_v9, 16 }
  0x53   : > { %774 = vrot.lane.b32.xlu0 %v732_v13, %s2858_s14  ;;  %v3880_v13 = vrot.slane %v3201_v34, 1 }
  0x54   : > { %v440_v52 = vor.u32 %v438_v11, %v3221_v7 }
  0x55   : > { %v3252_v44 = vsel %vm473_vm0, %v3881_v23, %v3880_v13  ;;  %v1332_v13 = vshrl.u32 %v3147_v38, 16  ;;  %v740_v23 = vsel %vm353_vm1, %v735_v47, %v739_v54 }
  0x56   : > { %1446 = vrot.lane.b32.xlu1 %v1425_v25, %s2857_s13  ;;  %v3233_v25 = vrot.slane %v1392_v63, 1  ;;  %v3255_v63 = vrot.slane %v442_v60, 1  ;;  %v1336_v60 = vshll.u32 %v3237_v29, 16 }
  0x57   : > { %1401 = vrot.lane.b32.xlu0 %v1323_v27, %s2858_s14  ;;  %v3883_v27 = vrot.slane %v3224_v9, 1 }
  0x58   : > { %v3245_v0 = vsel %vm353_vm1, %v1390_v24, %v3233_v25  ;;  %v1331_v24 = vsel %vm353_vm1, %v1326_v37, %v1330_v46  ;;  %v3272_v58 = vsel %vm353_vm1, %v440_v52, %v3255_v63  ;;  %v1428_v37 = vrot.slane %v3147_v38, 1 }
  0x59   : > { %v3262_v11 = vsel %vm473_vm0, %v3884_v41, %v3883_v27  ;;  %v3281_v27 = vld [vmem:[%s2938_s8 + $0x38] sm:$0xff]  }
  0x5a   : > { %1448 = vrot.lane.b32.xlu1 %v1427_v28, %s2857_s13  ;;  %v743_v28 = vor.u32 %v741_v22, %v739_v54  ;;  %v1334_v54 = vor.u32 %v1332_v13, %v1330_v46  ;;  %v1338_v22 = vrot.slane %v1336_v60, 1  ;;  %v1344_v41 = vshll.u32 %v3281_v27, 16 }
  0x5b   : > { %821 = vrot.lane.b32.xlu0 %v800_v36, %s2857_s13  ;;  %v802_v36 = vsel %vm473_vm0, %v799_v59, %v801_v61  ;;  %v1430_v59 = vrot.slane %v3237_v29, 1 }
  0x5c   : > { %v748_v47 = vsel %vm353_vm1, %v743_v28, %v3093_v55  ;;  %v1339_v40 = vsel %vm353_vm1, %v1334_v54, %v1338_v22  ;;  %v1346_v13 = vrot.slane %v1344_v41, 1  ;;  %v3895_v28 = vrot.slane %v3061_v33, 1 }
  0x5d   : > { %v1431_v55 = vsel %vm473_vm0, %v1428_v37, %v1430_v59  ;;  %v1348_v54 = vshrl.u32 %v3281_v27, 16  ;;  %v1432_v41 = vrot.slane %v3281_v27, 1 }
  0x5e   : > { %1403 = vrot.lane.b32.xlu1 %v1331_v24, %s2858_s14  ;;  %v1340_v24 = vshrl.u32 %v3237_v29, 16  ;;  %v804_v60 = vsel %vm473_vm0, %v801_v61, %v3895_v28 }
  0x5f   : > { %776 = vrot.lane.b32.xlu0 %v740_v23, %s2858_s14  ;;  %v3894_v23 = vrot.slane %v3127_v19, 1 }
  0x60   : > { %v1342_v46 = vor.u32 %v1340_v24, %v1338_v22  ;;  %v3315_v22 = vld [vmem:[%s2938_s8 + $0x48] sm:$0xff]   ;;  %v3318_v24 = vld [vmem:[%s2938_s8 + $0x38] sm:$0xff]  }
  0x61   : > { %v1429_v52 = vsel %vm473_vm0, %v3894_v23, %v1428_v37  ;;  %3896 = vst [vmem:[#allocation5_spill] sm:$0xff] %v3315_v22  ;;  %v1350_v23 = vor.u32 %v1348_v54, %v1346_v13  ;;  %3897 = vst [vmem:[#allocation6_spill] sm:$0xff] %v3318_v24 }
  0x62   : > { %823 = vrot.lane.b32.xlu1 %v802_v36, %s2857_s13  ;;  %v3301_v36 = vld [vmem:[%s2938_s8 + $0x40] sm:$0xff]  }
  0x63   : > { %778 = vrot.lane.b32.xlu0 %v748_v47, %s2858_s14  ;;  %v1347_v47 = vsel %vm353_vm1, %v1342_v46, %v1346_v13  ;;  %v1352_v37 = vshll.u32 %v3301_v36, 16  ;;  %v1360_v46 = vshll.u32 %v3315_v22, 16  ;;  %v406_v13 = vshrl.u32 %v3049_v21, 16 }
  0x65   : > { %v408_v54 = vor.u32 %v406_v13, %v3074_v43  ;;  %v1364_v43 = vshrl.u32 %v3315_v22, 16  ;;  %v1368_v13 = vshll.u32 %v3340_v6, 16 }
  0x66   : > { %1450 = vrot.lane.b32.xlu1 %v1429_v52, %s2857_s13  ;;  %v1354_v52 = vrot.slane %v1352_v37, 1 }
  0x67   : > { %1405 = vrot.lane.b32.xlu0 %v1339_v40, %s2858_s14  ;;  %v757_v40 = vshrl.u32 %v3096_v56, 16 }
  0x68   : > { %v1355_v28 = vsel %vm353_vm1, %v1350_v23, %v1354_v52 }
  0x69   : > { %v759_v61 = vor.u32 %v757_v40, %v3116_v17  ;;  %v1356_v17 = vshrl.u32 %v3301_v36, 16  ;;  %v1362_v40 = vrot.slane %v1360_v46, 1 }
  0x6a   : > { %1452 = vrot.lane.b32.xlu1 %v1431_v55, %s2857_s13  ;;  %v1433_v55 = vsel %vm473_vm0, %v1430_v59, %v1432_v41 }
  0x6b   : > { %825 = vrot.lane.b32.xlu0 %v804_v60, %s2857_s13  ;;  %v410_v60 = vshll.u32 %v3318_v24, 16  ;;  %v1358_v59 = vor.u32 %v1356_v17, %v1354_v52  ;;  %v487_v52 = vrot.slane %v3318_v24, 1 }
  0x6d   : > { %v412_v37 = vrot.slane %v410_v60, 1 }
  0x6e   : > { %1407 = vrot.lane.b32.xlu1 %v1347_v47, %s2858_s14  ;;  %v3331_v47 = vld [vmem:[%s2938_s8 + $0x40] sm:$0xff]  }
  0x6f   : > { %780 = vrot.lane.b32.xlu0 %v3131_v20, %s2858_s14  ;;  %v1434_v20 = vrot.slane %v3301_v36, 1  ;;  %3898 = vst [vmem:[#allocation7_spill] sm:$0xff] %v3331_v47  ;;  %v418_v23 = vshll.u32 %v3331_v47, 16  ;;  %v413_v17 = vsel %vm353_vm1, %v408_v54, %v412_v37  ;;  %v1370_v54 = vrot.slane %v1368_v13, 1 }
  0x72   : > { %827 = vrot.lane.b32.xlu1 %v3123_v18, %s2857_s13  ;;  %v1435_v18 = vsel %vm473_vm0, %v1432_v41, %v1434_v20  ;;  %v1363_v41 = vsel %vm353_vm1, %v1358_v59, %v1362_v40  ;;  %v3358_v59 = vld [vmem:[%s2938_s8 + $0x58] sm:$0xff]  }
  0x73   : > { %782 = vrot.lane.b32.xlu0 %v759_v61, %s2858_s14  ;;  %v414_v61 = vshrl.u32 %v3318_v24, 16  ;;  %v1366_v24 = vor.u32 %v1364_v43, %v1362_v40  ;;  %v422_v40 = vshrl.u32 %v3331_v47, 16 }
  0x75   : > { %v416_v46 = vor.u32 %v414_v61, %v412_v37  ;;  %v3362_v37 = vld [vmem:[%s2938_s8 + $0x48] sm:$0xff]  }
  0x76   : > { %1454 = vrot.lane.b32.xlu1 %v1433_v55, %s2857_s13  ;;  %v3900_v55 = vrot.slane %v3096_v56, 1  ;;  %v3901_v56 = vrot.slane %v3049_v21, 1  ;;  %v1438_v21 = vrot.slane %v3340_v6, 1  ;;  %v426_v43 = vshll.u32 %v3362_v37, 16 }
  0x77   : > { %1409 = vrot.lane.b32.xlu0 %v1355_v28, %s2858_s14  ;;  %v420_v28 = vrot.slane %v418_v23, 1  ;;  %v1372_v23 = vshrl.u32 %v3340_v6, 16 }
  0x78   : > { %v488_v60 = vsel %vm473_vm0, %v3901_v56, %v487_v52  ;;  %v428_v6 = vrot.slane %v426_v43, 1 }
  0x79   : > { %v1374_v13 = vor.u32 %v1372_v23, %v1370_v54 }
  0x7a   : > { %1456 = vrot.lane.b32.xlu1 %v1435_v18, %s2857_s13  ;;  %v1436_v18 = vrot.slane %v3315_v22, 1 }
  0x7b   : > { %829 = vrot.lane.b32.xlu0 %v3900_v55, %s2857_s13  ;;  %v421_v55 = vsel %vm353_vm1, %v416_v46, %v420_v28  ;;  %v489_v46 = vrot.slane %v3331_v47, 1 }
  0x7c   : > { %v1437_v61 = vsel %vm473_vm0, %v1434_v20, %v1436_v18  ;;  %v1439_v20 = vsel %vm473_vm0, %v1436_v18, %v1438_v21  ;;  %v1380_v18 = vshrl.u32 %v3358_v59, 16 }
  0x7e   : > { %1411 = vrot.lane.b32.xlu1 %v1363_v41, %s2858_s14  ;;  %v1376_v41 = vshll.u32 %v3358_v59, 16 }
  0x7f   : > { %461 = vrot.lane.b32.xlu0 %v413_v17, %s2858_s14  ;;  %v1371_v17 = vsel %vm353_vm1, %v1366_v24, %v1370_v54  ;;  %v430_v24 = vshrl.u32 %v3362_v37, 16  ;;  %v1440_v54 = vrot.slane %v3358_v59, 1 }
  0x80   : > { %v1378_v56 = vrot.slane %v1376_v41, 1 }
  0x81   : > { %v432_v22 = vor.u32 %v430_v24, %v428_v6  ;;  %v446_v24 = vshrl.u32 %v3224_v9, 16 }
  0x82   : > { %509 = vrot.lane.b32.xlu1 %v488_v60, %s2857_s13  ;;  %v490_v60 = vsel %vm473_vm0, %v487_v52, %v489_v46  ;;  %v1379_v47 = vsel %vm353_vm1, %v1374_v13, %v1378_v56 }
  0x83   : > { %463 = vrot.lane.b32.xlu0 %v421_v55, %s2858_s14  ;;  %v424_v55 = vor.u32 %v422_v40, %v420_v28  ;;  %v437_v41 = vsel %vm353_vm1, %v432_v22, %v3221_v7  ;;  %v1382_v40 = vor.u32 %v1380_v18, %v1378_v56  ;;  %v3902_v22 = vrot.slane %v3156_v49, 1 }
  0x85   : > { %v1387_v43 = vsel %vm353_vm1, %v1382_v40, %v3215_v57  ;;  %v3903_v57 = vrot.slane %v3162_v62, 1 }
  0x86   : > { %1458 = vrot.lane.b32.xlu1 %v1437_v61, %s2857_s13  ;;  %v491_v61 = vrot.slane %v3362_v37, 1 }
  0x87   : > { %1413 = vrot.lane.b32.xlu0 %v1371_v17, %s2858_s14  ;;  %v429_v17 = vsel %vm353_vm1, %v424_v55, %v428_v6  ;;  %v1441_v6 = vsel %vm473_vm0, %v1438_v21, %v1440_v54  ;;  %v1443_v21 = vsel %vm473_vm0, %v1440_v54, %v3902_v22 }
  0x88   : > { %v492_v28 = vsel %vm473_vm0, %v489_v46, %v491_v61  ;;  %v494_v56 = vsel %vm473_vm0, %v491_v61, %v3903_v57  ;;  %v2792_v61 = vld [vmem:[%s3872_s1 + $0x20] ss:$0 sps:$4 sm:$0xff]  }
  0x8a   : > { %1460 = vrot.lane.b32.xlu1 %v1439_v20, %s2857_s13 }
  0x8b   : > { %511 = vrot.lane.b32.xlu0 %v490_v60, %s2857_s13 }
  0x8e   : > { %1415 = vrot.lane.b32.xlu1 %v1379_v47, %s2858_s14 }
  0x8f   : > { %465 = vrot.lane.b32.xlu0 %v429_v17, %s2858_s14 }
  0x90   : > { %v500_v52 = vpop.permute.xlu0 %499  ;;  %v498_v23 = vpop.permute.xlu1 %497 }
  0x92   : > { %513 = vrot.lane.b32.xlu1 %v492_v28, %s2857_s13 }
  0x93   : > { %467 = vrot.lane.b32.xlu0 %v437_v41, %s2858_s14  ;;  %v1396_v41 = vshrl.u32 %v3201_v34, 16 }
  0x94   : > { %v808_v47 = vpop.permute.xlu1 %807 }
  0x95   : > { %v450_v46 = vpop.permute.xlu0 %449 }
  0x96   : > { %v523_v20 = vsel %vm521_vm3, %v2956_v4, %v450_v46  ;;  %1462 = vrot.lane.b32.xlu1 %v1441_v6, %s2857_s13  ;;  %v3905_v46 = vrot.slane %v3224_v9, 1  ;;  %v1772_v9 = vld [vmem:[%s3875_s4 + $0x20] sm:$0xff] }
  0x97   : > { %1417 = vrot.lane.b32.xlu0 %v1387_v43, %s2858_s14  ;;  %v549_v7 = vsel %vm547_vm4, %v523_v20, %v498_v23  ;;  %v3904_v43 = vrot.slane %v3201_v34, 1  ;;  %vm1795_vm10 = vcmp.gt.f32.partialorder %v1772_v9, 0.5 }
  0x98   : > { %2564 = vmatprep.mubr.msk.bf16.mxu0 %vm893_vm5, %v549_v7  ;;  %v810_v13 = vpop.permute.xlu1 %809 }
  0x99   : > { %v761_v60 = vpop.permute.xlu0 %760 }
  0x9a   : > { %v832_v4 = vsel %vm521_vm3, %v2963_v8, %v761_v60  ;;  %1464 = vrot.lane.b32.xlu1 %v1443_v21, %s2857_s13 }
  0x9b   : > { %515 = vrot.lane.b32.xlu0 %v494_v56, %s2857_s13  ;;  %v857_v55 = vsel %vm547_vm4, %v832_v4, %v808_v47 }
  0x9c   : > { %2536 = vmatprep.mubr.msk.bf16.mxu1 %vm893_vm5, %v857_v55  ;;  %v452_v17 = vpop.permute.xlu1 %451 }
  0x9d   : > { %v525_v18 = vsel %vm521_vm3, %v2949_v2, %v452_v17  ;;  %v763_v28 = vpop.permute.xlu0 %762  ;;  %v448_v2 = vor.u32 %v446_v24, %v3255_v63  ;;  %v2859_v63 = vmov 0   ;;  %v1774_v24 = vld [vmem:[%s3875_s4 + $0x30] sm:$0xff]  ;;  %v1775_v17 = vld [vmem:[%s3875_s4 + $0x38] sm:$0xff] }
  0x9e   : > { %v834_v8 = vsel %vm521_vm3, %v2969_v10, %v763_v28  ;;  %1419 = vrot.lane.b32.xlu1 %v3245_v0, %s2858_s14  ;;  %v551_v54 = vsel %vm547_vm4, %v525_v18, %v500_v52  ;;  %v1557_v0 = vsel %vm918_vm2, %v2792_v61, 0  ;;  %2749 = vset.pattern.permute.xlu0 %v2859_v63  ;;  %v1841_v18 = vsel %vm1795_vm10, 1, %v2859_v63 }
  0x9f   : > { %469 = vrot.lane.b32.xlu0 %v3272_v58, %s2858_s14  ;;  %v859_v23 = vsel %vm547_vm4, %v834_v8, %v810_v13  ;;  %2565 = vmatmul.mubr.msk.bf16.vlgmr.msra.gmra.mrb[0].mxu0 %vm893_vm5, %v551_v54  ;;  %v1398_v58 = vor.u32 %v1396_v41, %v3233_v25  ;;  %vm1797_vm12 = vcmp.gt.f32.partialorder %v1774_v24, 0.5  ;;  %vm1798_vm13 = vcmp.gt.f32.partialorder %v1775_v17, 0.5  ;;  %v1777_v41 = vld [vmem:[%s3875_s4 + $0x48] sm:$0xff]  ;;  %v1786_v17 = vld [vmem:[%s3875_s4 + $0x90] sm:$0xff] }
  0xa0   : > { %2537 = vmatmul.mubr.msk.bf16.vlgmr.msra.gmra.mrb[0].mxu1 %vm893_vm5, %v859_v23  ;;  %v765_v40 = vpop.permute.xlu1 %764  ;;  %2589 = vmatpush3.bf16.msra.mxu0 %v3194_v30  ;;  %vm1800_vm15 = vcmp.gt.f32.partialorder %v1777_v41, 0.5  ;;  %v1788_v41 = vld [vmem:[%s3875_s4 + $0xa0] sm:$0xff] }
  0xa1   : > { %v454_v10 = vpop.permute.xlu0 %453  ;;  %2670 = vmatprep.subr.msk.bf16.mxu0 %vm918_vm2, %v2792_v61  ;;  %2618 = vmatpush3.bf16.msra.mxu1 %v2946_v1  ;;  %v836_v25 = vsel %vm521_vm3, %v2978_v16, %v765_v40  ;;  %v1771_v16 = vld [vmem:[%s3875_s4 + $0x18] sm:$0xff] }
  0xa2   : > { %517 = vrot.lane.b32.xlu1 %v3262_v11, %s2857_s13  ;;  %2669 = vmatprep.subr.msk.bf16.mxu1 %vm918_vm2, %v3176_v14  ;;  %v527_v30 = vsel %vm521_vm3, %v2952_v3, %v454_v10  ;;  %v1769_v14 = vld [vmem:[%s3875_s4 + $0x8] sm:$0xff]  ;;  %v1768_v3 = vld [vmem:[%s3875_s4] sm:$0xff]  ;;  %vm1794_vm9 = vcmp.gt.f32.partialorder %v1771_v16, 0.5 }
  0xa3   : > { %471 = vrot.lane.b32.xlu0 %v448_v2, %s2858_s14  ;;  %2750 = vset.pattern.permute.xlu1 %v2859_v63  ;;  %vm1792_vm6 = vcmp.gt.f32.partialorder %v1769_v14, 0.5  ;;  %vm1791_vm7 = vcmp.gt.f32.partialorder %v1768_v3, 0.5  ;;  %v1840_v4 = vsel %vm1794_vm9, 1, %v2859_v63  ;;  %v1776_v2 = vld [vmem:[%s3875_s4 + $0x40] sm:$0xff]  ;;  %v1846_v3 = vsel %vm1800_vm15, 1, %v2859_v63 }
  0xa4   : > { %v502_v52 = vpop.permute.xlu1 %501  ;;  %2591 = vmatpush3.bf16.msra.mxu0 %v1557_v0  ;;  %v1838_v20 = vsel %vm1792_vm6, 1, %v2859_v63  ;;  %v1837_v21 = vsel %vm1791_vm7, 1, %v2859_v63  ;;  %vm1799_vm14 = vcmp.gt.f32.partialorder %v1776_v2, 0.5  ;;  %v1844_v0 = vsel %vm1798_vm13, 1, %v2859_v63 }
  0xa5   : > { %v553_v1 = vsel %vm547_vm4, %v527_v30, %v502_v52  ;;  %v456_v11 = vpop.permute.xlu0 %455  ;;  %2619 = vmatpush3.bf16.msra.mxu1 %v3213_v35  ;;  %v1778_v52 = vld [vmem:[%s3875_s4 + $0x50] sm:$0xff]  ;;  %vm1811_vm13 = vcmp.gt.f32.partialorder %v1788_v41, 0.5 }
  0xa6   : > { %1466 = vrot.lane.b32.xlu1 %v3252_v44, %s2857_s13  ;;  %2568 = vmatprep.mubr.msk.bf16.mxu0 %vm893_vm5, %v553_v1  ;;  %v1770_v44 = vld [vmem:[%s3875_s4 + $0x10] sm:$0xff]  ;;  %v529_v34 = vsel %vm521_vm3, %v2994_v32, %v456_v11  ;;  %v1779_v1 = vld [vmem:[%s3875_s4 + $0x58] sm:$0xff]  ;;  %vm1801_vm0 = vcmp.gt.f32.partialorder %v1778_v52, 0.5 }
  0xa7   : > { %1421 = vrot.lane.b32.xlu0 %v1398_v58, %s2858_s14  ;;  %vm1793_vm8 = vcmp.gt.f32.partialorder %v1770_v44, 0.5  ;;  %vm1802_vm1 = vcmp.gt.f32.partialorder %v1779_v1, 0.5  ;;  %s3800_s14 = scalar_lea.vmem (%p2922_p3), %s3876_s5, %s2673_s10  }
  0xa8   : > { %v812_v6 = vpop.permute.xlu1 %811  ;;  %v1839_v32 = vsel %vm1793_vm8, 1, %v2859_v63  ;;  %v1848_v16 = vsel %vm1802_vm1, 1, %v2859_v63 }
  0xa9   : > { %v861_v35 = vsel %vm547_vm4, %v836_v25, %v812_v6  ;;  %v767_v47 = vpop.permute.xlu0 %766 }
  0xaa   : > { %1468 = vrot.lane.b32.xlu1 %v3904_v43, %s2857_s13  ;;  %2540 = vmatprep.mubr.msk.bf16.mxu1 %vm893_vm5, %v861_v35  ;;  %v838_v7 = vsel %vm521_vm3, %v2991_v31, %v767_v47  ;;  %v1773_v31 = vld [vmem:[%s3875_s4 + $0x28] sm:$0xff]  ;;  %v1780_v47 = vld [vmem:[%s3875_s4 + $0x60] sm:$0xff] }
  0xab   : > { %519 = vrot.lane.b32.xlu0 %v3905_v46, %s2857_s13  ;;  %vm1796_vm11 = vcmp.gt.f32.partialorder %v1773_v31, 0.5  ;;  %vm1803_vm2 = vcmp.gt.f32.partialorder %v1780_v47, 0.5  ;;  %v1785_v31 = vld [vmem:[%s3875_s4 + $0x88] sm:$0xff] }
  0xac   : > { %v814_v22 = vpop.permute.xlu1 %813  ;;  %v1842_v8 = vsel %vm1796_vm11, 1, %v2859_v63  ;;  %vm1808_vm10 = vcmp.gt.f32.partialorder %v1785_v31, 0.5  ;;  %vm1809_vm11 = vcmp.gt.f32.partialorder %v1786_v17, 0.5 }
  0xad   : > { %v863_v13 = vsel %vm547_vm4, %v838_v7, %v814_v22  ;;  %v504_v57 = vpop.permute.xlu0 %503  ;;  %v1783_v7 = vld [vmem:[%s3875_s4 + $0x78] sm:$0xff]  ;;  %v1849_v22 = vsel %vm1803_vm2, 1, %v2859_v63 }
  0xae   : > { %v555_v56 = vsel %vm547_vm4, %v529_v34, %v504_v57  ;;  %2541 = vmatmul.mubr.msk.bf16.gmra.mrb[4].mxu1 %vm893_vm5, %v863_v13  ;;  %1864 = vperm.xlu1 %2750, %v1838_v20   ;;  %v1782_v20 = vld [vmem:[%s3875_s4 + $0x70] sm:$0xff]  ;;  %vm1806_vm8 = vcmp.gt.f32.partialorder %v1783_v7, 0.5 }
  0xaf   : > { %2569 = vmatmul.mubr.msk.bf16.gmra.mrb[4].mxu0 %vm893_vm5, %v555_v56  ;;  %1861 = vperm.xlu0 %2749, %v1837_v21   ;;  %vm1805_vm7 = vcmp.gt.f32.partialorder %v1782_v20, 0.5  ;;  %v1784_v56 = vld [vmem:[%s3875_s4 + $0x80] sm:$0xff] }
  0xb0   : > { %v769_v60 = vpop.permute.xlu1 %768  ;;  %vm1807_vm9 = vcmp.gt.f32.partialorder %v1784_v56, 0.5 }
  0xb1   : > { %v458_v55 = vpop.permute.xlu0 %457  ;;  %v840_v40 = vsel %vm521_vm3, %v3014_v51, %v769_v60  ;;  %v1845_v51 = vsel %vm1799_vm14, 1, %v2859_v63 }
  0xb2   : > { %1867 = vperm.xlu1 %2750, %v1839_v32   ;;  %v531_v28 = vsel %vm521_vm3, %v3004_v42, %v458_v55  ;;  %v1843_v42 = vsel %vm1797_vm12, 1, %v2859_v63 }
  0xb3   : > { %1870 = vperm.xlu0 %2749, %v1840_v4   ;;  %v1852_v4 = vsel %vm1806_vm8, 1, %v2859_v63 }
  0xb4   : > { %v506_v61 = vpop.permute.xlu1 %505 }
  0xb5   : > { %v557_v54 = vsel %vm547_vm4, %v531_v28, %v506_v61  ;;  %v460_v23 = vpop.permute.xlu0 %459 }
  0xb6   : > { %2572 = vmatprep.mubr.msk.bf16.mxu0 %vm893_vm5, %v557_v54  ;;  %1873 = vperm.xlu1 %2750, %v1841_v18   ;;  %v533_v25 = vsel %vm521_vm3, %v3036_v12, %v460_v23  ;;  %v1847_v12 = vsel %vm1801_vm0, 1, %v2859_v63  ;;  %v1787_v18 = vld [vmem:[%s3875_s4 + $0x98] sm:$0xff] }
  0xb7   : > { %1876 = vperm.xlu0 %2749, %v1842_v8   ;;  %v1854_v8 = vsel %vm1808_vm10, 1, %v2859_v63  ;;  %vm1810_vm12 = vcmp.gt.f32.partialorder %v1787_v18, 0.5 }
  0xb8   : > { %v816_v10 = vpop.permute.xlu1 %815 }
  0xb9   : > { %v865_v58 = vsel %vm547_vm4, %v840_v40, %v816_v10  ;;  %v771_v30 = vpop.permute.xlu0 %770  ;;  %v1856_v10 = vsel %vm1810_vm12, 1, %v2859_v63 }
  0xba   : > { %2544 = vmatprep.mubr.msk.bf16.mxu1 %vm893_vm5, %v865_v58  ;;  %1879 = vperm.xlu1 %2750, %v1843_v42   ;;  %v842_v11 = vsel %vm521_vm3, %v3032_v5, %v771_v30  ;;  %v1781_v5 = vld [vmem:[%s3875_s4 + $0x68] sm:$0xff]  ;;  %v1790_v58 = vld [vmem:[%s3875_s4 + $0xb0] sm:$0xff]  ;;  %v1857_v30 = vsel %vm1811_vm13, 1, %v2859_v63 }
  0xbb   : > { %1882 = vperm.xlu0 %2749, %v1844_v0   ;;  %vm1804_vm6 = vcmp.gt.f32.partialorder %v1781_v5, 0.5  ;;  %vm1813_vm15 = vcmp.gt.f32.partialorder %v1790_v58, 0.5 }
  0xbc   : > { %v818_v14 = vpop.permute.xlu1 %817  ;;  %v1850_v13 = vsel %vm1804_vm6, 1, %v2859_v63 }
  0xbd   : > { %v867_v6 = vsel %vm547_vm4, %v842_v11, %v818_v14  ;;  %v508_v35 = vpop.permute.xlu0 %507 }
  0xbe   : > { %v559_v44 = vsel %vm547_vm4, %v533_v25, %v508_v35  ;;  %2545 = vmatmul.mubr.msk.bf16.gmra.mrb[8].mxu1 %vm893_vm5, %v867_v6  ;;  %1885 = vperm.xlu1 %2750, %v1845_v51  }
  0xbf   : > { %2573 = vmatmul.mubr.msk.bf16.gmra.mrb[8].mxu0 %vm893_vm5, %v559_v44  ;;  %1888 = vperm.xlu0 %2749, %v1846_v3   ;;  %v1859_v3 = vsel %vm1813_vm15, 1, %v2859_v63 }
  0xc0   : > { %v1400_v43 = vpop.permute.xlu1 %1399 }
  0xc1   : > { %v773_v46 = vpop.permute.xlu0 %772  ;;  %v1471_v32 = vsel %vm521_vm3, %v3071_v39, %v1400_v43  ;;  %v1853_v39 = vsel %vm1807_vm9, 1, %v2859_v63 }
  0xc2   : > { %1891 = vperm.xlu1 %2750, %v1847_v12   ;;  %v844_v21 = vsel %vm521_vm3, %v3056_v26, %v773_v46  ;;  %v1851_v26 = vsel %vm1805_vm7, 1, %v2859_v63 }
  0xc3   : > { %1894 = vperm.xlu0 %2749, %v1848_v16  }
  0xc4   : > { %v820_v34 = vpop.permute.xlu1 %819 }
  0xc5   : > { %v869_v57 = vsel %vm547_vm4, %v844_v21, %v820_v34  ;;  %v775_v9 = vpop.permute.xlu0 %774  ;;  %v2392_v21 = vcombine.low %v3078_v45, %v3078_v45 }
  0xc6   : > { %2548 = vmatprep.mubr.msk.bf16.mxu1 %vm893_vm5, %v869_v57  ;;  %1897 = vperm.xlu1 %2750, %v1849_v22   ;;  %v846_v54 = vsel %vm521_vm3, %v3089_v53, %v775_v9  ;;  %v1855_v53 = vsel %vm1809_vm11, 1, %v2859_v63 }
  0xc7   : > { %1900 = vperm.xlu0 %2749, %v1850_v13  }
  0xc8   : > { %v1447_v60 = vpop.permute.xlu1 %1446 }
  0xc9   : > { %v1496_v55 = vsel %vm547_vm4, %v1471_v32, %v1447_v60  ;;  %v1402_v24 = vpop.permute.xlu0 %1401  ;;  %v2796_v32 = vld [vmem:[%s2938_s8 + $0x30] sm:$0xff]  }
  0xca   : > { %2592 = vmatprep.mubr.msk.bf16.mxu0 %vm893_vm5, %v1496_v55  ;;  %1903 = vperm.xlu1 %2750, %v1851_v26   ;;  %v1473_v28 = vsel %vm521_vm3, %v3085_v50, %v1402_v24  ;;  %v1789_v50 = vld [vmem:[%s3875_s4 + $0xa8] sm:$0xff] }
  0xcb   : > { %1906 = vperm.xlu0 %2749, %v1852_v4   ;;  %vm1812_vm14 = vcmp.gt.f32.partialorder %v1789_v50, 0.5 }
  0xcc   : > { %v1449_v61 = vpop.permute.xlu1 %1448  ;;  %v1858_v51 = vsel %vm1812_vm14, 1, %v2859_v63 }
  0xcd   : > { %v1498_v23 = vsel %vm547_vm4, %v1473_v28, %v1449_v61  ;;  %v822_v2 = vpop.permute.xlu0 %821  ;;  %v3906_v28 = vld [vmem:[#allocation5_spill] sm:$0xff] }
  0xce   : > { %v871_v42 = vsel %vm547_vm4, %v846_v54, %v822_v2  ;;  %2593 = vmatmul.mubr.msk.bf16.vlgmr.msra.gmra.mrb[0].mxu0 %vm893_vm5, %v1498_v23  ;;  %1909 = vperm.xlu1 %2750, %v1853_v39   ;;  %v3907_v54 = vld [vmem:[#allocation6_spill] sm:$0xff] }
  0xcf   : > { %2549 = vmatmul.mubr.msk.bf16.gmra.mrb[12].mxu1 %vm893_vm5, %v871_v42  ;;  %1912 = vperm.xlu0 %2749, %v1854_v8  }
  0xd0   : > { %v1404_v40 = vpop.permute.xlu1 %1403 }
  0xd1   : > { %v777_v0 = vpop.permute.xlu0 %776  ;;  %v1475_v25 = vsel %vm521_vm3, %v3127_v19, %v1404_v40 }
  0xd2   : > { %1915 = vperm.xlu1 %2750, %v1855_v53   ;;  %v848_v52 = vsel %vm521_vm3, %v3114_v15, %v777_v0  ;;  %v3908_v53 = vld [vmem:[#allocation7_spill] sm:$0xff] }
  0xd3   : > { %1918 = vperm.xlu0 %2749, %v1856_v10  }
  0xd4   : > { %v824_v1 = vpop.permute.xlu1 %823 }
  0xd5   : > { %v873_v11 = vsel %vm547_vm4, %v848_v52, %v824_v1  ;;  %v779_v14 = vpop.permute.xlu0 %778 }
  0xd6   : > { %2552 = vmatprep.mubr.msk.bf16.mxu1 %vm893_vm5, %v873_v11  ;;  %1921 = vperm.xlu1 %2750, %v1857_v30   ;;  %v850_v5 = vsel %vm521_vm3, %v3153_v48, %v779_v14  ;;  %v3909_v30 = vld [vmem:[#allocation8_spill] sm:$0xff] }
  0xd7   : > { %1924 = vperm.xlu0 %2749, %v1858_v51  }
  0xd8   : > { %v1451_v6 = vpop.permute.xlu1 %1450 }
  0xd9   : > { %v1500_v35 = vsel %vm547_vm4, %v1475_v25, %v1451_v6  ;;  %v1406_v15 = vpop.permute.xlu0 %1405 }
  0xda   : > { %2596 = vmatprep.mubr.msk.bf16.mxu0 %vm893_vm5, %v1500_v35  ;;  %1927 = vperm.xlu1 %2750, %v1859_v3   ;;  %v1477_v47 = vsel %vm521_vm3, %v3147_v38, %v1406_v15 }
  0xdc   : > { %v1453_v44 = vpop.permute.xlu1 %1452 }
  0xdd   : > { %v1502_v63 = vsel %vm547_vm4, %v1477_v47, %v1453_v44  ;;  %v826_v12 = vpop.permute.xlu0 %825 }
  0xde   : > { %v875_v43 = vsel %vm547_vm4, %v850_v5, %v826_v12  ;;  %2597 = vmatmul.mubr.msk.bf16.gmra.mrb[4].mxu0 %vm893_vm5, %v1502_v63 }
  0xdf   : > { %2553 = vmatmul.mubr.msk.bf16.gmra.mrb[16].mxu1 %vm893_vm5, %v875_v43 }
  0xe0   : > { %v1408_v19 = vpop.permute.xlu1 %1407 }
  0xe1   : > { %v781_v16 = vpop.permute.xlu0 %780  ;;  %v1479_v48 = vsel %vm521_vm3, %v3237_v29, %v1408_v19  ;;  %v3910_v19 = vld [vmem:[#allocation3_spill] sm:$0xff] }
  0xe2   : > { %v852_v46 = vsel %vm521_vm3, %v3061_v33, %v781_v16  ;;  %v2460_v16 = vcombine.low %v3910_v19, %v3910_v19 }
  0xe4   : > { %v828_v20 = vpop.permute.xlu1 %827 }
  0xe5   : > { %v877_v38 = vsel %vm547_vm4, %v852_v46, %v828_v20  ;;  %v783_v7 = vpop.permute.xlu0 %782  ;;  %v3911_v46 = vld [vmem:[#allocation4_spill] sm:$0xff] }
  0xe6   : > { %2556 = vmatprep.mubr.msk.bf16.mxu1 %vm893_vm5, %v877_v38  ;;  %v855_v9 = vsel %vm521_vm3, %v2392_v21, %v783_v7  ;;  %v2355_v20 = vcombine.low %v3911_v46, %v3911_v46 }
  0xe8   : > { %v1455_v22 = vpop.permute.xlu1 %1454 }
  0xe9   : > { %v1504_v34 = vsel %vm547_vm4, %v1479_v48, %v1455_v22  ;;  %v1410_v13 = vpop.permute.xlu0 %1409 }
  0xea   : > { %2600 = vmatprep.mubr.msk.bf16.mxu0 %vm893_vm5, %v1504_v34  ;;  %v1481_v33 = vsel %vm521_vm3, %v3281_v27, %v1410_v13 }
  0xec   : > { %v1457_v57 = vpop.permute.xlu1 %1456 }
  0xed   : > { %v1506_v56 = vsel %vm547_vm4, %v1481_v33, %v1457_v57  ;;  %v830_v31 = vpop.permute.xlu0 %829 }
  0xee   : > { %v879_v29 = vsel %vm547_vm4, %v855_v9, %v830_v31  ;;  %2601 = vmatmul.mubr.msk.bf16.gmra.mrb[8].mxu0 %vm893_vm5, %v1506_v56 }
  0xef   : > { %2557 = vmatmul.mubr.msk.bf16.gmra.mrb[20].mxu1 %vm893_vm5, %v879_v29 }
  0xf0   : > { %v1412_v45 = vpop.permute.xlu1 %1411 }
  0xf1   : > { %v462_v26 = vpop.permute.xlu0 %461  ;;  %v1483_v24 = vsel %vm521_vm3, %v3301_v36, %v1412_v45 }
  0xf2   : > { %v535_v60 = vsel %vm521_vm3, %v2796_v32, %v462_v26 }
  0xf4   : > { %v510_v4 = vpop.permute.xlu1 %509 }
  0xf5   : > { %v561_v27 = vsel %vm547_vm4, %v535_v60, %v510_v4  ;;  %v464_v55 = vpop.permute.xlu0 %463 }
  0xf6   : > { %2576 = vmatprep.mubr.msk.bf16.mxu1 %vm893_vm5, %v561_v27  ;;  %v537_v23 = vsel %vm521_vm3, %v3907_v54, %v464_v55 }
  0xf8   : > { %v1459_v17 = vpop.permute.xlu1 %1458 }
  0xf9   : > { %v1508_v18 = vsel %vm547_vm4, %v1483_v24, %v1459_v17  ;;  %v1414_v39 = vpop.permute.xlu0 %1413  ;;  %v3688_v24 = vld [vmem:[%s3873_s2] ss:$0 sm:$0xff] }
  0xfa   : > { %2604 = vmatprep.mubr.msk.bf16.mxu0 %vm893_vm5, %v1508_v18  ;;  %v1485_v61 = vsel %vm521_vm3, %v3906_v28, %v1414_v39 }
  0xfc   : > { %v1461_v8 = vpop.permute.xlu1 %1460 }
  0xfd   : > { %v1510_v2 = vsel %vm547_vm4, %v1485_v61, %v1461_v8  ;;  %v512_v41 = vpop.permute.xlu0 %511  ;;  %v3694_v8 = vld [vmem:[%s3874_s3] ss:$0 sm:$0xff] }
  0xfe   : > { %v563_v42 = vsel %vm547_vm4, %v537_v23, %v512_v41  ;;  %2605 = vmatmul.mubr.msk.bf16.gmra.mrb[12].mxu0 %vm893_vm5, %v1510_v2 }
  0xff   : > { %2577 = vmatmul.mubr.msk.bf16.vlgmr.msra.gmra.mrb[12].mxu1 %vm893_vm5, %v563_v42 }
 0x100   : > { %v1416_v36 = vpop.permute.xlu1 %1415 }
 0x101   : > { %v466_v50 = vpop.permute.xlu0 %465  ;;  %v1487_v52 = vsel %vm521_vm3, %v3909_v30, %v1416_v36 }
 0x102   : > { %v539_v40 = vsel %vm521_vm3, %v3908_v53, %v466_v50 }
 0x104   : > { %v514_v10 = vpop.permute.xlu1 %513 }
 0x105   : > { %v565_v0 = vsel %vm547_vm4, %v539_v40, %v514_v10  ;;  %v468_v58 = vpop.permute.xlu0 %467 }
 0x106   : > { %2580 = vmatprep.mubr.msk.bf16.mxu1 %vm893_vm5, %v565_v0  ;;  %v541_v25 = vsel %vm521_vm3, %v3362_v37, %v468_v58 }
 0x108   : > { %v1463_v1 = vpop.permute.xlu1 %1462 }
 0x109   : > { %v1512_v51 = vsel %vm547_vm4, %v1487_v52, %v1463_v1  ;;  %v1418_v11 = vpop.permute.xlu0 %1417 }
 0x10a   : > { %2608 = vmatprep.mubr.msk.bf16.mxu0 %vm893_vm5, %v1512_v51  ;;  %v1489_v14 = vsel %vm521_vm3, %v3358_v59, %v1418_v11 }
 0x10c   : > { %v1465_v3 = vpop.permute.xlu1 %1464 }
 0x10d   : > { %v1514_v6 = vsel %vm547_vm4, %v1489_v14, %v1465_v3  ;;  %v516_v35 = vpop.permute.xlu0 %515 }
 0x10e   : > { %v567_v15 = vsel %vm547_vm4, %v541_v25, %v516_v35  ;;  %2609 = vmatmul.mubr.msk.bf16.gmra.mrb[16].mxu0 %vm893_vm5, %v1514_v6 }
 0x10f   : > { %2581 = vmatmul.mubr.msk.bf16.gmra.mrb[16].mxu1 %vm893_vm5, %v567_v15 }
 0x110   : > { %v1420_v47 = vpop.permute.xlu1 %1419 }
 0x111   : > { %v470_v44 = vpop.permute.xlu0 %469  ;;  %v1491_v37 = vsel %vm521_vm3, %v3156_v49, %v1420_v47 }
 0x112   : > { %v543_v5 = vsel %vm521_vm3, %v3162_v62, %v470_v44 }
 0x114   : > { %v518_v63 = vpop.permute.xlu1 %517 }
 0x115   : > { %v569_v59 = vsel %vm547_vm4, %v543_v5, %v518_v63  ;;  %v472_v12 = vpop.permute.xlu0 %471 }
 0x116   : > { %2584 = vmatprep.mubr.msk.bf16.mxu1 %vm893_vm5, %v569_v59  ;;  %v546_v22 = vsel %vm521_vm3, %v2355_v20, %v472_v12 }
 0x118   : > { %v1467_v43 = vpop.permute.xlu1 %1466 }
 0x119   : > { %v1516_v38 = vsel %vm547_vm4, %v1491_v37, %v1467_v43  ;;  %v1422_v7 = vpop.permute.xlu0 %1421 }
 0x11a   : > { %2612 = vmatprep.mubr.msk.bf16.mxu0 %vm893_vm5, %v1516_v38  ;;  %v1494_v62 = vsel %vm521_vm3, %v2460_v16, %v1422_v7 }
 0x11c   : > { %v1469_v48 = vpop.permute.xlu1 %1468 }
 0x11d   : > { %v1518_v21 = vsel %vm547_vm4, %v1494_v62, %v1469_v48  ;;  %v520_v49 = vpop.permute.xlu0 %519 }
 0x11e   : > { %v571_v34 = vsel %vm547_vm4, %v546_v22, %v520_v49  ;;  %2613 = vmatmul.mubr.msk.bf16.gmra.mrb[20].mxu0 %vm893_vm5, %v1518_v21 }
 0x11f   : > { %2585 = vmatmul.mubr.msk.bf16.gmra.mrb[20].mxu1 %vm893_vm5, %v571_v34 }
 0x12d   : > { %v1865_v27 = vpop.permute.xlu1 %1864 }
 0x12e   : > { %v1862_v55 = vpop.permute.xlu0 %1861  ;;  %vm1930_vm1 = vcmp.eq.s32.totalorder %v1865_v27, 1 }
 0x12f   : > { %vm1929_vm5 = vcmp.eq.s32.totalorder %v1862_v55, 1 }
 0x131   : > { %v1868_v41 = vpop.permute.xlu1 %1867 }
 0x132   : > { %v1871_v40 = vpop.permute.xlu0 %1870  ;;  %vm1931_vm4 = vcmp.eq.s32.totalorder %v1868_v41, 1 }
 0x133   : > { %vm1932_vm0 = vcmp.eq.s32.totalorder %v1871_v40, 1 }
 0x135   : > { %v1874_v35 = vpop.permute.xlu1 %1873 }
 0x136   : > { %v1877_v5 = vpop.permute.xlu0 %1876  ;;  %vm1933_vm6 = vcmp.eq.s32.totalorder %v1874_v35, 1 }
 0x137   : > { %vm1934_vm8 = vcmp.eq.s32.totalorder %v1877_v5, 1 }
 0x139   : > { %v1880_v46 = vpop.permute.xlu1 %1879 }
 0x13a   : > { %vm1935_vm2 = vcmp.eq.s32.totalorder %v1880_v46, 1  ;;  %v1883_v21 = vpop.permute.xlu0 %1882 }
 0x13b   : > { %vm1936_vm7 = vcmp.eq.s32.totalorder %v1883_v21, 1 }
 0x13e   : > { %v1889_v27 = vpop.permute.xlu0 %1888 }
 0x13f   : > { %vm1938_vm12 = vcmp.eq.s32.totalorder %v1889_v27, 1 }
 0x173   : > { %v2538_v13 = vpop.f32.mrb[0].mxu1 }
 0x174   : > { %v956_v33 = vpop.f32.mrb[1].mxu1 }
 0x175   : > { %v2539_v57 = vpop.f32.mrb[2].mxu1 }
 0x176   : > { %v959_v9 = vpop.f32.mrb[3].mxu1 }
 0x181   : > { %v2542_v56 = vpop.f32.mrb[4].mxu1 }
 0x182   : > { %v972_v31 = vpop.f32.mrb[5].mxu1 }
 0x183   : > { %v2543_v29 = vpop.f32.mrb[6].mxu1 }
 0x184   : > { %v975_v45 = vpop.f32.mrb[7].mxu1 }
 0x191   : > { %v3677_v26 = vpop.f32.mrb[8].mxu1 }
 0x192   : > { %v3679_v32 = vpop.f32.mrb[9].mxu1 }
 0x193   : > { %v3681_v60 = vpop.f32.mrb[10].mxu1 }
 0x194   : > { %v3683_v4 = vpop.f32.mrb[11].mxu1 }
 0x1a1   : > { %v2594_v17 = vpop.f32.mrb[0].mxu0 }
 0x1a2   : > { %v2620_v18 = vadd.f32 %v2594_v17, %v2538_v13  ;;  %v1593_v39 = vpop.f32.mrb[1].mxu0 }
 0x1a3   : > { %v2621_v28 = vadd.f32 %v1593_v39, %v956_v33  ;;  %v2595_v61 = vpop.f32.mrb[2].mxu0 }
 0x1a4   : > { %v1718_v54 = vmul.f32 %v2620_v18, %v3688_v24  ;;  %v2622_v23 = vadd.f32 %v2595_v61, %v2539_v57  ;;  %v1596_v2 = vpop.f32.mrb[3].mxu0 }
 0x1a5   : > { %v1716_v42 = vmul.f32 %v2621_v28, %v3688_v24  ;;  %v2623_v36 = vadd.f32 %v1596_v2, %v959_v9 }
 0x1a6   : > { %v1719_v50 = vmul.f32 %v2622_v23, %v3688_v24  ;;  %v1747_v53 = vadd.f32 %v3694_v8, %v1718_v54 }
 0x1a7   : > { %v1717_v10 = vmul.f32 %v2623_v36, %v3688_v24  ;;  %v1745_v0 = vadd.f32 %v3694_v8, %v1716_v42 }
 0x1a8   : > { %v1816_v58 = vmax.f32 %v1747_v53, 0.0  ;;  %v1748_v30 = vadd.f32 %v3694_v8, %v1719_v50 }
 0x1a9   : > { %v1746_v52 = vadd.f32 %v3694_v8, %v1717_v10  ;;  %v1814_v1 = vmax.f32 %v1745_v0, 0.0 }
 0x1aa   : > { %v1954_v51 = vsel %vm1931_vm4, %v1816_v58, 0.0  ;;  %v1817_v11 = vmax.f32 %v1748_v30, 0.0 }
 0x1ab   : > { %v1815_v14 = vmax.f32 %v1746_v52, 0.0  ;;  %v1952_v3 = vsel %vm1929_vm5, %v1814_v1, 0.0  ;;  %1977 = vst.msk [vmem:[%s3704_s18 + $0x10] sm:$0xff] %vm521_vm3, %v1954_v51 }
 0x1ac   : > { %1975 = vst.msk [vmem:[%s3704_s18] sm:$0xff] %vm521_vm3, %v1952_v3  ;;  %v1955_v25 = vsel %vm1932_vm0, %v1817_v11, 0.0 }
 0x1ad   : > { %v1953_v6 = vsel %vm1930_vm1, %v1815_v14, 0.0  ;;  %1978 = vst.msk [vmem:[%s3704_s18 + $0x18] sm:$0xff] %vm521_vm3, %v1955_v25 }
 0x1ae   : > { %1976 = vst.msk [vmem:[%s3704_s18 + $0x8] sm:$0xff] %vm521_vm3, %v1953_v6 }
 0x1b1   : > { %v2598_v15 = vpop.f32.mrb[4].mxu0 }
 0x1b2   : > { %v2624_v47 = vadd.f32 %v2598_v15, %v2542_v56  ;;  %v1609_v44 = vpop.f32.mrb[5].mxu0 }
 0x1b3   : > { %v2625_v63 = vadd.f32 %v1609_v44, %v972_v31  ;;  %v2599_v59 = vpop.f32.mrb[6].mxu0 }
 0x1b4   : > { %v1722_v12 = vmul.f32 %v2624_v47, %v3688_v24  ;;  %v2626_v37 = vadd.f32 %v2599_v59, %v2543_v29  ;;  %v1612_v43 = vpop.f32.mrb[7].mxu0  ;;  %v1886_v29 = vpop.permute.xlu1 %1885 }
 0x1b5   : > { %v1720_v19 = vmul.f32 %v2625_v63, %v3688_v24  ;;  %v2627_v16 = vadd.f32 %v1612_v43, %v975_v45  ;;  %vm1937_vm10 = vcmp.eq.s32.totalorder %v1886_v29, 1 }
 0x1b6   : > { %v1751_v20 = vadd.f32 %v3694_v8, %v1722_v12  ;;  %v1723_v38 = vmul.f32 %v2626_v37, %v3688_v24 }
 0x1b7   : > { %v1749_v7 = vadd.f32 %v3694_v8, %v1720_v19  ;;  %v1721_v62 = vmul.f32 %v2627_v16, %v3688_v24 }
 0x1b8   : > { %v1820_v48 = vmax.f32 %v1751_v20, 0.0  ;;  %v1752_v22 = vadd.f32 %v3694_v8, %v1723_v38  ;;  %v1892_v41 = vpop.permute.xlu1 %1891 }
 0x1b9   : > { %v1818_v49 = vmax.f32 %v1749_v7, 0.0  ;;  %v1750_v34 = vadd.f32 %v3694_v8, %v1721_v62  ;;  %vm1939_vm9 = vcmp.eq.s32.totalorder %v1892_v41, 1 }
 0x1ba   : > { %v1958_v13 = vsel %vm1935_vm2, %v1820_v48, 0.0  ;;  %v1821_v33 = vmax.f32 %v1752_v22, 0.0 }
 0x1bb   : > { %1981 = vst.msk [vmem:[%s3704_s18 + $0x30] sm:$0xff] %vm521_vm3, %v1958_v13  ;;  %v1956_v57 = vsel %vm1933_vm6, %v1818_v49, 0.0  ;;  %v1819_v9 = vmax.f32 %v1750_v34, 0.0 }
 0x1bc   : > { %1979 = vst.msk [vmem:[%s3704_s18 + $0x20] sm:$0xff] %vm521_vm3, %v1956_v57  ;;  %v1959_v56 = vsel %vm1936_vm7, %v1821_v33, 0.0  ;;  %v1898_v51 = vpop.permute.xlu1 %1897 }
 0x1bd   : > { %v1957_v31 = vsel %vm1934_vm8, %v1819_v9, 0.0  ;;  %1982 = vst.msk [vmem:[%s3704_s18 + $0x38] sm:$0xff] %vm521_vm3, %v1959_v56  ;;  %vm1941_vm14 = vcmp.eq.s32.totalorder %v1898_v51, 1 }
 0x1be   : > { %1980 = vst.msk [vmem:[%s3704_s18 + $0x28] sm:$0xff] %vm521_vm3, %v1957_v31 }
 0x1c0   : > { %v1904_v38 = vpop.permute.xlu1 %1903 }
 0x1c1   : > { %v2602_v45 = vpop.f32.mrb[8].mxu0  ;;  %vm1943_vm13 = vcmp.eq.s32.totalorder %v1904_v38, 1 }
 0x1c2   : > { %v2628_v55 = vadd.f32 %v2602_v45, %v3677_v26  ;;  %v1625_v17 = vpop.f32.mrb[9].mxu0 }
 0x1c3   : > { %v2629_v18 = vadd.f32 %v1625_v17, %v3679_v32  ;;  %v2603_v39 = vpop.f32.mrb[10].mxu0 }
 0x1c4   : > { %v1726_v28 = vmul.f32 %v2628_v55, %v3688_v24  ;;  %v2630_v61 = vadd.f32 %v2603_v39, %v3681_v60  ;;  %v1628_v54 = vpop.f32.mrb[11].mxu0  ;;  %v1895_v60 = vpop.permute.xlu0 %1894 }
 0x1c5   : > { %v1724_v23 = vmul.f32 %v2629_v18, %v3688_v24  ;;  %v2631_v2 = vadd.f32 %v1628_v54, %v3683_v4  ;;  %vm1940_vm11 = vcmp.eq.s32.totalorder %v1895_v60, 1  ;;  %v1910_v56 = vpop.permute.xlu1 %1909 }
 0x1c6   : > { %v1755_v42 = vadd.f32 %v3694_v8, %v1726_v28  ;;  %v1727_v36 = vmul.f32 %v2630_v61, %v3688_v24  ;;  %vm1945_vm0 = vcmp.eq.s32.totalorder %v1910_v56, 1 }
 0x1c7   : > { %v1753_v26 = vadd.f32 %v3694_v8, %v1724_v23  ;;  %v1725_v32 = vmul.f32 %v2631_v2, %v3688_v24 }
 0x1c8   : > { %v1824_v50 = vmax.f32 %v1755_v42, 0.0  ;;  %v1756_v53 = vadd.f32 %v3694_v8, %v1727_v36  ;;  %v1901_v5 = vpop.permute.xlu0 %1900 }
 0x1c9   : > { %v1822_v4 = vmax.f32 %v1753_v26, 0.0  ;;  %v1754_v40 = vadd.f32 %v3694_v8, %v1725_v32  ;;  %vm1942_vm4 = vcmp.eq.s32.totalorder %v1901_v5, 1 }
 0x1ca   : > { %v1962_v10 = vsel %vm1939_vm9, %v1824_v50, 0.0  ;;  %v1825_v0 = vmax.f32 %v1756_v53, 0.0  ;;  %v1916_v50 = vpop.permute.xlu1 %1915 }
 0x1cb   : > { %1985 = vst.msk [vmem:[%s3704_s18 + $0x50] sm:$0xff] %vm521_vm3, %v1962_v10  ;;  %v1960_v58 = vsel %vm1937_vm10, %v1822_v4, 0.0  ;;  %v1823_v30 = vmax.f32 %v1754_v40, 0.0  ;;  %vm1947_vm5 = vcmp.eq.s32.totalorder %v1916_v50, 1 }
 0x1cc   : > { %1983 = vst.msk [vmem:[%s3704_s18 + $0x40] sm:$0xff] %vm521_vm3, %v1960_v58  ;;  %v1963_v52 = vsel %vm1940_vm11, %v1825_v0, 0.0  ;;  %v1907_v21 = vpop.permute.xlu0 %1906 }
 0x1cd   : > { %1986 = vst.msk [vmem:[%s3704_s18 + $0x58] sm:$0xff] %vm521_vm3, %v1963_v52  ;;  %v1961_v1 = vsel %vm1938_vm12, %v1823_v30, 0.0  ;;  %vm1944_vm15 = vcmp.eq.s32.totalorder %v1907_v21, 1 }
 0x1ce   : > { %1984 = vst.msk [vmem:[%s3704_s18 + $0x48] sm:$0xff] %vm521_vm3, %v1961_v1 }
 0x1d0   : > { %v1913_v61 = vpop.permute.xlu0 %1912 }
 0x1d1   : > { %v2606_v11 = vpop.f32.mrb[12].mxu0  ;;  %vm1946_vm2 = vcmp.eq.s32.totalorder %v1913_v61, 1 }
 0x1d2   : > { %v2578_v14 = vpop.f32.mrb[12].mxu1  ;;  %v1641_v3 = vpop.f32.mrb[13].mxu0 }
 0x1d3   : > { %v2632_v25 = vadd.f32 %v2606_v11, %v2578_v14  ;;  %v1168_v6 = vpop.f32.mrb[13].mxu1  ;;  %v2607_v35 = vpop.f32.mrb[14].mxu0 }
 0x1d4   : > { %v2633_v15 = vadd.f32 %v1641_v3, %v1168_v6  ;;  %v2579_v47 = vpop.f32.mrb[14].mxu1  ;;  %v1644_v44 = vpop.f32.mrb[15].mxu0 }
 0x1d5   : > { %v1730_v63 = vmul.f32 %v2632_v25, %v3688_v24  ;;  %v2634_v59 = vadd.f32 %v2607_v35, %v2579_v47  ;;  %v1171_v12 = vpop.f32.mrb[15].mxu1  ;;  %v1919_v0 = vpop.permute.xlu0 %1918 }
 0x1d6   : > { %v1728_v37 = vmul.f32 %v2633_v15, %v3688_v24  ;;  %v2635_v43 = vadd.f32 %v1644_v44, %v1171_v12  ;;  %vm1948_vm1 = vcmp.eq.s32.totalorder %v1919_v0, 1  ;;  %v1922_v14 = vpop.permute.xlu1 %1921 }
 0x1d7   : > { %v1759_v19 = vadd.f32 %v3694_v8, %v1730_v63  ;;  %v1731_v16 = vmul.f32 %v2634_v59, %v3688_v24  ;;  %vm1949_vm7 = vcmp.eq.s32.totalorder %v1922_v14, 1 }
 0x1d8   : > { %v1757_v46 = vadd.f32 %v3694_v8, %v1728_v37  ;;  %v1729_v20 = vmul.f32 %v2635_v43, %v3688_v24 }
 0x1d9   : > { %v1828_v7 = vmax.f32 %v1759_v19, 0.0  ;;  %v1760_v62 = vadd.f32 %v3694_v8, %v1731_v16 }
 0x1da   : > { %v1826_v48 = vmax.f32 %v1757_v46, 0.0  ;;  %v1758_v22 = vadd.f32 %v3694_v8, %v1729_v20  ;;  %v1928_v19 = vpop.permute.xlu1 %1927 }
 0x1db   : > { %v1966_v49 = vsel %vm1943_vm13, %v1828_v7, 0.0  ;;  %v1829_v34 = vmax.f32 %v1760_v62, 0.0  ;;  %vm1951_vm6 = vcmp.eq.s32.totalorder %v1928_v19, 1  ;;  %v1925_v7 = vpop.permute.xlu0 %1924 }
 0x1dc   : > { %1989 = vst.msk [vmem:[%s3704_s18 + $0x70] sm:$0xff] %vm521_vm3, %v1966_v49  ;;  %v1964_v13 = vsel %vm1941_vm14, %v1826_v48, 0.0  ;;  %v1827_v33 = vmax.f32 %v1758_v22, 0.0  ;;  %vm1950_vm8 = vcmp.eq.s32.totalorder %v1925_v7, 1 }
 0x1dd   : > { %1987 = vst.msk [vmem:[%s3704_s18 + $0x60] sm:$0xff] %vm521_vm3, %v1964_v13  ;;  %v1967_v57 = vsel %vm1944_vm15, %v1829_v34, 0.0 }
 0x1de   : > { %1990 = vst.msk [vmem:[%s3704_s18 + $0x78] sm:$0xff] %vm521_vm3, %v1967_v57  ;;  %v1965_v9 = vsel %vm1942_vm4, %v1827_v33, 0.0 }
 0x1df   : > { %1988 = vst.msk [vmem:[%s3704_s18 + $0x68] sm:$0xff] %vm521_vm3, %v1965_v9 }
 0x1e1   : > { %v2610_v31 = vpop.f32.mrb[16].mxu0 }
 0x1e2   : > { %v2582_v29 = vpop.f32.mrb[16].mxu1  ;;  %v1657_v45 = vpop.f32.mrb[17].mxu0 }
 0x1e3   : > { %v2636_v27 = vadd.f32 %v2610_v31, %v2582_v29  ;;  %v1184_v55 = vpop.f32.mrb[17].mxu1  ;;  %v2611_v17 = vpop.f32.mrb[18].mxu0 }
 0x1e4   : > { %v2637_v18 = vadd.f32 %v1657_v45, %v1184_v55  ;;  %v2583_v39 = vpop.f32.mrb[18].mxu1  ;;  %v1660_v28 = vpop.f32.mrb[19].mxu0 }
 0x1e5   : > { %v1734_v54 = vmul.f32 %v2636_v27, %v3688_v24  ;;  %v2638_v23 = vadd.f32 %v2611_v17, %v2583_v39  ;;  %v1187_v2 = vpop.f32.mrb[19].mxu1 }
 0x1e6   : > { %v1732_v41 = vmul.f32 %v2637_v18, %v3688_v24  ;;  %v2639_v42 = vadd.f32 %v1660_v28, %v1187_v2 }
 0x1e7   : > { %v1763_v36 = vadd.f32 %v3694_v8, %v1734_v54  ;;  %v1735_v26 = vmul.f32 %v2638_v23, %v3688_v24 }
 0x1e8   : > { %v1761_v32 = vadd.f32 %v3694_v8, %v1732_v41  ;;  %v1733_v60 = vmul.f32 %v2639_v42, %v3688_v24 }
 0x1e9   : > { %v1832_v53 = vmax.f32 %v1763_v36, 0.0  ;;  %v1764_v4 = vadd.f32 %v3694_v8, %v1735_v26 }
 0x1ea   : > { %v1830_v40 = vmax.f32 %v1761_v32, 0.0  ;;  %v1762_v10 = vadd.f32 %v3694_v8, %v1733_v60 }
 0x1eb   : > { %v1970_v58 = vsel %vm1947_vm5, %v1832_v53, 0.0  ;;  %v1833_v30 = vmax.f32 %v1764_v4, 0.0 }
 0x1ec   : > { %1993 = vst.msk [vmem:[%s3704_s18 + $0x90] sm:$0xff] %vm521_vm3, %v1970_v58  ;;  %v1968_v52 = vsel %vm1945_vm0, %v1830_v40, 0.0  ;;  %v1831_v1 = vmax.f32 %v1762_v10, 0.0 }
 0x1ed   : > { %1991 = vst.msk [vmem:[%s3704_s18 + $0x80] sm:$0xff] %vm521_vm3, %v1968_v52  ;;  %v1971_v51 = vsel %vm1948_vm1, %v1833_v30, 0.0 }
 0x1ee   : > { %1994 = vst.msk [vmem:[%s3704_s18 + $0x98] sm:$0xff] %vm521_vm3, %v1971_v51  ;;  %v1969_v11 = vsel %vm1946_vm2, %v1831_v1, 0.0 }
 0x1ef   : > { %1992 = vst.msk [vmem:[%s3704_s18 + $0x88] sm:$0xff] %vm521_vm3, %v1969_v11 }
 0x1f1   : > { %v2614_v3 = vpop.f32.mrb[20].mxu0 }
 0x1f2   : > { %v2586_v25 = vpop.f32.mrb[20].mxu1  ;;  %v1673_v6 = vpop.f32.mrb[21].mxu0 }
 0x1f3   : > { %v2640_v35 = vadd.f32 %v2614_v3, %v2586_v25  ;;  %v1200_v15 = vpop.f32.mrb[21].mxu1  ;;  %v2615_v47 = vpop.f32.mrb[22].mxu0 }
 0x1f4   : > { %v2641_v44 = vadd.f32 %v1673_v6, %v1200_v15  ;;  %v2587_v5 = vpop.f32.mrb[22].mxu1  ;;  %v1676_v63 = vpop.f32.mrb[23].mxu0 }
 0x1f5   : > { %v1738_v59 = vmul.f32 %v2640_v35, %v3688_v24  ;;  %v1203_v12 = vpop.f32.mrb[23].mxu1 }
 0x1f6   : > { %v1736_v37 = vmul.f32 %v2641_v44, %v3688_v24  ;;  %v2642_v43 = vadd.f32 %v1676_v63, %v1203_v12 }
 0x1f7   : > { %v1767_v16 = vadd.f32 %v3694_v8, %v1738_v59 }
 0x1f8   : > { %v1765_v46 = vadd.f32 %v3694_v8, %v1736_v37  ;;  %v1737_v20 = vmul.f32 %v2642_v43, %v3688_v24 }
 0x1f9   : > { %v1836_v38 = vmax.f32 %v1767_v16, 0.0  ;;  %2004 = sbr.rel (!%p2922_p3) target bundleno = 525 (0x20d), region = 44 }
 0x1fa   : > { %v1834_v62 = vmax.f32 %v1765_v46, 0.0  ;;  %v1766_v48 = vadd.f32 %v3694_v8, %v1737_v20 }
 0x1fb   : > { %v1974_v22 = vsel %vm1951_vm6, %v1836_v38, 0.0 }
 0x1fc   : > { %1997 = vst.msk [vmem:[%s3704_s18 + $0xb0] sm:$0xff] %vm521_vm3, %v1974_v22  ;;  %v1972_v21 = vsel %vm1949_vm7, %v1834_v62, 0.0  ;;  %v1835_v49 = vmax.f32 %v1766_v48, 0.0 }
 0x1fd   : > { %1995 = vst.msk [vmem:[%s3704_s18 + $0xa0] sm:$0xff] %vm521_vm3, %v1972_v21 }
 0x1fe   : > { %v1973_v34 = vsel %vm1950_vm8, %v1835_v49, 0.0 }
 0x1ff   : > { %1996 = vst.msk [vmem:[%s3704_s18 + $0xa8] sm:$0xff] %vm521_vm3, %v1973_v34 }
 0x200 LB: >> { %v2125_v24 = vld [vmem:[%s3704_s18] sm:$0xff]  ;;  %v2127_v8 = vld [vmem:[%s3704_s18 + $0x8] sm:$0xff]  ;;  %v2129_v13 = vld [vmem:[%s3704_s18 + $0x10] sm:$0xff]  ;;  %s2119_s15 = sadd.s32 1, %s2855_s15   ;;  %s2855_s15 = sphi %s3802_s15, %s2119_s15  }
 0x201   : >> { %2126 = vst [vmem:[%s3800_s14] sm:$0xff] %v2125_v24  ;;  %2128 = vst [vmem:[%s3800_s14 + $0x8] sm:$0xff] %v2127_v8  ;;  %v2131_v33 = vld [vmem:[%s3704_s18 + $0x18] sm:$0xff]  ;;  %v2133_v57 = vld [vmem:[%s3704_s18 + $0x20] sm:$0xff]  ;;  %p2118_p9 = scmp.ge.s32.totalorder %s2119_s15, 1 }
 0x202   : >> { %2130 = vst [vmem:[%s3800_s14 + $0x10] sm:$0xff] %v2129_v13  ;;  %v2135_v9 = vld [vmem:[%s3704_s18 + $0x28] sm:$0xff]  ;;  %2132 = vst [vmem:[%s3800_s14 + $0x18] sm:$0xff] %v2131_v33  ;;  %v2137_v56 = vld [vmem:[%s3704_s18 + $0x30] sm:$0xff] }
 0x203   : >> { %2134 = vst [vmem:[%s3800_s14 + $0x20] sm:$0xff] %v2133_v57  ;;  %2136 = vst [vmem:[%s3800_s14 + $0x28] sm:$0xff] %v2135_v9  ;;  %v2139_v31 = vld [vmem:[%s3704_s18 + $0x38] sm:$0xff]  ;;  %v2141_v29 = vld [vmem:[%s3704_s18 + $0x40] sm:$0xff] }
 0x204   : >> { %2138 = vst [vmem:[%s3800_s14 + $0x30] sm:$0xff] %v2137_v56  ;;  %2140 = vst [vmem:[%s3800_s14 + $0x38] sm:$0xff] %v2139_v31  ;;  %v2143_v45 = vld [vmem:[%s3704_s18 + $0x48] sm:$0xff]  ;;  %v2145_v27 = vld [vmem:[%s3704_s18 + $0x50] sm:$0xff] }
 0x205   : >> { %2142 = vst [vmem:[%s3800_s14 + $0x40] sm:$0xff] %v2141_v29  ;;  %v2147_v55 = vld [vmem:[%s3704_s18 + $0x58] sm:$0xff]  ;;  %2144 = vst [vmem:[%s3800_s14 + $0x48] sm:$0xff] %v2143_v45  ;;  %v2149_v17 = vld [vmem:[%s3704_s18 + $0x60] sm:$0xff] }
 0x206   : >> { %2146 = vst [vmem:[%s3800_s14 + $0x50] sm:$0xff] %v2145_v27  ;;  %2148 = vst [vmem:[%s3800_s14 + $0x58] sm:$0xff] %v2147_v55  ;;  %v2151_v18 = vld [vmem:[%s3704_s18 + $0x68] sm:$0xff]  ;;  %v2153_v39 = vld [vmem:[%s3704_s18 + $0x70] sm:$0xff]  ;;  %2121 = sbr.rel (!%p2118_p9) target bundleno = 512 (0x200), region = 138 }
 0x207   : >> { %2150 = vst [vmem:[%s3800_s14 + $0x60] sm:$0xff] %v2149_v17  ;;  %2152 = vst [vmem:[%s3800_s14 + $0x68] sm:$0xff] %v2151_v18  ;;  %v2155_v28 = vld [vmem:[%s3704_s18 + $0x78] sm:$0xff]  ;;  %v2157_v61 = vld [vmem:[%s3704_s18 + $0x80] sm:$0xff] }
 0x208   : >> { %2154 = vst [vmem:[%s3800_s14 + $0x70] sm:$0xff] %v2153_v39  ;;  %v2159_v54 = vld [vmem:[%s3704_s18 + $0x88] sm:$0xff]  ;;  %2156 = vst [vmem:[%s3800_s14 + $0x78] sm:$0xff] %v2155_v28  ;;  %v2161_v23 = vld [vmem:[%s3704_s18 + $0x90] sm:$0xff] }
 0x209   : >> { %2158 = vst [vmem:[%s3800_s14 + $0x80] sm:$0xff] %v2157_v61  ;;  %2160 = vst [vmem:[%s3800_s14 + $0x88] sm:$0xff] %v2159_v54  ;;  %v2163_v2 = vld [vmem:[%s3704_s18 + $0x98] sm:$0xff]  ;;  %v2165_v41 = vld [vmem:[%s3704_s18 + $0xa0] sm:$0xff] }
 0x20a   : >> { %2162 = vst [vmem:[%s3800_s14 + $0x90] sm:$0xff] %v2161_v23  ;;  %2164 = vst [vmem:[%s3800_s14 + $0x98] sm:$0xff] %v2163_v2  ;;  %v2167_v42 = vld [vmem:[%s3704_s18 + $0xa8] sm:$0xff]  ;;  %v2169_v36 = vld [vmem:[%s3704_s18 + $0xb0] sm:$0xff] }
 0x20b   : >> { %2166 = vst [vmem:[%s3800_s14 + $0xa0] sm:$0xff] %v2165_v41  ;;  %2168 = vst [vmem:[%s3800_s14 + $0xa8] sm:$0xff] %v2167_v42 }
 0x20c   : >> { %2170 = vst [vmem:[%s3800_s14 + $0xb0] sm:$0xff] %v2169_v36 }
 0x20d PF: > { %s15_s22 = sadd.s32 1, %s2851_s22   ;;  %s3912_s18 = smov %s2839_s19 }
 0x20e   : > { %p12_p10 = scmp.ge.s32.totalorder %s15_s22, 4   ;;  %s3913_s19 = smov %s2931_s28 }
 0x20f   : > { %s3914_s20 = smov %s2847_s21  ;;  %s3915_s21 = smov %s3917_s24 }
 0x210   :  { %14 = sbr.rel (!%p12_p10) target bundleno = 3 (0x3), region = 160 }

</bundles_post_ra>
